<compile_context>
chip_gen: v7x
topology: tpu7x:2x2x1
jax: 0.10.0
libtpu: 0.0.40
codegen_flags: <defaults>
</compile_context>

<pallas_src>
import functools

import jax
import jax.numpy as jnp
from jax.experimental import pallas as pl
from jax.experimental.pallas import tpu as pltpu


def _decoder_kernel(z_ref, w1_ref, b1_ref, w2_ref, b2_ref,
                    w3_ref, b3_ref, w4_ref, b4_ref, o_ref):
    # bf16 operands -> MXU fast path; f32 accumulation and elementwise math.
    h = jnp.dot(z_ref[...], w1_ref[...], preferred_element_type=jnp.float32)
    h = jnp.maximum(h + b1_ref[...], 0.0)
    h = jnp.dot(h.astype(jnp.bfloat16), w2_ref[...],
                preferred_element_type=jnp.float32)
    h = jnp.maximum(h + b2_ref[...], 0.0)
    h = jnp.dot(h.astype(jnp.bfloat16), w3_ref[...],
                preferred_element_type=jnp.float32)
    h = jnp.maximum(h + b3_ref[...], 0.0)
    h = jnp.dot(h.astype(jnp.bfloat16), w4_ref[...],
                preferred_element_type=jnp.float32)
    logits = h + b4_ref[...]
    # Exact sigmoid via tanh: single EUP op, no overflow / approx error.
    sig = 0.5 * (jnp.tanh(0.5 * logits) + 1.0)
    o_ref[...] = sig.astype(o_ref.dtype)


def _round_up(x, m):
    return (x + m - 1) // m * m


@functools.partial(jax.jit, static_argnames=("tile_b",))
def decoder_forward(z, params, *, tile_b=256):
    """Pallas forward of Decoder.

    z: (B, z_dim) float32.
    params: (w1, b1, w2, b2, w3, b3, w4, b4) with wi: (fan_in, fan_out),
            bi: (fan_out,).
    """
    w1, b1, w2, b2, w3, b3, w4, b4 = params
    batch, z_dim = z.shape
    out_features = w4.shape[1]
    out_dtype = z.dtype

    # ---- batch tiling: multiple of 8 sublanes, >= 2 tiles for big batches
    # (so v7x's two TensorCores both get work on the "parallel" axis).
    tb = min(tile_b, _round_up(batch, 8))
    pb = _round_up(batch, tb)
    if pb >= 512 and pb // tb < 2:
        tb = _round_up(pb // 2, 8)
        pb = _round_up(batch, tb)

    # ---- lane-align the ragged dims: z_dim 100 -> 128, out 784 -> 896.
    zk = _round_up(z_dim, 128)
    no = _round_up(out_features, 128)

    zp = jnp.pad(z, ((0, pb - batch), (0, zk - z_dim)))
    w1p = jnp.pad(w1, ((0, zk - z_dim), (0, 0)))
    w4p = jnp.pad(w4, ((0, 0), (0, no - out_features)))
    b4p = jnp.pad(b4, ((0, no - out_features),))

    # bf16 for everything that feeds the MXU; biases stay f32 (as (1, N) rows
    # so they broadcast over the batch tile in-kernel).
    zp = zp.astype(jnp.bfloat16)
    w1p, w2b, w3b, w4p = (w.astype(jnp.bfloat16) for w in (w1p, w2, w3, w4p))
    b1r, b2r, b3r, b4r = (x.reshape(1, -1).astype(jnp.float32)
                          for x in (b1, b2, b3, b4p))

    def batch_spec(cols):
        return pl.BlockSpec((tb, cols), lambda i: (i, 0))

    def resident_spec(shape):
        # Block index never changes -> keep a single VMEM copy (no double
        # buffering), fetched once and reused across all grid steps.
        return pl.BlockSpec(shape, lambda i: (0, 0),
                            pipeline_mode=pl.Buffered(1))

    out = pl.pallas_call(
        _decoder_kernel,
        out_shape=jax.ShapeDtypeStruct((pb, no), out_dtype),
        grid_spec=pltpu.PrefetchScalarGridSpec(
            num_scalar_prefetch=0,
            grid=(pb // tb,),
            in_specs=[
                batch_spec(zk),
                resident_spec(w1p.shape), resident_spec(b1r.shape),
                resident_spec(w2b.shape), resident_spec(b2r.shape),
                resident_spec(w3b.shape), resident_spec(b3r.shape),
                resident_spec(w4p.shape), resident_spec(b4r.shape),
            ],
            out_specs=batch_spec(no),
        ),
        compiler_params=pltpu.CompilerParams(
            dimension_semantics=("parallel",),
            vmem_limit_bytes=32 * 1024 * 1024,
        ),
    )(zp, w1p, b1r, w2b, b2r, w3b, b3r, w4p, b4r)

    return out[:batch, :out_features]


def decoder_ref(z, params):
    """Pure-JAX f32 reference (mirrors the PyTorch forward)."""
    w1, b1, w2, b2, w3, b3, w4, b4 = params
    h = jnp.maximum(z @ w1 + b1, 0.0)
    h = jnp.maximum(h @ w2 + b2, 0.0)
    h = jnp.maximum(h @ w3 + b3, 0.0)
    return jax.nn.sigmoid(h @ w4 + b4)


if __name__ == "__main__":
    key = jax.random.PRNGKey(0)
    batch, z_dim, out_features = 2, 100, 784
    dims = (z_dim, 256, 512, 1024, out_features)

    keys = jax.random.split(key, 2 * (len(dims) - 1) + 1)
    params = []
    for li, (fan_in, fan_out) in enumerate(zip(dims[:-1], dims[1:])):
        bound = 1.0 / (fan_in ** 0.5)  # PyTorch nn.Linear default init range
        w = jax.random.uniform(keys[2 * li], (fan_in, fan_out),
                               jnp.float32, -bound, bound)
        bias = jax.random.uniform(keys[2 * li + 1], (fan_out,),
                                  jnp.float32, -bound, bound)
        params.extend([w, bias])
    params = tuple(params)

    z = jax.random.normal(keys[-1], (batch, z_dim), dtype=jnp.float32)

    y = decoder_forward(z, params)
    jax.block_until_ready(y)

    ref = decoder_ref(z, params)
    assert y.shape == (batch, out_features) and y.dtype == z.dtype
    # bf16 MXU matmuls (f32 accumulate) vs f32 reference: small abs slack on
    # the [0, 1] sigmoid outputs.
    err = float(jnp.max(jnp.abs(y - ref)))
    assert jnp.allclose(y, ref, atol=1e-2, rtol=0.0), err

    print("KERNEL_OK")
</pallas_src>

<mosaic_0001>
module attributes {stable_mosaic.version = 11 : i64} {
  func.func @_decoder_kernel(%arg0: i32, %arg1: memref<8x128xbf16, #tpu.memory_space<vmem>>, %arg2: memref<128x256xbf16, #tpu.memory_space<vmem>>, %arg3: memref<1x256xf32, #tpu.memory_space<vmem>>, %arg4: memref<256x512xbf16, #tpu.memory_space<vmem>>, %arg5: memref<1x512xf32, #tpu.memory_space<vmem>>, %arg6: memref<512x1024xbf16, #tpu.memory_space<vmem>>, %arg7: memref<1x1024xf32, #tpu.memory_space<vmem>>, %arg8: memref<1024x896xbf16, #tpu.memory_space<vmem>>, %arg9: memref<1x896xf32, #tpu.memory_space<vmem>>, %arg10: memref<8x896xf32, #tpu.memory_space<vmem>>) attributes {dimension_semantics = [#tpu.dimension_semantics<parallel>], iteration_bounds = array<i64: 1>, scalar_prefetch = 0 : i64, scratch_operands = 0 : i64, tpu.core_type = #tpu.core_type<tc>, window_params = [{transform_indices = @transform_0, window_bounds = array<i64: 8, 128>}, {pipeline_mode = #tpu.pipeline_mode<synchronous>, transform_indices = @transform_1, window_bounds = array<i64: 128, 256>}, {pipeline_mode = #tpu.pipeline_mode<synchronous>, transform_indices = @transform_2, window_bounds = array<i64: 1, 256>}, {pipeline_mode = #tpu.pipeline_mode<synchronous>, transform_indices = @transform_3, window_bounds = array<i64: 256, 512>}, {pipeline_mode = #tpu.pipeline_mode<synchronous>, transform_indices = @transform_4, window_bounds = array<i64: 1, 512>}, {pipeline_mode = #tpu.pipeline_mode<synchronous>, transform_indices = @transform_5, window_bounds = array<i64: 512, 1024>}, {pipeline_mode = #tpu.pipeline_mode<synchronous>, transform_indices = @transform_6, window_bounds = array<i64: 1, 1024>}, {pipeline_mode = #tpu.pipeline_mode<synchronous>, transform_indices = @transform_7, window_bounds = array<i64: 1024, 896>}, {pipeline_mode = #tpu.pipeline_mode<synchronous>, transform_indices = @transform_8, window_bounds = array<i64: 1, 896>}, {transform_indices = @transform_9, window_bounds = array<i64: 8, 896>}]} {
    %c0 = arith.constant 0 : index
    %c0_0 = arith.constant 0 : index
    %0 = vector.load %arg1[%c0, %c0_0] : memref<8x128xbf16, #tpu.memory_space<vmem>>, vector<8x128xbf16>
    %c0_1 = arith.constant 0 : index
    %c0_2 = arith.constant 0 : index
    %1 = vector.load %arg2[%c0_1, %c0_2] : memref<128x256xbf16, #tpu.memory_space<vmem>>, vector<128x256xbf16>
    %cst = arith.constant dense<0.000000e+00> : vector<8x256xf32>
    %2 = tpu.matmul %0, %1, %cst {dimension_numbers = #tpu.dot_dimension_numbers<[1], [0], [0], [1], [0, 0, 1, 1], [], []>} : vector<8x128xbf16>, vector<128x256xbf16>, vector<8x256xf32> -> vector<8x256xf32>
    %c0_3 = arith.constant 0 : index
    %c0_4 = arith.constant 0 : index
    %3 = vector.load %arg3[%c0_3, %c0_4] : memref<1x256xf32, #tpu.memory_space<vmem>>, vector<1x256xf32>
    %4 = vector.broadcast %3 : vector<1x256xf32> to vector<8x256xf32>
    %5 = arith.addf %2, %4 : vector<8x256xf32>
    %cst_5 = arith.constant 0.000000e+00 : f32
    %6 = vector.broadcast %cst_5 : f32 to vector<8x256xf32>
    %7 = arith.maximumf %5, %6 : vector<8x256xf32>
    %8 = arith.truncf %7 : vector<8x256xf32> to vector<8x256xbf16>
    %c0_6 = arith.constant 0 : index
    %c0_7 = arith.constant 0 : index
    %9 = vector.load %arg4[%c0_6, %c0_7] : memref<256x512xbf16, #tpu.memory_space<vmem>>, vector<256x512xbf16>
    %cst_8 = arith.constant dense<0.000000e+00> : vector<8x512xf32>
    %10 = tpu.matmul %8, %9, %cst_8 {dimension_numbers = #tpu.dot_dimension_numbers<[1], [0], [0], [1], [0, 0, 1, 1], [], []>} : vector<8x256xbf16>, vector<256x512xbf16>, vector<8x512xf32> -> vector<8x512xf32>
    %c0_9 = arith.constant 0 : index
    %c0_10 = arith.constant 0 : index
    %11 = vector.load %arg5[%c0_9, %c0_10] : memref<1x512xf32, #tpu.memory_space<vmem>>, vector<1x512xf32>
    %12 = vector.broadcast %11 : vector<1x512xf32> to vector<8x512xf32>
    %13 = arith.addf %10, %12 : vector<8x512xf32>
    %cst_11 = arith.constant 0.000000e+00 : f32
    %14 = vector.broadcast %cst_11 : f32 to vector<8x512xf32>
    %15 = arith.maximumf %13, %14 : vector<8x512xf32>
    %16 = arith.truncf %15 : vector<8x512xf32> to vector<8x512xbf16>
    %c0_12 = arith.constant 0 : index
    %c0_13 = arith.constant 0 : index
    %17 = vector.load %arg6[%c0_12, %c0_13] : memref<512x1024xbf16, #tpu.memory_space<vmem>>, vector<512x1024xbf16>
    %cst_14 = arith.constant dense<0.000000e+00> : vector<8x1024xf32>
    %18 = tpu.matmul %16, %17, %cst_14 {dimension_numbers = #tpu.dot_dimension_numbers<[1], [0], [0], [1], [0, 0, 1, 1], [], []>} : vector<8x512xbf16>, vector<512x1024xbf16>, vector<8x1024xf32> -> vector<8x1024xf32>
    %c0_15 = arith.constant 0 : index
    %c0_16 = arith.constant 0 : index
    %19 = vector.load %arg7[%c0_15, %c0_16] : memref<1x1024xf32, #tpu.memory_space<vmem>>, vector<1x1024xf32>
    %20 = vector.broadcast %19 : vector<1x1024xf32> to vector<8x1024xf32>
    %21 = arith.addf %18, %20 : vector<8x1024xf32>
    %cst_17 = arith.constant 0.000000e+00 : f32
    %22 = vector.broadcast %cst_17 : f32 to vector<8x1024xf32>
    %23 = arith.maximumf %21, %22 : vector<8x1024xf32>
    %24 = arith.truncf %23 : vector<8x1024xf32> to vector<8x1024xbf16>
    %c0_18 = arith.constant 0 : index
    %c0_19 = arith.constant 0 : index
    %25 = vector.load %arg8[%c0_18, %c0_19] : memref<1024x896xbf16, #tpu.memory_space<vmem>>, vector<1024x896xbf16>
    %cst_20 = arith.constant dense<0.000000e+00> : vector<8x896xf32>
    %26 = tpu.matmul %24, %25, %cst_20 {dimension_numbers = #tpu.dot_dimension_numbers<[1], [0], [0], [1], [0, 0, 1, 1], [], []>} : vector<8x1024xbf16>, vector<1024x896xbf16>, vector<8x896xf32> -> vector<8x896xf32>
    %c0_21 = arith.constant 0 : index
    %c0_22 = arith.constant 0 : index
    %27 = vector.load %arg9[%c0_21, %c0_22] : memref<1x896xf32, #tpu.memory_space<vmem>>, vector<1x896xf32>
    %28 = vector.broadcast %27 : vector<1x896xf32> to vector<8x896xf32>
    %29 = arith.addf %26, %28 : vector<8x896xf32>
    %cst_23 = arith.constant 5.000000e-01 : f32
    %30 = vector.broadcast %cst_23 : f32 to vector<8x896xf32>
    %31 = arith.mulf %30, %29 : vector<8x896xf32>
    %32 = math.tanh %31 : vector<8x896xf32>
    %cst_24 = arith.constant 1.000000e+00 : f32
    %33 = vector.broadcast %cst_24 : f32 to vector<8x896xf32>
    %34 = arith.addf %32, %33 : vector<8x896xf32>
    %cst_25 = arith.constant 5.000000e-01 : f32
    %35 = vector.broadcast %cst_25 : f32 to vector<8x896xf32>
    %36 = arith.mulf %35, %34 : vector<8x896xf32>
    %c0_26 = arith.constant 0 : index
    %c0_27 = arith.constant 0 : index
    %37 = vector.load %arg10[%c0_26, %c0_27] : memref<8x896xf32, #tpu.memory_space<vmem>>, vector<8x896xf32>
    tpu.vector_store %arg10[%c0_26, %c0_27], %36 {strides = array<i32>} : memref<8x896xf32, #tpu.memory_space<vmem>>, vector<8x896xf32>,
    return
  }
  func.func @transform_0(%arg0: i32) -> (i32, i32) {
    %c0_i32 = arith.constant 0 : i32
    %c0_i32_0 = arith.constant 0 : i32
    return %arg0, %c0_i32 : i32, i32
  }
  func.func @transform_1(%arg0: i32) -> (i32, i32) {
    %c0_i32 = arith.constant 0 : i32
    %c0_i32_0 = arith.constant 0 : i32
    %c0_i32_1 = arith.constant 0 : i32
    return %c0_i32, %c0_i32_0 : i32, i32
  }
  func.func @transform_2(%arg0: i32) -> (i32, i32) {
    %c0_i32 = arith.constant 0 : i32
    %c0_i32_0 = arith.constant 0 : i32
    %c0_i32_1 = arith.constant 0 : i32
    return %c0_i32, %c0_i32_0 : i32, i32
  }
  func.func @transform_3(%arg0: i32) -> (i32, i32) {
    %c0_i32 = arith.constant 0 : i32
    %c0_i32_0 = arith.constant 0 : i32
    %c0_i32_1 = arith.constant 0 : i32
    return %c0_i32, %c0_i32_0 : i32, i32
  }
  func.func @transform_4(%arg0: i32) -> (i32, i32) {
    %c0_i32 = arith.constant 0 : i32
    %c0_i32_0 = arith.constant 0 : i32
    %c0_i32_1 = arith.constant 0 : i32
    return %c0_i32, %c0_i32_0 : i32, i32
  }
  func.func @transform_5(%arg0: i32) -> (i32, i32) {
    %c0_i32 = arith.constant 0 : i32
    %c0_i32_0 = arith.constant 0 : i32
    %c0_i32_1 = arith.constant 0 : i32
    return %c0_i32, %c0_i32_0 : i32, i32
  }
  func.func @transform_6(%arg0: i32) -> (i32, i32) {
    %c0_i32 = arith.constant 0 : i32
    %c0_i32_0 = arith.constant 0 : i32
    %c0_i32_1 = arith.constant 0 : i32
    return %c0_i32, %c0_i32_0 : i32, i32
  }
  func.func @transform_7(%arg0: i32) -> (i32, i32) {
    %c0_i32 = arith.constant 0 : i32
    %c0_i32_0 = arith.constant 0 : i32
    %c0_i32_1 = arith.constant 0 : i32
    return %c0_i32, %c0_i32_0 : i32, i32
  }
  func.func @transform_8(%arg0: i32) -> (i32, i32) {
    %c0_i32 = arith.constant 0 : i32
    %c0_i32_0 = arith.constant 0 : i32
    %c0_i32_1 = arith.constant 0 : i32
    return %c0_i32, %c0_i32_0 : i32, i32
  }
  func.func @transform_9(%arg0: i32) -> (i32, i32) {
    %c0_i32 = arith.constant 0 : i32
    %c0_i32_0 = arith.constant 0 : i32
    return %arg0, %c0_i32 : i32, i32
  }
}

</mosaic_0001>

<bundles_post_ra>
// kernel: decoder_forward.1
= control target key start
LH: loop header
LB: loop body
LE: loop exit
PB: predicated region body
PF: predicated region fallthrough
CT: control target
= control target key end

     0   :  { %v7862_v1 = vmov 0   ;;  %s10474_s1 = inlined_call_operand.vmem [shape: bf16[128,256], index: 1, kind: input, shape index: {}]   ;;  %s10475_s3 = inlined_call_operand.vmem [shape: bf16[256,512], index: 3, kind: input, shape index: {}]   ;;  %s10476_s0 = inlined_call_operand.vmem [shape: bf16[8,128], index: 0, kind: input, shape index: {}]   ;;  %s10477_s5 = inlined_call_operand.vmem [shape: bf16[512,1024], index: 5, kind: input, shape index: {}]   ;;  %s10478_s2 = inlined_call_operand.vmem [shape: f32[1,256], index: 2, kind: input, shape index: {}]   ;;  %s10479_s4 = inlined_call_operand.vmem [shape: f32[1,512], index: 4, kind: input, shape index: {}]   ;;  %s10480_s7 = inlined_call_operand.vmem [shape: bf16[1024,896], index: 7, kind: input, shape index: {}]   ;;  %s10481_s6 = inlined_call_operand.vmem [shape: f32[1,1024], index: 6, kind: input, shape index: {}]   ;;  %s10482_s8 = inlined_call_operand.vmem [shape: f32[1,896], index: 8, kind: input, shape index: {}]   ;;  %s10483_s9 = inlined_call_operand.vmem [shape: f32[8,896], index: 9, kind: output, shape index: {}]  }
   0x1   :  { %v7088_v0 = vld [vmem:[%s10474_s1 + $0x4] ss:$8 sps:$4 sm:$0xff]   ;;  %174 = vmatprep.mubr.bf16.mxu0 %v7862_v1  ;;  %v7090_v2 = vld [vmem:[%s10474_s1] ss:$8 sps:$4 sm:$0xff]   ;;  %v7091_v3 = vld [vmem:[%s10474_s1 + $0x14] ss:$8 sps:$4 sm:$0xff]  }
   0x2   :  { %142 = vmatprep.subr.bf16.mxu0 %v7088_v0  ;;  %v7093_v4 = vld [vmem:[%s10474_s1 + $0x10] ss:$8 sps:$4 sm:$0xff]   ;;  %v7094_v5 = vld [vmem:[%s10474_s1 + $0x24] ss:$8 sps:$4 sm:$0xff]   ;;  %v7096_v6 = vld [vmem:[%s10474_s1 + $0x20] ss:$8 sps:$4 sm:$0xff]  }
   0x3   :  { %143 = vmatpush1.bf16.msra.mxu0 %v7090_v2  ;;  %v7097_v7 = vld [vmem:[%s10474_s1 + $0x34] ss:$8 sps:$4 sm:$0xff]   ;;  %v7099_v8 = vld [vmem:[%s10474_s1 + $0x30] ss:$8 sps:$4 sm:$0xff]   ;;  %v7100_v9 = vld [vmem:[%s10474_s1 + $0x44] ss:$8 sps:$4 sm:$0xff]  }
   0x4   :  { %144 = vmatprep.subr.bf16.mxu0 %v7091_v3  ;;  %v7102_v10 = vld [vmem:[%s10474_s1 + $0x40] ss:$8 sps:$4 sm:$0xff]   ;;  %v7103_v11 = vld [vmem:[%s10474_s1 + $0x54] ss:$8 sps:$4 sm:$0xff]   ;;  %v7105_v12 = vld [vmem:[%s10474_s1 + $0x50] ss:$8 sps:$4 sm:$0xff]  }
   0x5   :  { %v7106_v13 = vld [vmem:[%s10474_s1 + $0x64] ss:$8 sps:$4 sm:$0xff]   ;;  %v7108_v14 = vld [vmem:[%s10474_s1 + $0x60] ss:$8 sps:$4 sm:$0xff]   ;;  %v7109_v15 = vld [vmem:[%s10474_s1 + $0x74] ss:$8 sps:$4 sm:$0xff]  }
   0x6   :  { %v7111_v16 = vld [vmem:[%s10474_s1 + $0x70] ss:$8 sps:$4 sm:$0xff]   ;;  %v7114_v17 = vld [vmem:[%s10475_s3 + $0x4] ss:$16 sps:$4 sm:$0xff]   ;;  %v33_v18 = vld [vmem:[%s10476_s0] sm:$0xf] }
   0x7   :  { %145 = vmatpush1.bf16.msra.mxu0 %v7093_v4  ;;  %v7112_v19 = vld [vmem:[%s10475_s3] ss:$16 sps:$4 sm:$0xff]   ;;  %v7117_v20 = vld [vmem:[%s10475_s3 + $0x24] ss:$16 sps:$4 sm:$0xff]   ;;  %v7162_v50 = vld [vmem:[%s10475_s3 + $0xc] ss:$16 sps:$4 sm:$0xff]  }
   0x8   :  { %146 = vmatprep.subr.bf16.mxu0 %v7094_v5  ;;  %v7115_v21 = vld [vmem:[%s10475_s3 + $0x20] ss:$16 sps:$4 sm:$0xff]   ;;  %v7120_v22 = vld [vmem:[%s10475_s3 + $0x44] ss:$16 sps:$4 sm:$0xff]  }
   0x9   :  { %v7118_v23 = vld [vmem:[%s10475_s3 + $0x40] ss:$16 sps:$4 sm:$0xff]   ;;  %v7123_v24 = vld [vmem:[%s10475_s3 + $0x64] ss:$16 sps:$4 sm:$0xff]  }
   0xa   :  { %v7121_v25 = vld [vmem:[%s10475_s3 + $0x60] ss:$16 sps:$4 sm:$0xff]   ;;  %v7126_v26 = vld [vmem:[%s10475_s3 + $0x84] ss:$16 sps:$4 sm:$0xff]  }
   0xb   :  { %147 = vmatpush1.bf16.msra.mxu0 %v7096_v6  ;;  %v7124_v27 = vld [vmem:[%s10475_s3 + $0x80] ss:$16 sps:$4 sm:$0xff]   ;;  %v7129_v28 = vld [vmem:[%s10475_s3 + $0xa4] ss:$16 sps:$4 sm:$0xff]  }
   0xc   :  { %148 = vmatprep.subr.bf16.mxu0 %v7097_v7  ;;  %v7127_v29 = vld [vmem:[%s10475_s3 + $0xa0] ss:$16 sps:$4 sm:$0xff]   ;;  %v7132_v30 = vld [vmem:[%s10475_s3 + $0xc4] ss:$16 sps:$4 sm:$0xff]  }
   0xd   :  { %v7130_v31 = vld [vmem:[%s10475_s3 + $0xc0] ss:$16 sps:$4 sm:$0xff]   ;;  %v7135_v32 = vld [vmem:[%s10475_s3 + $0xe4] ss:$16 sps:$4 sm:$0xff]  }
   0xe   :  { %v7133_v33 = vld [vmem:[%s10475_s3 + $0xe0] ss:$16 sps:$4 sm:$0xff]   ;;  %v7138_v34 = vld [vmem:[%s10475_s3 + $0x104] ss:$16 sps:$4 sm:$0xff]  }
   0xf   :  { %149 = vmatpush1.bf16.msra.mxu0 %v7099_v8  ;;  %v7136_v35 = vld [vmem:[%s10475_s3 + $0x100] ss:$16 sps:$4 sm:$0xff]   ;;  %v7141_v36 = vld [vmem:[%s10475_s3 + $0x124] ss:$16 sps:$4 sm:$0xff]  }
  0x10   :  { %150 = vmatprep.subr.bf16.mxu0 %v7100_v9  ;;  %v7139_v37 = vld [vmem:[%s10475_s3 + $0x120] ss:$16 sps:$4 sm:$0xff]   ;;  %v7144_v38 = vld [vmem:[%s10475_s3 + $0x144] ss:$16 sps:$4 sm:$0xff]  }
  0x11   :  { %v7142_v39 = vld [vmem:[%s10475_s3 + $0x140] ss:$16 sps:$4 sm:$0xff]   ;;  %v7147_v40 = vld [vmem:[%s10475_s3 + $0x164] ss:$16 sps:$4 sm:$0xff]  }
  0x12   :  { %v7145_v41 = vld [vmem:[%s10475_s3 + $0x160] ss:$16 sps:$4 sm:$0xff]   ;;  %v7150_v42 = vld [vmem:[%s10475_s3 + $0x184] ss:$16 sps:$4 sm:$0xff]  }
  0x13   :  { %151 = vmatpush1.bf16.msra.mxu0 %v7102_v10  ;;  %v7148_v43 = vld [vmem:[%s10475_s3 + $0x180] ss:$16 sps:$4 sm:$0xff]   ;;  %v7153_v44 = vld [vmem:[%s10475_s3 + $0x1a4] ss:$16 sps:$4 sm:$0xff]  }
  0x14   :  { %152 = vmatprep.subr.bf16.mxu0 %v7103_v11  ;;  %v7151_v45 = vld [vmem:[%s10475_s3 + $0x1a0] ss:$16 sps:$4 sm:$0xff]   ;;  %v7156_v46 = vld [vmem:[%s10475_s3 + $0x1c4] ss:$16 sps:$4 sm:$0xff]  }
  0x15   :  { %v7154_v47 = vld [vmem:[%s10475_s3 + $0x1c0] ss:$16 sps:$4 sm:$0xff]   ;;  %v7159_v48 = vld [vmem:[%s10475_s3 + $0x1e4] ss:$16 sps:$4 sm:$0xff]  }
  0x16   :  { %v7157_v49 = vld [vmem:[%s10475_s3 + $0x1e0] ss:$16 sps:$4 sm:$0xff]  }
  0x17   :  { %153 = vmatpush1.bf16.msra.mxu0 %v7105_v12  ;;  %v683_v51 = vld [vmem:[%s10477_s5] sm:$0xff] }
  0x18   :  { %154 = vmatprep.subr.bf16.mxu0 %v7106_v13  ;;  %v687_v52 = vld [vmem:[%s10477_s5 + $0x20] sm:$0xff] }
  0x19   :  { %v6230_v53 = vcombine.high %v683_v51, %v687_v52  ;;  %v6229_v54 = vcombine.low %v683_v51, %v687_v52  ;;  %v691_v55 = vld [vmem:[%s10477_s5 + $0x40] sm:$0xff] }
  0x1a   :  { %v695_v56 = vld [vmem:[%s10477_s5 + $0x60] sm:$0xff] }
  0x1b   :  { %155 = vmatpush1.bf16.msra.mxu0 %v7108_v14  ;;  %v6238_v57 = vcombine.high %v691_v55, %v695_v56  ;;  %2261 = vmatprep.subr.bf16.mxu1 %v6230_v53  ;;  %v6237_v58 = vcombine.low %v691_v55, %v695_v56  ;;  %v699_v59 = vld [vmem:[%s10477_s5 + $0x80] sm:$0xff] }
  0x1c   :  { %156 = vmatprep.subr.bf16.mxu0 %v7109_v15  ;;  %2262 = vmatpush1.bf16.msra.mxu1 %v6229_v54  ;;  %v703_v60 = vld [vmem:[%s10477_s5 + $0xa0] sm:$0xff] }
  0x1d   :  { %2263 = vmatprep.subr.bf16.mxu1 %v6238_v57  ;;  %v6246_v61 = vcombine.high %v699_v59, %v703_v60  ;;  %v6245_v62 = vcombine.low %v699_v59, %v703_v60  ;;  %v707_v63 = vld [vmem:[%s10477_s5 + $0xc0] sm:$0xff]  ;;  %v7160_v59 = vld [vmem:[%s10475_s3 + $0x8] ss:$16 sps:$4 sm:$0xff]  }
  0x1e   :  { %v711_v0 = vld [vmem:[%s10477_s5 + $0xe0] sm:$0xff] }
  0x1f   :  { %157 = vmatpush1.bf16.msra.mxu0 %v7111_v16  ;;  %v6254_v1 = vcombine.high %v707_v63, %v711_v0  ;;  %v6253_v2 = vcombine.low %v707_v63, %v711_v0  ;;  %v715_v3 = vld [vmem:[%s10477_s5 + $0x100] sm:$0xff]  ;;  %v7168_v63 = vld [vmem:[%s10475_s3 + $0x4c] ss:$16 sps:$4 sm:$0xff]   ;;  %v7166_v0 = vld [vmem:[%s10475_s3 + $0x48] ss:$16 sps:$4 sm:$0xff]  }
  0x20   :  { %593 = vmatprep.subr.bf16.mxu0 %v7114_v17  ;;  %2264 = vmatpush1.bf16.msra.mxu1 %v6237_v58  ;;  %v719_v4 = vld [vmem:[%s10477_s5 + $0x120] sm:$0xff] }
  0x21   :  { %2265 = vmatprep.subr.bf16.mxu1 %v6246_v61  ;;  %v6262_v5 = vcombine.high %v715_v3, %v719_v4  ;;  %v6261_v6 = vcombine.low %v715_v3, %v719_v4  ;;  %v723_v7 = vld [vmem:[%s10477_s5 + $0x140] sm:$0xff]  ;;  %v7165_v61 = vld [vmem:[%s10475_s3 + $0x2c] ss:$16 sps:$4 sm:$0xff]   ;;  %v7172_v4 = vld [vmem:[%s10475_s3 + $0x88] ss:$16 sps:$4 sm:$0xff]  }
  0x22   :  { %175 = vmatmul.mubr.bf16.vlgmr.msra.gmra.mrb[0].mxu0 %v33_v18  ;;  %v727_v8 = vld [vmem:[%s10477_s5 + $0x160] sm:$0xff]  ;;  %v7174_v3 = vld [vmem:[%s10475_s3 + $0x8c] ss:$16 sps:$4 sm:$0xff]  }
  0x23   :  { %594 = vmatpush1.bf16.msra.mxu0 %v7112_v19  ;;  %v6270_v9 = vcombine.high %v723_v7, %v727_v8  ;;  %v6269_v10 = vcombine.low %v723_v7, %v727_v8  ;;  %v731_v11 = vld [vmem:[%s10477_s5 + $0x180] sm:$0xff]  ;;  %v7180_v7 = vld [vmem:[%s10475_s3 + $0xcc] ss:$16 sps:$4 sm:$0xff]   ;;  %v7178_v8 = vld [vmem:[%s10475_s3 + $0xc8] ss:$16 sps:$4 sm:$0xff]  }
  0x24   :  { %595 = vmatprep.subr.bf16.mxu0 %v7117_v20  ;;  %2266 = vmatpush1.bf16.msra.mxu1 %v6245_v62  ;;  %v735_v12 = vld [vmem:[%s10477_s5 + $0x1a0] sm:$0xff]  ;;  %v7163_v62 = vld [vmem:[%s10475_s3 + $0x28] ss:$16 sps:$4 sm:$0xff]  }
  0x25   :  { %2267 = vmatprep.subr.bf16.mxu1 %v6254_v1  ;;  %v6278_v13 = vcombine.high %v731_v11, %v735_v12  ;;  %v6277_v14 = vcombine.low %v731_v11, %v735_v12  ;;  %v739_v15 = vld [vmem:[%s10477_s5 + $0x1c0] sm:$0xff]  ;;  %v7171_v1 = vld [vmem:[%s10475_s3 + $0x6c] ss:$16 sps:$4 sm:$0xff]   ;;  %v7184_v12 = vld [vmem:[%s10475_s3 + $0x108] ss:$16 sps:$4 sm:$0xff]  }
  0x26   :  { %v743_v16 = vld [vmem:[%s10477_s5 + $0x1e0] sm:$0xff]  ;;  %v7186_v11 = vld [vmem:[%s10475_s3 + $0x10c] ss:$16 sps:$4 sm:$0xff]  }
  0x27   :  { %596 = vmatpush1.bf16.msra.mxu0 %v7115_v21  ;;  %v6286_v17 = vcombine.high %v739_v15, %v743_v16  ;;  %v6285_v18 = vcombine.low %v739_v15, %v743_v16  ;;  %v747_v19 = vld [vmem:[%s10477_s5 + $0x200] sm:$0xff]  ;;  %v7192_v15 = vld [vmem:[%s10475_s3 + $0x14c] ss:$16 sps:$4 sm:$0xff]   ;;  %v7190_v16 = vld [vmem:[%s10475_s3 + $0x148] ss:$16 sps:$4 sm:$0xff]  }
  0x28   :  { %597 = vmatprep.subr.bf16.mxu0 %v7120_v22  ;;  %2268 = vmatpush1.bf16.msra.mxu1 %v6253_v2  ;;  %v751_v20 = vld [vmem:[%s10477_s5 + $0x220] sm:$0xff]  ;;  %v7169_v2 = vld [vmem:[%s10475_s3 + $0x68] ss:$16 sps:$4 sm:$0xff]  }
  0x29   :  { %2269 = vmatprep.subr.bf16.mxu1 %v6262_v5  ;;  %v6294_v21 = vcombine.high %v747_v19, %v751_v20  ;;  %v6293_v22 = vcombine.low %v747_v19, %v751_v20  ;;  %v7177_v5 = vld [vmem:[%s10475_s3 + $0xac] ss:$16 sps:$4 sm:$0xff]   ;;  %v7196_v20 = vld [vmem:[%s10475_s3 + $0x188] ss:$16 sps:$4 sm:$0xff]  }
  0x2a   :  { %v7198_v19 = vld [vmem:[%s10475_s3 + $0x18c] ss:$16 sps:$4 sm:$0xff]  }
  0x2b   :  { %598 = vmatpush1.bf16.msra.mxu0 %v7118_v23  ;;  %v755_v23 = vld [vmem:[%s10477_s5 + $0x240] sm:$0xff] }
  0x2c   :  { %599 = vmatprep.subr.bf16.mxu0 %v7123_v24  ;;  %2270 = vmatpush1.bf16.msra.mxu1 %v6261_v6  ;;  %v759_v24 = vld [vmem:[%s10477_s5 + $0x260] sm:$0xff]  ;;  %v7175_v6 = vld [vmem:[%s10475_s3 + $0xa8] ss:$16 sps:$4 sm:$0xff]  }
  0x2d   :  { %2271 = vmatprep.subr.bf16.mxu1 %v6270_v9  ;;  %v7183_v9 = vld [vmem:[%s10475_s3 + $0xec] ss:$16 sps:$4 sm:$0xff]  }
  0x2f   :  { %600 = vmatpush1.bf16.msra.mxu0 %v7121_v25  ;;  %v6302_v25 = vcombine.high %v755_v23, %v759_v24 }
  0x30   :  { %601 = vmatprep.subr.bf16.mxu0 %v7126_v26  ;;  %2272 = vmatpush1.bf16.msra.mxu1 %v6269_v10  ;;  %v6301_v26 = vcombine.low %v755_v23, %v759_v24  ;;  %v7181_v10 = vld [vmem:[%s10475_s3 + $0xe8] ss:$16 sps:$4 sm:$0xff]   ;;  %v7204_v23 = vld [vmem:[%s10475_s3 + $0x1cc] ss:$16 sps:$4 sm:$0xff]  }
  0x31   :  { %2273 = vmatprep.subr.bf16.mxu1 %v6278_v13  ;;  %v7189_v13 = vld [vmem:[%s10475_s3 + $0x12c] ss:$16 sps:$4 sm:$0xff]   ;;  %v7202_v24 = vld [vmem:[%s10475_s3 + $0x1c8] ss:$16 sps:$4 sm:$0xff]  }
  0x33   :  { %602 = vmatpush1.bf16.msra.mxu0 %v7124_v27  ;;  %v763_v27 = vld [vmem:[%s10477_s5 + $0x280] sm:$0xff] }
  0x34   :  { %603 = vmatprep.subr.bf16.mxu0 %v7129_v28  ;;  %2274 = vmatpush1.bf16.msra.mxu1 %v6277_v14  ;;  %v767_v28 = vld [vmem:[%s10477_s5 + $0x2a0] sm:$0xff]  ;;  %v7187_v14 = vld [vmem:[%s10475_s3 + $0x128] ss:$16 sps:$4 sm:$0xff]  }
  0x35   :  { %2275 = vmatprep.subr.bf16.mxu1 %v6286_v17  ;;  %v7195_v17 = vld [vmem:[%s10475_s3 + $0x16c] ss:$16 sps:$4 sm:$0xff]  }
  0x37   :  { %604 = vmatpush1.bf16.msra.mxu0 %v7127_v29  ;;  %v6310_v29 = vcombine.high %v763_v27, %v767_v28 }
  0x38   :  { %605 = vmatprep.subr.bf16.mxu0 %v7132_v30  ;;  %2276 = vmatpush1.bf16.msra.mxu1 %v6285_v18  ;;  %v52_v30 = vlaneseq  ;;  %v7193_v18 = vld [vmem:[%s10475_s3 + $0x168] ss:$16 sps:$4 sm:$0xff]  }
  0x39   :  { %2277 = vmatprep.subr.bf16.mxu1 %v6294_v21  ;;  %v7201_v21 = vld [vmem:[%s10475_s3 + $0x1ac] ss:$16 sps:$4 sm:$0xff]  }
  0x3b   :  { %606 = vmatpush1.bf16.msra.mxu0 %v7130_v31  ;;  %v6309_v31 = vcombine.low %v763_v27, %v767_v28  ;;  %v688_v27 = vld [vmem:[%s10477_s5 + $0x28] sm:$0xff] }
  0x3c   :  { %607 = vmatprep.subr.bf16.mxu0 %v7135_v32  ;;  %2278 = vmatpush1.bf16.msra.mxu1 %v6293_v22  ;;  %v771_v32 = vld [vmem:[%s10477_s5 + $0x2c0] sm:$0xff]  ;;  %v7199_v22 = vld [vmem:[%s10475_s3 + $0x1a8] ss:$16 sps:$4 sm:$0xff]  }
  0x3d   :  { %2279 = vmatprep.subr.bf16.mxu1 %v6302_v25  ;;  %v7207_v25 = vld [vmem:[%s10475_s3 + $0x1ec] ss:$16 sps:$4 sm:$0xff]   ;;  %v7205_v28 = vld [vmem:[%s10475_s3 + $0x1e8] ss:$16 sps:$4 sm:$0xff]  }
  0x3f   :  { %608 = vmatpush1.bf16.msra.mxu0 %v7133_v33  ;;  %v775_v33 = vld [vmem:[%s10477_s5 + $0x2e0] sm:$0xff] }
  0x40   :  { %609 = vmatprep.subr.bf16.mxu0 %v7138_v34  ;;  %2280 = vmatpush1.bf16.msra.mxu1 %v6301_v26  ;;  %v6318_v34 = vcombine.high %v771_v32, %v775_v33  ;;  %v684_v26 = vld [vmem:[%s10477_s5 + $0x8] sm:$0xff] }
  0x41   :  { %2281 = vmatprep.subr.bf16.mxu1 %v6310_v29  ;;  %v6232_v29 = vcombine.high %v684_v26, %v688_v27 }
  0x43   :  { %610 = vmatpush1.bf16.msra.mxu0 %v7136_v35  ;;  %v8135_v35 = vshrl.u32 %v52_v30, 7  ;;  %v692_v30 = vld [vmem:[%s10477_s5 + $0x48] sm:$0xff] }
  0x44   :  { %611 = vmatprep.subr.bf16.mxu0 %v7141_v36  ;;  %2282 = vmatpush1.bf16.msra.mxu1 %v6309_v31  ;;  %v6317_v36 = vcombine.low %v771_v32, %v775_v33  ;;  %v696_v31 = vld [vmem:[%s10477_s5 + $0x68] sm:$0xff]  ;;  %v6231_v32 = vcombine.low %v684_v26, %v688_v27 }
  0x45   :  { %2283 = vmatprep.subr.bf16.mxu1 %v6318_v34  ;;  %v6240_v33 = vcombine.high %v692_v30, %v696_v31  ;;  %v700_v34 = vld [vmem:[%s10477_s5 + $0x88] sm:$0xff] }
  0x47   :  { %612 = vmatpush1.bf16.msra.mxu0 %v7139_v37  ;;  %v779_v37 = vld [vmem:[%s10477_s5 + $0x300] sm:$0xff] }
  0x48   :  { %613 = vmatprep.subr.bf16.mxu0 %v7144_v38  ;;  %v783_v38 = vld [vmem:[%s10477_s5 + $0x320] sm:$0xff]  ;;  %2284 = vmatpush1.bf16.msra.mxu1 %v6317_v36  ;;  %v704_v36 = vld [vmem:[%s10477_s5 + $0xa8] sm:$0xff] }
  0x4b   :  { %614 = vmatpush1.bf16.msra.mxu0 %v7142_v39  ;;  %v6326_v39 = vcombine.high %v779_v37, %v783_v38 }
  0x4c   :  { %615 = vmatprep.subr.bf16.mxu0 %v7147_v40  ;;  %v8144_v40 = vsub.s32 0, %v8135_v35 }
  0x4d   :  { %2285 = vmatprep.subr.bf16.mxu1 %v6326_v39  ;;  %v708_v39 = vld [vmem:[%s10477_s5 + $0xc8] sm:$0xff] }
  0x4f   :  { %616 = vmatpush1.bf16.msra.mxu0 %v7145_v41  ;;  %v50_v41 = vld [vmem:[%s10478_s2] sm:$0x3] }
  0x50   :  { %617 = vmatprep.subr.bf16.mxu0 %v7150_v42  ;;  %v8150_v42 = vsub.s32 1, %v8135_v35 }
  0x53   :  { %618 = vmatpush1.bf16.msra.mxu0 %v7148_v43  ;;  %v6325_v43 = vcombine.low %v779_v37, %v783_v38  ;;  %v6239_v37 = vcombine.low %v692_v30, %v696_v31  ;;  %v6248_v38 = vcombine.high %v700_v34, %v704_v36 }
  0x54   :  { %619 = vmatprep.subr.bf16.mxu0 %v7153_v44  ;;  %v787_v44 = vld [vmem:[%s10477_s5 + $0x340] sm:$0xff] }
  0x55   :  { %2286 = vmatpush1.bf16.msra.mxu1 %v6325_v43  ;;  %v6247_v43 = vcombine.low %v700_v34, %v704_v36 }
  0x57   :  { %620 = vmatpush1.bf16.msra.mxu0 %v7151_v45  ;;  %v791_v45 = vld [vmem:[%s10477_s5 + $0x360] sm:$0xff] }
  0x58   :  { %621 = vmatprep.subr.bf16.mxu0 %v7156_v46  ;;  %v6334_v46 = vcombine.high %v787_v44, %v791_v45 }
  0x5a   :  { %2287 = vmatprep.subr.bf16.mxu1 %v6334_v46  ;;  %v720_v46 = vld [vmem:[%s10477_s5 + $0x128] sm:$0xff] }
  0x5b   :  { %622 = vmatpush1.bf16.msra.mxu0 %v7154_v47  ;;  %v55_v47 = vrot.slane %v50_v41, %v8144_v40 }
  0x5c   :  { %623 = vmatprep.subr.bf16.mxu0 %v7159_v48  ;;  %v59_v48 = vrot.slane %v50_v41, %v8150_v42  ;;  %v712_v41 = vld [vmem:[%s10477_s5 + $0xe8] sm:$0xff] }
  0x5f   :  { %624 = vmatpush1.bf16.msra.mxu0 %v7157_v49  ;;  %v6333_v49 = vcombine.low %v787_v44, %v791_v45  ;;  %v6256_v44 = vcombine.high %v708_v39, %v712_v41  ;;  %v716_v45 = vld [vmem:[%s10477_s5 + $0x108] sm:$0xff] }
  0x60   :  { %634 = vmatprep.subr.bf16.mxu0 %v7162_v50 }
  0x61   :  { %2288 = vmatpush1.bf16.msra.mxu1 %v6333_v49  ;;  %v724_v49 = vld [vmem:[%s10477_s5 + $0x148] sm:$0xff] }
  0xf5   :  { %v176_v50 = vpop.f32.mrb[0].mxu0 }
  0xf6   :  { %v177_v51 = vadd.f32 %v176_v50, %v55_v47  ;;  %v178_v52 = vpop.f32.mrb[1].mxu0  ;;  %v6255_v47 = vcombine.low %v708_v39, %v712_v41  ;;  %v728_v50 = vld [vmem:[%s10477_s5 + $0x168] sm:$0xff] }
  0xf7   :  { %v179_v53 = vadd.f32 %v178_v52, %v59_v48  ;;  %v180_v54 = vpop.f32.mrb[2].mxu0  ;;  %v6264_v48 = vcombine.high %v716_v45, %v720_v46  ;;  %v6272_v52 = vcombine.high %v724_v49, %v728_v50 }
  0xf8   :  { %v183_v55 = vmax.f32 %v177_v51, 0.0  ;;  %v181_v56 = vpop.f32.mrb[3].mxu0  ;;  %v6263_v51 = vcombine.low %v716_v45, %v720_v46  ;;  %v736_v54 = vld [vmem:[%s10477_s5 + $0x1a8] sm:$0xff] }
  0xf9   :  { %v184_v57 = vmax.f32 %v179_v53, 0.0  ;;  %v732_v53 = vld [vmem:[%s10477_s5 + $0x188] sm:$0xff]  ;;  %v795_v56 = vld [vmem:[%s10477_s5 + $0x380] sm:$0xff] }
  0xfa   :  { %v8163_v60 = vpack.c.bf16 %v183_v55, %v183_v55  ;;  %v6271_v55 = vcombine.low %v724_v49, %v728_v50  ;;  %v8396_v49 = vld [vmem:[%s10479_s4] sm:$0xf] }
  0xfb   :  { %v186_v58 = vpack.c.bf16 %v184_v57, %v184_v57  ;;  %v799_v57 = vld [vmem:[%s10477_s5 + $0x3a0] sm:$0xff]  ;;  %v256_v50 = vrot.slane %v8396_v49, %v8144_v40 }
  0xfd   :  { %625 = vmatprep.mubr.bf16.mxu0 %v186_v58 }
  0xfe   :  { %626 = vmatmul.mubr.bf16.vlgmr.msra.gmra.mrb[4].mxu0 %v8163_v60 }
  0xff   :  { %635 = vmatpush1.bf16.msra.mxu0 %v7160_v59  ;;  %666 = vmatprep.mubr.bf16.mxu0 %v186_v58  ;;  %v6280_v58 = vcombine.high %v732_v53, %v736_v54  ;;  %v6342_v59 = vcombine.high %v795_v56, %v799_v57 }
 0x100   :  { %636 = vmatprep.subr.bf16.mxu0 %v7165_v61  ;;  %v744_v61 = vld [vmem:[%s10477_s5 + $0x1e8] sm:$0xff] }
 0x101   :  { %2289 = vmatprep.subr.bf16.mxu1 %v6342_v59  ;;  %v819_v59 = vld [vmem:[%s10477_s5 + $0x440] sm:$0xff] }
 0x103   :  { %637 = vmatpush1.bf16.msra.mxu0 %v7163_v62  ;;  %v6341_v62 = vcombine.low %v795_v56, %v799_v57 }
 0x104   :  { %638 = vmatprep.subr.bf16.mxu0 %v7168_v63  ;;  %v6279_v63 = vcombine.low %v732_v53, %v736_v54 }
 0x105   :  { %2290 = vmatpush1.bf16.msra.mxu1 %v6341_v62  ;;  %v820_v62 = vld [vmem:[%s10477_s5 + $0x448] sm:$0xff] }
 0x107   :  { %639 = vmatpush1.bf16.msra.mxu0 %v7166_v0  ;;  %v803_v0 = vld [vmem:[%s10477_s5 + $0x3c0] sm:$0xff] }
 0x108   :  { %640 = vmatprep.subr.bf16.mxu0 %v7171_v1  ;;  %v807_v1 = vld [vmem:[%s10477_s5 + $0x3e0] sm:$0xff] }
 0x10b   :  { %641 = vmatpush1.bf16.msra.mxu0 %v7169_v2 }
 0x10c   :  { %642 = vmatprep.subr.bf16.mxu0 %v7174_v3  ;;  %v6350_v3 = vcombine.high %v803_v0, %v807_v1 }
 0x10e   :  { %2291 = vmatprep.subr.bf16.mxu1 %v6350_v3 }
 0x10f   :  { %643 = vmatpush1.bf16.msra.mxu0 %v7172_v4  ;;  %v748_v4 = vld [vmem:[%s10477_s5 + $0x208] sm:$0xff] }
 0x110   :  { %644 = vmatprep.subr.bf16.mxu0 %v7177_v5  ;;  %v752_v5 = vld [vmem:[%s10477_s5 + $0x228] sm:$0xff] }
 0x113   :  { %645 = vmatpush1.bf16.msra.mxu0 %v7175_v6  ;;  %v6349_v6 = vcombine.low %v803_v0, %v807_v1 }
 0x114   :  { %646 = vmatprep.subr.bf16.mxu0 %v7180_v7 }
 0x115   :  { %2292 = vmatpush1.bf16.msra.mxu1 %v6349_v6  ;;  %v828_v6 = vld [vmem:[%s10477_s5 + $0x488] sm:$0xff] }
 0x117   :  { %647 = vmatpush1.bf16.msra.mxu0 %v7178_v8  ;;  %v8326_v8 = vld [vmem:[%s10477_s5 + $0x400] sm:$0xff] }
 0x118   :  { %648 = vmatprep.subr.bf16.mxu0 %v7183_v9  ;;  %v8331_v9 = vld [vmem:[%s10477_s5 + $0x420] sm:$0xff] }
 0x11b   :  { %649 = vmatpush1.bf16.msra.mxu0 %v7181_v10  ;;  %v8336_v10 = vld [vmem:[%s10477_s5 + $0x408] sm:$0xff] }
 0x11c   :  { %650 = vmatprep.subr.bf16.mxu0 %v7186_v11  ;;  %v6296_v11 = vcombine.high %v748_v4, %v752_v5 }
 0x11f   :  { %651 = vmatpush1.bf16.msra.mxu0 %v7184_v12  ;;  %v6358_v12 = vcombine.high %v8326_v8, %v8331_v9 }
 0x120   :  { %652 = vmatprep.subr.bf16.mxu0 %v7189_v13  ;;  %v8343_v13 = vld [vmem:[%s10477_s5 + $0x428] sm:$0xff] }
 0x121   :  { %2302 = vmatprep.subr.bf16.mxu1 %v6358_v12 }
 0x123   :  { %653 = vmatpush1.bf16.msra.mxu0 %v7187_v14  ;;  %v756_v14 = vld [vmem:[%s10477_s5 + $0x248] sm:$0xff] }
 0x124   :  { %654 = vmatprep.subr.bf16.mxu0 %v7192_v15  ;;  %v760_v15 = vld [vmem:[%s10477_s5 + $0x268] sm:$0xff] }
 0x127   :  { %655 = vmatpush1.bf16.msra.mxu0 %v7190_v16  ;;  %v6357_v16 = vcombine.low %v8326_v8, %v8331_v9  ;;  %v836_v8 = vld [vmem:[%s10477_s5 + $0x4c8] sm:$0xff] }
 0x128   :  { %656 = vmatprep.subr.bf16.mxu0 %v7195_v17  ;;  %v6359_v17 = vcombine.low %v8336_v10, %v8343_v13  ;;  %v840_v9 = vld [vmem:[%s10477_s5 + $0x4e8] sm:$0xff] }
 0x12b   :  { %657 = vmatpush1.bf16.msra.mxu0 %v7193_v18  ;;  %v6295_v18 = vcombine.low %v748_v4, %v752_v5  ;;  %v827_v4 = vld [vmem:[%s10477_s5 + $0x480] sm:$0xff] }
 0x12c   :  { %658 = vmatprep.subr.bf16.mxu0 %v7198_v19  ;;  %v6304_v19 = vcombine.high %v756_v14, %v760_v15  ;;  %v831_v5 = vld [vmem:[%s10477_s5 + $0x4a0] sm:$0xff] }
 0x12f   :  { %659 = vmatpush1.bf16.msra.mxu0 %v7196_v20  ;;  %v764_v20 = vld [vmem:[%s10477_s5 + $0x288] sm:$0xff] }
 0x130   :  { %660 = vmatprep.subr.bf16.mxu0 %v7201_v21  ;;  %v768_v21 = vld [vmem:[%s10477_s5 + $0x2a8] sm:$0xff] }
 0x131   :  { %v6311_v26 = vcombine.low %v764_v20, %v768_v21 }
 0x133   :  { %661 = vmatpush1.bf16.msra.mxu0 %v7199_v22  ;;  %v6303_v22 = vcombine.low %v756_v14, %v760_v15  ;;  %v6374_v14 = vcombine.high %v827_v4, %v831_v5 }
 0x134   :  { %662 = vmatprep.subr.bf16.mxu0 %v7204_v23  ;;  %v6312_v23 = vcombine.high %v764_v20, %v768_v21  ;;  %v843_v20 = vld [vmem:[%s10477_s5 + $0x500] sm:$0xff] }
 0x135   :  { %v847_v21 = vld [vmem:[%s10477_s5 + $0x520] sm:$0xff] }
 0x137   :  { %663 = vmatpush1.bf16.msra.mxu0 %v7202_v24  ;;  %v772_v24 = vld [vmem:[%s10477_s5 + $0x2c8] sm:$0xff] }
 0x138   :  { %664 = vmatprep.subr.bf16.mxu0 %v7207_v25  ;;  %v776_v25 = vld [vmem:[%s10477_s5 + $0x2e8] sm:$0xff] }
 0x139   :  { %v6320_v27 = vcombine.high %v772_v24, %v776_v25  ;;  %v6319_v30 = vcombine.low %v772_v24, %v776_v25  ;;  %v6383_v25 = vcombine.low %v836_v8, %v840_v9 }
 0x13b   :  { %665 = vmatpush1.bf16.msra.mxu0 %v7205_v28  ;;  %v780_v28 = vld [vmem:[%s10477_s5 + $0x308] sm:$0xff] }
 0x13c   :  { %2343 = vmatprep.subr.bf16.mxu0 %v6232_v29  ;;  %v784_v29 = vld [vmem:[%s10477_s5 + $0x328] sm:$0xff] }
 0x13d   :  { %v6328_v31 = vcombine.high %v780_v28, %v784_v29  ;;  %v6327_v34 = vcombine.low %v780_v28, %v784_v29  ;;  %v851_v28 = vld [vmem:[%s10477_s5 + $0x540] sm:$0xff] }
 0x13e   :  { %667 = vmatmul.mubr.bf16.vlgmr.msra.gmra.mrb[8].mxu0 %v8163_v60  ;;  %v740_v60 = vld [vmem:[%s10477_s5 + $0x1c8] sm:$0xff]  ;;  %v855_v29 = vld [vmem:[%s10477_s5 + $0x560] sm:$0xff] }
 0x13f   :  { %2344 = vmatpush1.bf16.msra.mxu0 %v6231_v32  ;;  %v6288_v2 = vcombine.high %v740_v60, %v744_v61  ;;  %v6287_v7 = vcombine.low %v740_v60, %v744_v61  ;;  %v788_v32 = vld [vmem:[%s10477_s5 + $0x348] sm:$0xff]  ;;  %v823_v61 = vld [vmem:[%s10477_s5 + $0x460] sm:$0xff] }
 0x140   :  { %2345 = vmatprep.subr.bf16.mxu0 %v6240_v33  ;;  %v792_v33 = vld [vmem:[%s10477_s5 + $0x368] sm:$0xff] }
 0x141   :  { %v6336_v36 = vcombine.high %v788_v32, %v792_v33  ;;  %v6335_v39 = vcombine.low %v788_v32, %v792_v33  ;;  %v6389_v32 = vcombine.low %v843_v20, %v847_v21 }
 0x143   :  { %2346 = vmatpush1.bf16.msra.mxu0 %v6239_v37  ;;  %v796_v37 = vld [vmem:[%s10477_s5 + $0x388] sm:$0xff] }
 0x144   :  { %2347 = vmatprep.subr.bf16.mxu0 %v6248_v38  ;;  %v800_v38 = vld [vmem:[%s10477_s5 + $0x3a8] sm:$0xff] }
 0x145   :  { %v6344_v41 = vcombine.high %v796_v37, %v800_v38  ;;  %v6343_v45 = vcombine.low %v796_v37, %v800_v38  ;;  %v859_v37 = vld [vmem:[%s10477_s5 + $0x580] sm:$0xff] }
 0x146   :  { %v863_v38 = vld [vmem:[%s10477_s5 + $0x5a0] sm:$0xff] }
 0x147   :  { %2348 = vmatpush1.bf16.msra.mxu0 %v6247_v43  ;;  %v804_v43 = vld [vmem:[%s10477_s5 + $0x3c8] sm:$0xff] }
 0x148   :  { %2349 = vmatprep.subr.bf16.mxu0 %v6256_v44  ;;  %v808_v44 = vld [vmem:[%s10477_s5 + $0x3e8] sm:$0xff] }
 0x149   :  { %v6352_v46 = vcombine.high %v804_v43, %v808_v44 }
 0x14b   :  { %2350 = vmatpush1.bf16.msra.mxu0 %v6255_v47  ;;  %v6351_v47 = vcombine.low %v804_v43, %v808_v44  ;;  %v6397_v43 = vcombine.low %v851_v28, %v855_v29 }
 0x14c   :  { %2351 = vmatprep.subr.bf16.mxu0 %v6264_v48  ;;  %v6360_v48 = vcombine.high %v8336_v10, %v8343_v13  ;;  %v6373_v10 = vcombine.low %v827_v4, %v831_v5  ;;  %v884_v4 = vld [vmem:[%s10477_s5 + $0x648] sm:$0xff] }
 0x14d   :  { %v888_v5 = vld [vmem:[%s10477_s5 + $0x668] sm:$0xff] }
 0x14f   :  { %2352 = vmatpush1.bf16.msra.mxu0 %v6263_v51  ;;  %v260_v51 = vrot.slane %v8396_v49, %v8150_v42 }
 0x150   :  { %2353 = vmatprep.subr.bf16.mxu0 %v6272_v52 }
 0x153   :  { %2354 = vmatpush1.bf16.msra.mxu0 %v6271_v55 }
 0x154   :  { %2355 = vmatprep.subr.bf16.mxu0 %v6280_v58 }
 0x157   :  { %2356 = vmatpush1.bf16.msra.mxu0 %v6279_v63  ;;  %v824_v63 = vld [vmem:[%s10477_s5 + $0x468] sm:$0xff] }
 0x158   :  { %2357 = vmatprep.subr.bf16.mxu0 %v6288_v2  ;;  %v6366_v2 = vcombine.high %v819_v59, %v823_v61  ;;  %v6368_v3 = vcombine.high %v820_v62, %v824_v63  ;;  %v6367_v12 = vcombine.low %v820_v62, %v824_v63 }
 0x15b   :  { %2358 = vmatpush1.bf16.msra.mxu0 %v6287_v7  ;;  %v832_v7 = vld [vmem:[%s10477_s5 + $0x4a8] sm:$0xff] }
 0x15c   :  { %2359 = vmatprep.subr.bf16.mxu0 %v6296_v11  ;;  %v6365_v11 = vcombine.low %v819_v59, %v823_v61  ;;  %v6376_v15 = vcombine.high %v828_v6, %v832_v7  ;;  %v6375_v13 = vcombine.low %v828_v6, %v832_v7  ;;  %v880_v59 = vld [vmem:[%s10477_s5 + $0x628] sm:$0xff] }
 0x15f   :  { %2360 = vmatpush1.bf16.msra.mxu0 %v6295_v18  ;;  %v835_v18 = vld [vmem:[%s10477_s5 + $0x4c0] sm:$0xff] }
 0x160   :  { %2361 = vmatprep.subr.bf16.mxu0 %v6304_v19  ;;  %v839_v19 = vld [vmem:[%s10477_s5 + $0x4e0] sm:$0xff] }
 0x161   :  { %v6381_v24 = vcombine.low %v835_v18, %v839_v19 }
 0x163   :  { %2362 = vmatpush1.bf16.msra.mxu0 %v6303_v22  ;;  %v844_v22 = vld [vmem:[%s10477_s5 + $0x508] sm:$0xff] }
 0x164   :  { %2363 = vmatprep.subr.bf16.mxu0 %v6312_v23  ;;  %v848_v23 = vld [vmem:[%s10477_s5 + $0x528] sm:$0xff] }
 0x165   :  { %v6391_v33 = vcombine.low %v844_v22, %v848_v23 }
 0x167   :  { %2364 = vmatpush1.bf16.msra.mxu0 %v6311_v26  ;;  %v6390_v26 = vcombine.high %v843_v20, %v847_v21  ;;  %v900_v20 = vld [vmem:[%s10477_s5 + $0x6c8] sm:$0xff] }
 0x168   :  { %2365 = vmatprep.subr.bf16.mxu0 %v6320_v27  ;;  %v6392_v27 = vcombine.high %v844_v22, %v848_v23  ;;  %v904_v21 = vld [vmem:[%s10477_s5 + $0x6e8] sm:$0xff] }
 0x16b   :  { %2366 = vmatpush1.bf16.msra.mxu0 %v6319_v30  ;;  %v852_v30 = vld [vmem:[%s10477_s5 + $0x548] sm:$0xff] }
 0x16c   :  { %2367 = vmatprep.subr.bf16.mxu0 %v6328_v31  ;;  %v856_v31 = vld [vmem:[%s10477_s5 + $0x568] sm:$0xff] }
 0x16d   :  { %v6399_v44 = vcombine.low %v852_v30, %v856_v31 }
 0x16f   :  { %2368 = vmatpush1.bf16.msra.mxu0 %v6327_v34  ;;  %v6398_v34 = vcombine.high %v851_v28, %v855_v29  ;;  %v908_v28 = vld [vmem:[%s10477_s5 + $0x708] sm:$0xff] }
 0x170   :  { %2369 = vmatprep.subr.bf16.mxu0 %v6336_v36  ;;  %v6400_v36 = vcombine.high %v852_v30, %v856_v31  ;;  %v912_v29 = vld [vmem:[%s10477_s5 + $0x728] sm:$0xff]  ;;  %v6447_v31 = vcombine.low %v900_v20, %v904_v21 }
 0x173   :  { %2370 = vmatpush1.bf16.msra.mxu0 %v6335_v39  ;;  %v860_v39 = vld [vmem:[%s10477_s5 + $0x588] sm:$0xff] }
 0x174   :  { %2371 = vmatprep.subr.bf16.mxu0 %v6344_v41  ;;  %v864_v41 = vld [vmem:[%s10477_s5 + $0x5a8] sm:$0xff] }
 0x177   :  { %2372 = vmatpush1.bf16.msra.mxu0 %v6343_v45  ;;  %v6406_v45 = vcombine.high %v859_v37, %v863_v38 }
 0x178   :  { %2373 = vmatprep.subr.bf16.mxu0 %v6352_v46  ;;  %v6408_v46 = vcombine.high %v860_v39, %v864_v41 }
 0x17b   :  { %2374 = vmatpush1.bf16.msra.mxu0 %v6351_v47  ;;  %v867_v47 = vld [vmem:[%s10477_s5 + $0x5c0] sm:$0xff] }
 0x17c   :  { %2384 = vmatprep.subr.bf16.mxu0 %v6360_v48  ;;  %v871_v48 = vld [vmem:[%s10477_s5 + $0x5e0] sm:$0xff] }
 0x1d1   :  { %v627_v52 = vpop.f32.mrb[4].mxu0 }
 0x1d2   :  { %v628_v53 = vadd.f32 %v627_v52, %v256_v50  ;;  %v629_v54 = vpop.f32.mrb[5].mxu0  ;;  %v868_v50 = vld [vmem:[%s10477_s5 + $0x5c8] sm:$0xff]  ;;  %v6405_v52 = vcombine.low %v859_v37, %v863_v38 }
 0x1d3   :  { %v630_v55 = vadd.f32 %v629_v54, %v260_v51  ;;  %v631_v56 = vpop.f32.mrb[6].mxu0  ;;  %v872_v51 = vld [vmem:[%s10477_s5 + $0x5e8] sm:$0xff]  ;;  %v6414_v54 = vcombine.high %v867_v47, %v871_v48 }
 0x1d4   :  { %v675_v57 = vmax.f32 %v628_v53, 0.0  ;;  %v632_v58 = vpop.f32.mrb[7].mxu0  ;;  %v6407_v53 = vcombine.low %v860_v39, %v864_v41  ;;  %v875_v56 = vld [vmem:[%s10477_s5 + $0x600] sm:$0xff]  ;;  %v6415_v61 = vcombine.low %v868_v50, %v872_v51  ;;  %v916_v37 = vld [vmem:[%s10477_s5 + $0x748] sm:$0xff]  ;;  %v6455_v41 = vcombine.low %v908_v28, %v912_v29 }
 0x1d5   :  { %v676_v60 = vmax.f32 %v630_v55, 0.0  ;;  %v6416_v55 = vcombine.high %v868_v50, %v872_v51  ;;  %v876_v58 = vld [vmem:[%s10477_s5 + $0x608] sm:$0xff]  ;;  %v8585_v50 = vsub.s32 2, %v8135_v35 }
 0x1d6   :  { %v8416_v1 = vpack.c.bf16 %v675_v57, %v675_v57  ;;  %v879_v57 = vld [vmem:[%s10477_s5 + $0x620] sm:$0xff]  ;;  %v6424_v63 = vcombine.high %v876_v58, %v880_v59  ;;  %v6423_v7 = vcombine.low %v876_v58, %v880_v59  ;;  %v920_v38 = vld [vmem:[%s10477_s5 + $0x768] sm:$0xff] }
 0x1d7   :  { %v8414_v0 = vpack.c.bf16 %v676_v60, %v676_v60  ;;  %v6413_v60 = vcombine.low %v867_v47, %v871_v48  ;;  %v6422_v62 = vcombine.high %v875_v56, %v879_v57  ;;  %v6421_v6 = vcombine.low %v875_v56, %v879_v57  ;;  %v924_v47 = vld [vmem:[%s10477_s5 + $0x788] sm:$0xff]  ;;  %v931_v56 = vld [vmem:[%s10477_s5 + $0x7c0] sm:$0xff] }
 0x1d8   :  { %v928_v48 = vld [vmem:[%s10477_s5 + $0x7a8] sm:$0xff]  ;;  %v935_v57 = vld [vmem:[%s10477_s5 + $0x7e0] sm:$0xff] }
 0x1d9   :  { %2293 = vmatprep.mubr.bf16.mxu1 %v8414_v0  ;;  %2375 = vmatprep.mubr.bf16.mxu0 %v8414_v0  ;;  %v932_v58 = vld [vmem:[%s10477_s5 + $0x7c8] sm:$0xff] }
 0x1da   :  { %2294 = vmatmul.mubr.bf16.vlgmr.msra.gmra.mrb[0].mxu1 %v8416_v1  ;;  %2376 = vmatmul.mubr.bf16.vlgmr.msra.gmra.mrb[12].mxu0 %v8416_v1  ;;  %v936_v59 = vld [vmem:[%s10477_s5 + $0x7e8] sm:$0xff] }
 0x1db   :  { %2303 = vmatpush1.bf16.msra.mxu1 %v6357_v16  ;;  %2385 = vmatpush1.bf16.msra.mxu0 %v6359_v17  ;;  %v6382_v16 = vcombine.high %v835_v18, %v839_v19  ;;  %v6384_v17 = vcombine.high %v836_v8, %v840_v9  ;;  %v892_v18 = vld [vmem:[%s10477_s5 + $0x688] sm:$0xff]  ;;  %v6431_v9 = vcombine.low %v884_v4, %v888_v5 }
 0x1dc   :  { %2304 = vmatprep.subr.bf16.mxu1 %v6366_v2  ;;  %2386 = vmatprep.subr.bf16.mxu0 %v6368_v3  ;;  %v883_v2 = vld [vmem:[%s10477_s5 + $0x640] sm:$0xff]  ;;  %v896_v19 = vld [vmem:[%s10477_s5 + $0x6a8] sm:$0xff] }
 0x1dd   :  { %v887_v3 = vld [vmem:[%s10477_s5 + $0x660] sm:$0xff]  ;;  %v6439_v23 = vcombine.low %v892_v18, %v896_v19 }
 0x1de   :  { %v6429_v8 = vcombine.low %v883_v2, %v887_v3 }
 0x1df   :  { %2305 = vmatpush1.bf16.msra.mxu1 %v6365_v11  ;;  %2387 = vmatpush1.bf16.msra.mxu0 %v6367_v12  ;;  %v6430_v11 = vcombine.high %v883_v2, %v887_v3  ;;  %v6432_v12 = vcombine.high %v884_v4, %v888_v5  ;;  %v6478_v2 = vcombine.high %v931_v56, %v935_v57  ;;  %v685_v4 = vld [vmem:[%s10477_s5 + $0x10] sm:$0xff] }
 0x1e0   :  { %2306 = vmatprep.subr.bf16.mxu1 %v6374_v14  ;;  %2388 = vmatprep.subr.bf16.mxu0 %v6376_v15  ;;  %v891_v14 = vld [vmem:[%s10477_s5 + $0x680] sm:$0xff]  ;;  %v6480_v3 = vcombine.high %v932_v58, %v936_v59 }
 0x1e1   :  { %v895_v15 = vld [vmem:[%s10477_s5 + $0x6a0] sm:$0xff] }
 0x1e2   :  { %v6437_v22 = vcombine.low %v891_v14, %v895_v15 }
 0x1e3   :  { %2307 = vmatpush1.bf16.msra.mxu1 %v6373_v10  ;;  %2389 = vmatpush1.bf16.msra.mxu0 %v6375_v13  ;;  %v6438_v10 = vcombine.high %v891_v14, %v895_v15  ;;  %v6440_v13 = vcombine.high %v892_v18, %v896_v19  ;;  %v6477_v18 = vcombine.low %v931_v56, %v935_v57  ;;  %v725_v57 = vld [vmem:[%s10477_s5 + $0x150] sm:$0xff] }
 0x1e4   :  { %2308 = vmatprep.subr.bf16.mxu1 %v6382_v16  ;;  %2390 = vmatprep.subr.bf16.mxu0 %v6384_v17  ;;  %v899_v16 = vld [vmem:[%s10477_s5 + $0x6c0] sm:$0xff]  ;;  %v6479_v19 = vcombine.low %v932_v58, %v936_v59  ;;  %v729_v59 = vld [vmem:[%s10477_s5 + $0x170] sm:$0xff] }
 0x1e5   :  { %v903_v17 = vld [vmem:[%s10477_s5 + $0x6e0] sm:$0xff] }
 0x1e6   :  { %v6445_v30 = vcombine.low %v899_v16, %v903_v17 }
 0x1e7   :  { %2309 = vmatpush1.bf16.msra.mxu1 %v6381_v24  ;;  %2391 = vmatpush1.bf16.msra.mxu0 %v6383_v25  ;;  %v6446_v24 = vcombine.high %v899_v16, %v903_v17  ;;  %v6448_v25 = vcombine.high %v900_v20, %v904_v21  ;;  %v693_v17 = vld [vmem:[%s10477_s5 + $0x50] sm:$0xff]  ;;  %v694_v21 = vld [vmem:[%s10477_s5 + $0x58] sm:$0xff] }
 0x1e8   :  { %2310 = vmatprep.subr.bf16.mxu1 %v6390_v26  ;;  %2392 = vmatprep.subr.bf16.mxu0 %v6392_v27  ;;  %v907_v26 = vld [vmem:[%s10477_s5 + $0x700] sm:$0xff]  ;;  %v697_v20 = vld [vmem:[%s10477_s5 + $0x70] sm:$0xff] }
 0x1e9   :  { %v911_v27 = vld [vmem:[%s10477_s5 + $0x720] sm:$0xff] }
 0x1ea   :  { %v6453_v39 = vcombine.low %v907_v26, %v911_v27 }
 0x1eb   :  { %2311 = vmatpush1.bf16.msra.mxu1 %v6389_v32  ;;  %2393 = vmatpush1.bf16.msra.mxu0 %v6391_v33  ;;  %v6454_v32 = vcombine.high %v907_v26, %v911_v27  ;;  %v6456_v33 = vcombine.high %v908_v28, %v912_v29  ;;  %v6242_v27 = vcombine.high %v693_v17, %v697_v20  ;;  %v701_v29 = vld [vmem:[%s10477_s5 + $0x90] sm:$0xff] }
 0x1ec   :  { %2312 = vmatprep.subr.bf16.mxu1 %v6398_v34  ;;  %2394 = vmatprep.subr.bf16.mxu0 %v6400_v36  ;;  %v915_v34 = vld [vmem:[%s10477_s5 + $0x740] sm:$0xff] }
 0x1ed   :  { %v919_v36 = vld [vmem:[%s10477_s5 + $0x760] sm:$0xff] }
 0x1ee   :  { %v6461_v51 = vcombine.low %v915_v34, %v919_v36 }
 0x1ef   :  { %2313 = vmatpush1.bf16.msra.mxu1 %v6397_v43  ;;  %2395 = vmatpush1.bf16.msra.mxu0 %v6399_v44  ;;  %v6462_v43 = vcombine.high %v915_v34, %v919_v36  ;;  %v6464_v44 = vcombine.high %v916_v37, %v920_v38 }
 0x1f0   :  { %2314 = vmatprep.subr.bf16.mxu1 %v6406_v45  ;;  %2396 = vmatprep.subr.bf16.mxu0 %v6408_v46  ;;  %v923_v45 = vld [vmem:[%s10477_s5 + $0x780] sm:$0xff] }
 0x1f1   :  { %v927_v46 = vld [vmem:[%s10477_s5 + $0x7a0] sm:$0xff] }
 0x1f3   :  { %2315 = vmatpush1.bf16.msra.mxu1 %v6405_v52  ;;  %2397 = vmatpush1.bf16.msra.mxu0 %v6407_v53  ;;  %v6463_v52 = vcombine.low %v916_v37, %v920_v38  ;;  %v8588_v53 = vsub.s32 3, %v8135_v35  ;;  %v709_v37 = vld [vmem:[%s10477_s5 + $0xd0] sm:$0xff] }
 0x1f4   :  { %2316 = vmatprep.subr.bf16.mxu1 %v6414_v54  ;;  %2398 = vmatprep.subr.bf16.mxu0 %v6416_v55  ;;  %v6470_v54 = vcombine.high %v923_v45, %v927_v46  ;;  %v6472_v55 = vcombine.high %v924_v47, %v928_v48 }
 0x1f7   :  { %2317 = vmatpush1.bf16.msra.mxu1 %v6413_v60  ;;  %2399 = vmatpush1.bf16.msra.mxu0 %v6415_v61  ;;  %v264_v60 = vrot.slane %v8396_v49, %v8585_v50  ;;  %v268_v61 = vrot.slane %v8396_v49, %v8588_v53  ;;  %v690_v49 = vld [vmem:[%s10477_s5 + $0x38] sm:$0xff] }
 0x1f8   :  { %2318 = vmatprep.subr.bf16.mxu1 %v6422_v62  ;;  %2400 = vmatprep.subr.bf16.mxu0 %v6424_v63  ;;  %v6469_v62 = vcombine.low %v923_v45, %v927_v46  ;;  %v6471_v63 = vcombine.low %v924_v47, %v928_v48  ;;  %v717_v46 = vld [vmem:[%s10477_s5 + $0x110] sm:$0xff] }
 0x1f9   :  { %v721_v48 = vld [vmem:[%s10477_s5 + $0x130] sm:$0xff] }
 0x1fa   :  { %v6266_v56 = vcombine.high %v717_v46, %v721_v48 }
 0x1fb   :  { %2319 = vmatpush1.bf16.msra.mxu1 %v6421_v6  ;;  %2401 = vmatpush1.bf16.msra.mxu0 %v6423_v7  ;;  %v689_v6 = vld [vmem:[%s10477_s5 + $0x30] sm:$0xff]  ;;  %v686_v7 = vld [vmem:[%s10477_s5 + $0x18] sm:$0xff] }
 0x1fc   :  { %2320 = vmatprep.subr.bf16.mxu1 %v6430_v11  ;;  %2402 = vmatprep.subr.bf16.mxu0 %v6432_v12  ;;  %v6235_v26 = vcombine.low %v686_v7, %v690_v49 }
 0x1ff   :  { %2321 = vmatpush1.bf16.msra.mxu1 %v6429_v8  ;;  %2403 = vmatpush1.bf16.msra.mxu0 %v6431_v9 }
 0x200   :  { %2322 = vmatprep.subr.bf16.mxu1 %v6438_v10  ;;  %2404 = vmatprep.subr.bf16.mxu0 %v6440_v13  ;;  %v6234_v10 = vcombine.high %v685_v4, %v689_v6  ;;  %v6236_v13 = vcombine.high %v686_v7, %v690_v49  ;;  %v738_v7 = vld [vmem:[%s10477_s5 + $0x1b8] sm:$0xff]  ;;  %v6273_v49 = vcombine.low %v725_v57, %v729_v59 }
 0x203   :  { %2323 = vmatpush1.bf16.msra.mxu1 %v6437_v22  ;;  %2405 = vmatpush1.bf16.msra.mxu0 %v6439_v23  ;;  %v698_v22 = vld [vmem:[%s10477_s5 + $0x78] sm:$0xff] }
 0x204   :  { %2324 = vmatprep.subr.bf16.mxu1 %v6446_v24  ;;  %2406 = vmatprep.subr.bf16.mxu0 %v6448_v25  ;;  %v6233_v24 = vcombine.low %v685_v4, %v689_v6  ;;  %v6244_v28 = vcombine.high %v694_v21, %v698_v22  ;;  %v6243_v34 = vcombine.low %v694_v21, %v698_v22  ;;  %v737_v4 = vld [vmem:[%s10477_s5 + $0x1b0] sm:$0xff]  ;;  %v754_v22 = vld [vmem:[%s10477_s5 + $0x238] sm:$0xff] }
 0x207   :  { %2325 = vmatpush1.bf16.msra.mxu1 %v6445_v30  ;;  %2407 = vmatpush1.bf16.msra.mxu0 %v6447_v31  ;;  %v705_v30 = vld [vmem:[%s10477_s5 + $0xb0] sm:$0xff]  ;;  %v702_v31 = vld [vmem:[%s10477_s5 + $0x98] sm:$0xff] }
 0x208   :  { %2326 = vmatprep.subr.bf16.mxu1 %v6454_v32  ;;  %2408 = vmatprep.subr.bf16.mxu0 %v6456_v33  ;;  %v706_v32 = vld [vmem:[%s10477_s5 + $0xb8] sm:$0xff]  ;;  %v6241_v33 = vcombine.low %v693_v17, %v697_v20  ;;  %v6250_v36 = vcombine.high %v701_v29, %v705_v30  ;;  %v753_v17 = vld [vmem:[%s10477_s5 + $0x230] sm:$0xff] }
 0x209   :  { %v6252_v38 = vcombine.high %v702_v31, %v706_v32  ;;  %v750_v20 = vld [vmem:[%s10477_s5 + $0x218] sm:$0xff] }
 0x20b   :  { %2327 = vmatpush1.bf16.msra.mxu1 %v6453_v39  ;;  %2409 = vmatpush1.bf16.msra.mxu0 %v6455_v41  ;;  %v713_v39 = vld [vmem:[%s10477_s5 + $0xf0] sm:$0xff]  ;;  %v710_v41 = vld [vmem:[%s10477_s5 + $0xd8] sm:$0xff] }
 0x20c   :  { %2328 = vmatprep.subr.bf16.mxu1 %v6462_v43  ;;  %2410 = vmatprep.subr.bf16.mxu0 %v6464_v44  ;;  %v6249_v43 = vcombine.low %v701_v29, %v705_v30  ;;  %v6251_v44 = vcombine.low %v702_v31, %v706_v32  ;;  %v6258_v45 = vcombine.high %v709_v37, %v713_v39  ;;  %v761_v29 = vld [vmem:[%s10477_s5 + $0x270] sm:$0xff]  ;;  %v758_v30 = vld [vmem:[%s10477_s5 + $0x258] sm:$0xff] }
 0x20d   :  { %v6300_v31 = vcombine.high %v750_v20, %v754_v22  ;;  %v762_v32 = vld [vmem:[%s10477_s5 + $0x278] sm:$0xff] }
 0x20f   :  { %2329 = vmatpush1.bf16.msra.mxu1 %v6461_v51  ;;  %2411 = vmatpush1.bf16.msra.mxu0 %v6463_v52  ;;  %v718_v51 = vld [vmem:[%s10477_s5 + $0x118] sm:$0xff] }
 0x210   :  { %2330 = vmatprep.subr.bf16.mxu1 %v6470_v54  ;;  %2412 = vmatprep.subr.bf16.mxu0 %v6472_v55  ;;  %v722_v52 = vld [vmem:[%s10477_s5 + $0x138] sm:$0xff]  ;;  %v6257_v54 = vcombine.low %v709_v37, %v713_v39  ;;  %v765_v37 = vld [vmem:[%s10477_s5 + $0x290] sm:$0xff] }
 0x211   :  { %v668_v5 = vpop.f32.mrb[8].mxu0  ;;  %v6268_v58 = vcombine.high %v718_v51, %v722_v52  ;;  %v766_v39 = vld [vmem:[%s10477_s5 + $0x298] sm:$0xff] }
 0x212   :  { %v669_v11 = vadd.f32 %v668_v5, %v264_v60  ;;  %v670_v12 = vpop.f32.mrb[9].mxu0  ;;  %v726_v60 = vld [vmem:[%s10477_s5 + $0x158] sm:$0xff] }
 0x213   :  { %v671_v14 = vadd.f32 %v670_v12, %v268_v61  ;;  %v672_v15 = vpop.f32.mrb[10].mxu0  ;;  %2331 = vmatpush1.bf16.msra.mxu1 %v6469_v62  ;;  %2413 = vmatpush1.bf16.msra.mxu0 %v6471_v63  ;;  %v730_v61 = vld [vmem:[%s10477_s5 + $0x178] sm:$0xff]  ;;  %v6265_v62 = vcombine.low %v717_v46, %v721_v48  ;;  %v6267_v63 = vcombine.low %v718_v51, %v722_v52  ;;  %v773_v46 = vld [vmem:[%s10477_s5 + $0x2d0] sm:$0xff] }
 0x214   :  { %v677_v8 = vmax.f32 %v669_v11, 0.0  ;;  %v673_v9 = vpop.f32.mrb[11].mxu0  ;;  %2332 = vmatprep.subr.bf16.mxu1 %v6478_v2  ;;  %2414 = vmatprep.subr.bf16.mxu0 %v6480_v3  ;;  %v6274_v2 = vcombine.high %v725_v57, %v729_v59  ;;  %v733_v3 = vld [vmem:[%s10477_s5 + $0x190] sm:$0xff]  ;;  %v734_v5 = vld [vmem:[%s10477_s5 + $0x198] sm:$0xff]  ;;  %v6276_v6 = vcombine.high %v726_v60, %v730_v61  ;;  %v6275_v11 = vcombine.low %v726_v60, %v730_v61 }
 0x215   :  { %v678_v16 = vmax.f32 %v671_v14, 0.0  ;;  %v6282_v12 = vcombine.high %v733_v3, %v737_v4  ;;  %v741_v14 = vld [vmem:[%s10477_s5 + $0x1d0] sm:$0xff]  ;;  %v6281_v9 = vcombine.low %v733_v3, %v737_v4  ;;  %v774_v48 = vld [vmem:[%s10477_s5 + $0x2d8] sm:$0xff] }
 0x216   :  { %v8632_v25 = vpack.c.bf16 %v677_v8, %v677_v8  ;;  %v745_v15 = vld [vmem:[%s10477_s5 + $0x1f0] sm:$0xff]  ;;  %v746_v8 = vld [vmem:[%s10477_s5 + $0x1f8] sm:$0xff] }
 0x217   :  { %v8630_v23 = vpack.c.bf16 %v678_v16, %v678_v16  ;;  %2333 = vmatpush1.bf16.msra.mxu1 %v6477_v18  ;;  %2415 = vmatpush1.bf16.msra.mxu0 %v6479_v19  ;;  %v742_v18 = vld [vmem:[%s10477_s5 + $0x1d8] sm:$0xff]  ;;  %v6284_v19 = vcombine.high %v734_v5, %v738_v7  ;;  %v749_v16 = vld [vmem:[%s10477_s5 + $0x210] sm:$0xff] }
 0x218   :  { %2425 = vmatprep.subr.bf16.mxu1 %v6234_v10  ;;  %2507 = vmatprep.subr.bf16.mxu0 %v6236_v13  ;;  %v6283_v10 = vcombine.low %v734_v5, %v738_v7  ;;  %v6290_v13 = vcombine.high %v741_v14, %v745_v15  ;;  %v6292_v21 = vcombine.high %v742_v18, %v746_v8  ;;  %v778_v52 = vld [vmem:[%s10477_s5 + $0x2f8] sm:$0xff]  ;;  %v781_v57 = vld [vmem:[%s10477_s5 + $0x310] sm:$0xff] }
 0x219   :  { %2334 = vmatprep.mubr.bf16.mxu1 %v8630_v23  ;;  %2416 = vmatprep.mubr.bf16.mxu0 %v8630_v23  ;;  %v782_v59 = vld [vmem:[%s10477_s5 + $0x318] sm:$0xff]  ;;  %v6324_v60 = vcombine.high %v774_v48, %v778_v52  ;;  %v789_v3 = vld [vmem:[%s10477_s5 + $0x350] sm:$0xff] }
 0x21a   :  { %2335 = vmatmul.mubr.bf16.vlgmr.msra.gmra.mrb[0].mxu1 %v8632_v25  ;;  %2417 = vmatmul.mubr.bf16.vlgmr.msra.gmra.mrb[12].mxu0 %v8632_v25  ;;  %v786_v61 = vld [vmem:[%s10477_s5 + $0x338] sm:$0xff]  ;;  %v793_v4 = vld [vmem:[%s10477_s5 + $0x370] sm:$0xff] }
 0x21b   :  { %2426 = vmatpush1.bf16.msra.mxu1 %v6233_v24  ;;  %2457 = vmatprep.mubr.bf16.mxu1 %v8414_v0  ;;  %v6289_v24 = vcombine.low %v741_v14, %v745_v15  ;;  %v790_v5 = vld [vmem:[%s10477_s5 + $0x358] sm:$0xff]  ;;  %v797_v14 = vld [vmem:[%s10477_s5 + $0x390] sm:$0xff] }
 0x21c   :  { %2508 = vmatpush1.bf16.msra.mxu0 %v6235_v26  ;;  %2539 = vmatprep.mubr.bf16.mxu0 %v8414_v0  ;;  %v714_v0 = vld [vmem:[%s10477_s5 + $0xf8] sm:$0xff]  ;;  %v6291_v26 = vcombine.low %v742_v18, %v746_v8  ;;  %v801_v15 = vld [vmem:[%s10477_s5 + $0x3b0] sm:$0xff] }
 0x21d   :  { %2427 = vmatprep.subr.bf16.mxu1 %v6242_v27  ;;  %2509 = vmatprep.subr.bf16.mxu0 %v6244_v28  ;;  %v6260_v47 = vcombine.high %v710_v41, %v714_v0  ;;  %v6259_v55 = vcombine.low %v710_v41, %v714_v0  ;;  %v6298_v27 = vcombine.high %v749_v16, %v753_v17  ;;  %v757_v28 = vld [vmem:[%s10477_s5 + $0x250] sm:$0xff]  ;;  %v770_v0 = vld [vmem:[%s10477_s5 + $0x2b8] sm:$0xff] }
 0x21e   :  { %v6308_v41 = vcombine.high %v758_v30, %v762_v32  ;;  %v6316_v51 = vcombine.high %v766_v39, %v770_v0  ;;  %v794_v7 = vld [vmem:[%s10477_s5 + $0x378] sm:$0xff] }
 0x21f   :  { %2428 = vmatpush1.bf16.msra.mxu1 %v6241_v33  ;;  %v6297_v33 = vcombine.low %v749_v16, %v753_v17  ;;  %v798_v18 = vld [vmem:[%s10477_s5 + $0x398] sm:$0xff]  ;;  %v805_v16 = vld [vmem:[%s10477_s5 + $0x3d0] sm:$0xff] }
 0x220   :  { %2510 = vmatpush1.bf16.msra.mxu0 %v6243_v34  ;;  %2429 = vmatprep.subr.bf16.mxu1 %v6250_v36  ;;  %v6299_v34 = vcombine.low %v750_v20, %v754_v22  ;;  %v6306_v36 = vcombine.high %v757_v28, %v761_v29  ;;  %v802_v8 = vld [vmem:[%s10477_s5 + $0x3b8] sm:$0xff]  ;;  %v809_v17 = vld [vmem:[%s10477_s5 + $0x3f0] sm:$0xff] }
 0x221   :  { %2511 = vmatprep.subr.bf16.mxu0 %v6252_v38  ;;  %v769_v38 = vld [vmem:[%s10477_s5 + $0x2b0] sm:$0xff]  ;;  %v806_v20 = vld [vmem:[%s10477_s5 + $0x3d8] sm:$0xff] }
 0x222   :  { %v810_v22 = vld [vmem:[%s10477_s5 + $0x3f8] sm:$0xff] }
 0x223   :  { %2430 = vmatpush1.bf16.msra.mxu1 %v6249_v43  ;;  %v6305_v43 = vcombine.low %v757_v28, %v761_v29  ;;  %v6347_v28 = vcombine.low %v798_v18, %v802_v8  ;;  %v6354_v29 = vcombine.high %v805_v16, %v809_v17 }
 0x224   :  { %2512 = vmatpush1.bf16.msra.mxu0 %v6251_v44  ;;  %2431 = vmatprep.subr.bf16.mxu1 %v6258_v45  ;;  %v6307_v44 = vcombine.low %v758_v30, %v762_v32  ;;  %v6314_v45 = vcombine.high %v765_v37, %v769_v38  ;;  %v814_v30 = vld [vmem:[%s10477_s5 + $0x418] sm:$0xff] }
 0x225   :  { %2513 = vmatprep.subr.bf16.mxu0 %v6260_v47  ;;  %v777_v47 = vld [vmem:[%s10477_s5 + $0x2f0] sm:$0xff]  ;;  %v818_v32 = vld [vmem:[%s10477_s5 + $0x438] sm:$0xff] }
 0x227   :  { %2432 = vmatpush1.bf16.msra.mxu1 %v6257_v54  ;;  %v6313_v54 = vcombine.low %v765_v37, %v769_v38  ;;  %v821_v37 = vld [vmem:[%s10477_s5 + $0x450] sm:$0xff] }
 0x228   :  { %2514 = vmatpush1.bf16.msra.mxu0 %v6259_v55  ;;  %2433 = vmatprep.subr.bf16.mxu1 %v6266_v56  ;;  %v6315_v55 = vcombine.low %v766_v39, %v770_v0  ;;  %v6322_v56 = vcombine.high %v773_v46, %v777_v47  ;;  %v825_v38 = vld [vmem:[%s10477_s5 + $0x470] sm:$0xff]  ;;  %v6364_v39 = vcombine.high %v814_v30, %v818_v32  ;;  %v826_v0 = vld [vmem:[%s10477_s5 + $0x478] sm:$0xff] }
 0x229   :  { %2515 = vmatprep.subr.bf16.mxu0 %v6268_v58  ;;  %v785_v58 = vld [vmem:[%s10477_s5 + $0x330] sm:$0xff] }
 0x22b   :  { %2434 = vmatpush1.bf16.msra.mxu1 %v6265_v62  ;;  %v6321_v62 = vcombine.low %v773_v46, %v777_v47  ;;  %v6363_v46 = vcombine.low %v814_v30, %v818_v32  ;;  %v830_v47 = vld [vmem:[%s10477_s5 + $0x498] sm:$0xff] }
 0x22c   :  { %2516 = vmatpush1.bf16.msra.mxu0 %v6267_v63  ;;  %2435 = vmatprep.subr.bf16.mxu1 %v6274_v2  ;;  %v6323_v63 = vcombine.low %v774_v48, %v778_v52  ;;  %v6330_v2 = vcombine.high %v781_v57, %v785_v58  ;;  %v834_v48 = vld [vmem:[%s10477_s5 + $0x4b8] sm:$0xff] }
 0x22d   :  { %2517 = vmatprep.subr.bf16.mxu0 %v6276_v6  ;;  %v6332_v6 = vcombine.high %v782_v59, %v786_v61  ;;  %v874_v30 = vld [vmem:[%s10477_s5 + $0x5f8] sm:$0xff] }
 0x22f   :  { %2436 = vmatpush1.bf16.msra.mxu1 %v6273_v49  ;;  %v6329_v49 = vcombine.low %v781_v57, %v785_v58 }
 0x230   :  { %2518 = vmatpush1.bf16.msra.mxu0 %v6275_v11  ;;  %2437 = vmatprep.subr.bf16.mxu1 %v6282_v12  ;;  %v6331_v11 = vcombine.low %v782_v59, %v786_v61  ;;  %v6338_v12 = vcombine.high %v789_v3, %v793_v4  ;;  %v838_v59 = vld [vmem:[%s10477_s5 + $0x4d8] sm:$0xff] }
 0x231   :  { %2519 = vmatprep.subr.bf16.mxu0 %v6284_v19  ;;  %v6340_v19 = vcombine.high %v790_v5, %v794_v7 }
 0x233   :  { %2438 = vmatpush1.bf16.msra.mxu1 %v6281_v9  ;;  %v6337_v9 = vcombine.low %v789_v3, %v793_v4  ;;  %v850_v4 = vld [vmem:[%s10477_s5 + $0x538] sm:$0xff] }
 0x234   :  { %2520 = vmatpush1.bf16.msra.mxu0 %v6283_v10  ;;  %2439 = vmatprep.subr.bf16.mxu1 %v6290_v13  ;;  %v6339_v10 = vcombine.low %v790_v5, %v794_v7  ;;  %v6346_v13 = vcombine.high %v797_v14, %v801_v15  ;;  %v853_v7 = vld [vmem:[%s10477_s5 + $0x550] sm:$0xff] }
 0x235   :  { %2521 = vmatprep.subr.bf16.mxu0 %v6292_v21  ;;  %v6348_v21 = vcombine.high %v798_v18, %v802_v8  ;;  %v861_v8 = vld [vmem:[%s10477_s5 + $0x590] sm:$0xff] }
 0x237   :  { %2440 = vmatpush1.bf16.msra.mxu1 %v6289_v24  ;;  %v6345_v24 = vcombine.low %v797_v14, %v801_v15  ;;  %v854_v14 = vld [vmem:[%s10477_s5 + $0x558] sm:$0xff] }
 0x238   :  { %2522 = vmatpush1.bf16.msra.mxu0 %v6291_v26  ;;  %2441 = vmatprep.subr.bf16.mxu1 %v6298_v27  ;;  %v813_v26 = vld [vmem:[%s10477_s5 + $0x410] sm:$0xff]  ;;  %v858_v15 = vld [vmem:[%s10477_s5 + $0x578] sm:$0xff] }
 0x239   :  { %2523 = vmatprep.subr.bf16.mxu0 %v6300_v31  ;;  %v817_v27 = vld [vmem:[%s10477_s5 + $0x430] sm:$0xff]  ;;  %v6356_v31 = vcombine.high %v806_v20, %v810_v22 }
 0x23b   :  { %2442 = vmatpush1.bf16.msra.mxu1 %v6297_v33  ;;  %v6353_v33 = vcombine.low %v805_v16, %v809_v17  ;;  %v862_v16 = vld [vmem:[%s10477_s5 + $0x598] sm:$0xff] }
 0x23c   :  { %2524 = vmatpush1.bf16.msra.mxu0 %v6299_v34  ;;  %2443 = vmatprep.subr.bf16.mxu1 %v6306_v36  ;;  %v6355_v34 = vcombine.low %v806_v20, %v810_v22  ;;  %v6362_v36 = vcombine.high %v813_v26, %v817_v27  ;;  %v866_v17 = vld [vmem:[%s10477_s5 + $0x5b8] sm:$0xff]  ;;  %v6404_v20 = vcombine.high %v854_v14, %v858_v15 }
 0x23d   :  { %2525 = vmatprep.subr.bf16.mxu0 %v6308_v41  ;;  %v822_v41 = vld [vmem:[%s10477_s5 + $0x458] sm:$0xff]  ;;  %v6403_v22 = vcombine.low %v854_v14, %v858_v15  ;;  %v6411_v32 = vcombine.low %v862_v16, %v866_v17 }
 0x23e   :  { %v6372_v52 = vcombine.high %v822_v41, %v826_v0  ;;  %v6371_v57 = vcombine.low %v822_v41, %v826_v0 }
 0x23f   :  { %2444 = vmatpush1.bf16.msra.mxu1 %v6305_v43  ;;  %v6361_v43 = vcombine.low %v813_v26, %v817_v27  ;;  %v6412_v26 = vcombine.high %v862_v16, %v866_v17  ;;  %v869_v27 = vld [vmem:[%s10477_s5 + $0x5d0] sm:$0xff] }
 0x240   :  { %2526 = vmatpush1.bf16.msra.mxu0 %v6307_v44  ;;  %2445 = vmatprep.subr.bf16.mxu1 %v6314_v45  ;;  %v829_v44 = vld [vmem:[%s10477_s5 + $0x490] sm:$0xff] }
 0x241   :  { %2527 = vmatprep.subr.bf16.mxu0 %v6316_v51  ;;  %v833_v45 = vld [vmem:[%s10477_s5 + $0x4b0] sm:$0xff]  ;;  %v6370_v51 = vcombine.high %v821_v37, %v825_v38 }
 0x242   :  { %v6378_v58 = vcombine.high %v829_v44, %v833_v45  ;;  %v6377_v61 = vcombine.low %v829_v44, %v833_v45  ;;  %v885_v45 = vld [vmem:[%s10477_s5 + $0x650] sm:$0xff] }
 0x243   :  { %2446 = vmatpush1.bf16.msra.mxu1 %v6313_v54  ;;  %v6369_v54 = vcombine.low %v821_v37, %v825_v38  ;;  %v881_v37 = vld [vmem:[%s10477_s5 + $0x630] sm:$0xff]  ;;  %v878_v38 = vld [vmem:[%s10477_s5 + $0x618] sm:$0xff] }
 0x244   :  { %2528 = vmatpush1.bf16.msra.mxu0 %v6315_v55  ;;  %2447 = vmatprep.subr.bf16.mxu1 %v6322_v56  ;;  %v837_v55 = vld [vmem:[%s10477_s5 + $0x4d0] sm:$0xff] }
 0x245   :  { %2529 = vmatprep.subr.bf16.mxu0 %v6324_v60  ;;  %v841_v56 = vld [vmem:[%s10477_s5 + $0x4f0] sm:$0xff]  ;;  %v6380_v60 = vcombine.high %v830_v47, %v834_v48 }
 0x246   :  { %v6386_v3 = vcombine.high %v837_v55, %v841_v56 }
 0x247   :  { %2448 = vmatpush1.bf16.msra.mxu1 %v6321_v62  ;;  %v845_v62 = vld [vmem:[%s10477_s5 + $0x510] sm:$0xff] }
 0x248   :  { %2530 = vmatpush1.bf16.msra.mxu0 %v6323_v63  ;;  %2449 = vmatprep.subr.bf16.mxu1 %v6330_v2  ;;  %v849_v63 = vld [vmem:[%s10477_s5 + $0x530] sm:$0xff]  ;;  %v6379_v2 = vcombine.low %v830_v47, %v834_v48  ;;  %v886_v47 = vld [vmem:[%s10477_s5 + $0x658] sm:$0xff] }
 0x249   :  { %2531 = vmatprep.subr.bf16.mxu0 %v6332_v6  ;;  %v6385_v6 = vcombine.low %v837_v55, %v841_v56  ;;  %v890_v48 = vld [vmem:[%s10477_s5 + $0x678] sm:$0xff]  ;;  %v893_v55 = vld [vmem:[%s10477_s5 + $0x690] sm:$0xff] }
 0x24a   :  { %v897_v56 = vld [vmem:[%s10477_s5 + $0x6b0] sm:$0xff] }
 0x24b   :  { %2450 = vmatpush1.bf16.msra.mxu1 %v6329_v49  ;;  %v857_v49 = vld [vmem:[%s10477_s5 + $0x570] sm:$0xff] }
 0x24c   :  { %2532 = vmatpush1.bf16.msra.mxu0 %v6331_v11  ;;  %2451 = vmatprep.subr.bf16.mxu1 %v6338_v12  ;;  %v6394_v12 = vcombine.high %v845_v62, %v849_v63 }
 0x24d   :  { %2533 = vmatprep.subr.bf16.mxu0 %v6340_v19  ;;  %v6393_v19 = vcombine.low %v845_v62, %v849_v63  ;;  %v6435_v62 = vcombine.low %v886_v47, %v890_v48  ;;  %v6442_v63 = vcombine.high %v893_v55, %v897_v56 }
 0x24f   :  { %2452 = vmatpush1.bf16.msra.mxu1 %v6337_v9  ;;  %v865_v9 = vld [vmem:[%s10477_s5 + $0x5b0] sm:$0xff] }
 0x250   :  { %2534 = vmatpush1.bf16.msra.mxu0 %v6339_v10  ;;  %2453 = vmatprep.subr.bf16.mxu1 %v6346_v13  ;;  %v6402_v13 = vcombine.high %v853_v7, %v857_v49 }
 0x251   :  { %2535 = vmatprep.subr.bf16.mxu0 %v6348_v21  ;;  %v6401_v21 = vcombine.low %v853_v7, %v857_v49 }
 0x253   :  { %2454 = vmatpush1.bf16.msra.mxu1 %v6345_v24  ;;  %v6410_v24 = vcombine.high %v861_v8, %v865_v9 }
 0x254   :  { %2536 = vmatpush1.bf16.msra.mxu0 %v6347_v28  ;;  %2455 = vmatprep.subr.bf16.mxu1 %v6354_v29  ;;  %v873_v28 = vld [vmem:[%s10477_s5 + $0x5f0] sm:$0xff]  ;;  %v870_v29 = vld [vmem:[%s10477_s5 + $0x5d8] sm:$0xff] }
 0x255   :  { %2537 = vmatprep.subr.bf16.mxu0 %v6356_v31  ;;  %v6409_v31 = vcombine.low %v861_v8, %v865_v9  ;;  %v6417_v41 = vcombine.low %v869_v27, %v873_v28  ;;  %v6419_v0 = vcombine.low %v870_v29, %v874_v30 }
 0x257   :  { %2456 = vmatpush1.bf16.msra.mxu1 %v6353_v33  ;;  %v6418_v33 = vcombine.high %v869_v27, %v873_v28  ;;  %v930_v27 = vld [vmem:[%s10477_s5 + $0x7b8] sm:$0xff] }
 0x258   :  { %2538 = vmatpush1.bf16.msra.mxu0 %v6355_v34  ;;  %2466 = vmatprep.subr.bf16.mxu1 %v6362_v36  ;;  %v6420_v34 = vcombine.high %v870_v29, %v874_v30  ;;  %v877_v36 = vld [vmem:[%s10477_s5 + $0x610] sm:$0xff] }
 0x259   :  { %2548 = vmatprep.subr.bf16.mxu0 %v6364_v39  ;;  %v882_v39 = vld [vmem:[%s10477_s5 + $0x638] sm:$0xff]  ;;  %v933_v30 = vld [vmem:[%s10477_s5 + $0x7d0] sm:$0xff] }
 0x25a   :  { %2458 = vmatmul.mubr.bf16.vlgmr.msra.gmra.mrb[4].mxu1 %v8416_v1  ;;  %v6428_v44 = vcombine.high %v878_v38, %v882_v39 }
 0x25b   :  { %2540 = vmatmul.mubr.bf16.vlgmr.msra.gmra.mrb[16].mxu0 %v8416_v1  ;;  %2467 = vmatpush1.bf16.msra.mxu1 %v6361_v43  ;;  %v842_v1 = vld [vmem:[%s10477_s5 + $0x4f8] sm:$0xff]  ;;  %v6426_v43 = vcombine.high %v877_v36, %v881_v37 }
 0x25c   :  { %2498 = vmatprep.mubr.bf16.mxu1 %v8630_v23  ;;  %2549 = vmatpush1.bf16.msra.mxu0 %v6363_v46  ;;  %v6388_v5 = vcombine.high %v838_v59, %v842_v1  ;;  %v6387_v11 = vcombine.low %v838_v59, %v842_v1  ;;  %v889_v46 = vld [vmem:[%s10477_s5 + $0x670] sm:$0xff]  ;;  %v898_v59 = vld [vmem:[%s10477_s5 + $0x6b8] sm:$0xff] }
 0x25d   :  { %2580 = vmatprep.mubr.bf16.mxu0 %v8630_v23  ;;  %2468 = vmatprep.subr.bf16.mxu1 %v6370_v51  ;;  %v846_v23 = vld [vmem:[%s10477_s5 + $0x518] sm:$0xff]  ;;  %v6425_v51 = vcombine.low %v877_v36, %v881_v37  ;;  %v6433_v1 = vcombine.low %v885_v45, %v889_v46 }
 0x25e   :  { %2550 = vmatprep.subr.bf16.mxu0 %v6372_v52  ;;  %v6396_v18 = vcombine.high %v846_v23, %v850_v4  ;;  %v6395_v10 = vcombine.low %v846_v23, %v850_v4  ;;  %v6427_v52 = vcombine.low %v878_v38, %v882_v39  ;;  %v6441_v4 = vcombine.low %v893_v55, %v897_v56  ;;  %v938_v36 = vld [vmem:[%s10477_s5 + $0x7f8] sm:$0xff]  ;;  %v7222_v56 = vld [vmem:[%s10480_s7 + $0x74] ss:$28 sps:$4 sm:$0xff]  }
 0x25f   :  { %2469 = vmatpush1.bf16.msra.mxu1 %v6369_v54  ;;  %v6434_v54 = vcombine.high %v885_v45, %v889_v46  ;;  %v7210_v45 = vld [vmem:[%s10480_s7 + $0x4] ss:$28 sps:$4 sm:$0xff]   ;;  %v7213_v46 = vld [vmem:[%s10480_s7 + $0xc] ss:$28 sps:$4 sm:$0xff]  }
 0x260   :  { %2551 = vmatpush1.bf16.msra.mxu0 %v6371_v57  ;;  %2470 = vmatprep.subr.bf16.mxu1 %v6378_v58  ;;  %v6436_v57 = vcombine.high %v886_v47, %v890_v48  ;;  %v894_v58 = vld [vmem:[%s10477_s5 + $0x698] sm:$0xff]  ;;  %v7211_v48 = vld [vmem:[%s10480_s7 + $0x8] ss:$28 sps:$4 sm:$0xff]  }
 0x261   :  { %2552 = vmatprep.subr.bf16.mxu0 %v6380_v60  ;;  %v901_v60 = vld [vmem:[%s10477_s5 + $0x6d0] sm:$0xff]  ;;  %v6444_v23 = vcombine.high %v894_v58, %v898_v59  ;;  %v6443_v7 = vcombine.low %v894_v58, %v898_v59  ;;  %v7208_v47 = vld [vmem:[%s10480_s7] ss:$28 sps:$4 sm:$0xff]   ;;  %v7228_v59 = vld [vmem:[%s10480_s7 + $0xac] ss:$28 sps:$4 sm:$0xff]  }
 0x262   :  { %v7217_v55 = vld [vmem:[%s10480_s7 + $0x40] ss:$28 sps:$4 sm:$0xff]   ;;  %v7223_v58 = vld [vmem:[%s10480_s7 + $0x78] ss:$28 sps:$4 sm:$0xff]  }
 0x263   :  { %2471 = vmatpush1.bf16.msra.mxu1 %v6377_v61  ;;  %v905_v61 = vld [vmem:[%s10477_s5 + $0x6f0] sm:$0xff] }
 0x264   :  { %2553 = vmatpush1.bf16.msra.mxu0 %v6379_v2  ;;  %2472 = vmatprep.subr.bf16.mxu1 %v6386_v3  ;;  %v902_v2 = vld [vmem:[%s10477_s5 + $0x6d8] sm:$0xff]  ;;  %v6450_v49 = vcombine.high %v901_v60, %v905_v61  ;;  %v6449_v15 = vcombine.low %v901_v60, %v905_v61  ;;  %v7226_v60 = vld [vmem:[%s10480_s7 + $0xa8] ss:$28 sps:$4 sm:$0xff]   ;;  %v7229_v61 = vld [vmem:[%s10480_s7 + $0xb0] ss:$28 sps:$4 sm:$0xff]  }
 0x265   :  { %2554 = vmatprep.subr.bf16.mxu0 %v6388_v5  ;;  %v906_v3 = vld [vmem:[%s10477_s5 + $0x6f8] sm:$0xff]  ;;  %v909_v5 = vld [vmem:[%s10477_s5 + $0x710] sm:$0xff] }
 0x266   :  { %v6452_v14 = vcombine.high %v902_v2, %v906_v3  ;;  %v6451_v8 = vcombine.low %v902_v2, %v906_v3  ;;  %v7232_v2 = vld [vmem:[%s10480_s7 + $0xe0] ss:$28 sps:$4 sm:$0xff]   ;;  %v7235_v3 = vld [vmem:[%s10480_s7 + $0xe8] ss:$28 sps:$4 sm:$0xff]  }
 0x267   :  { %2473 = vmatpush1.bf16.msra.mxu1 %v6385_v6  ;;  %v913_v6 = vld [vmem:[%s10477_s5 + $0x730] sm:$0xff] }
 0x268   :  { %2555 = vmatpush1.bf16.msra.mxu0 %v6387_v11  ;;  %2474 = vmatprep.subr.bf16.mxu1 %v6394_v12  ;;  %v910_v11 = vld [vmem:[%s10477_s5 + $0x718] sm:$0xff]  ;;  %v6458_v9 = vcombine.high %v909_v5, %v913_v6  ;;  %v6457_v17 = vcombine.low %v909_v5, %v913_v6 }
 0x269   :  { %2556 = vmatprep.subr.bf16.mxu0 %v6396_v18  ;;  %v914_v12 = vld [vmem:[%s10477_s5 + $0x738] sm:$0xff]  ;;  %v917_v18 = vld [vmem:[%s10477_s5 + $0x750] sm:$0xff] }
 0x26a   :  { %v6460_v16 = vcombine.high %v910_v11, %v914_v12  ;;  %v7238_v5 = vld [vmem:[%s10480_s7 + $0x118] ss:$28 sps:$4 sm:$0xff]   ;;  %v7241_v6 = vld [vmem:[%s10480_s7 + $0x120] ss:$28 sps:$4 sm:$0xff]  }
 0x26b   :  { %2475 = vmatpush1.bf16.msra.mxu1 %v6393_v19  ;;  %v921_v19 = vld [vmem:[%s10477_s5 + $0x770] sm:$0xff] }
 0x26c   :  { %2557 = vmatpush1.bf16.msra.mxu0 %v6395_v10  ;;  %2476 = vmatprep.subr.bf16.mxu1 %v6402_v13  ;;  %v918_v10 = vld [vmem:[%s10477_s5 + $0x758] sm:$0xff]  ;;  %v6465_v29 = vcombine.low %v917_v18, %v921_v19 }
 0x26d   :  { %2558 = vmatprep.subr.bf16.mxu0 %v6404_v20  ;;  %v922_v13 = vld [vmem:[%s10477_s5 + $0x778] sm:$0xff]  ;;  %v925_v20 = vld [vmem:[%s10477_s5 + $0x790] sm:$0xff] }
 0x26e   :  { %v6468_v28 = vcombine.high %v918_v10, %v922_v13 }
 0x26f   :  { %2477 = vmatpush1.bf16.msra.mxu1 %v6401_v21  ;;  %v929_v21 = vld [vmem:[%s10477_s5 + $0x7b0] sm:$0xff] }
 0x270   :  { %2559 = vmatpush1.bf16.msra.mxu0 %v6403_v22  ;;  %2478 = vmatprep.subr.bf16.mxu1 %v6410_v24  ;;  %v6459_v22 = vcombine.low %v910_v11, %v914_v12  ;;  %v6466_v24 = vcombine.high %v917_v18, %v921_v19  ;;  %v6473_v38 = vcombine.low %v925_v20, %v929_v21  ;;  %v7244_v11 = vld [vmem:[%s10480_s7 + $0x150] ss:$28 sps:$4 sm:$0xff]   ;;  %v7247_v12 = vld [vmem:[%s10480_s7 + $0x158] ss:$28 sps:$4 sm:$0xff]   ;;  %v7250_v18 = vld [vmem:[%s10480_s7 + $0x188] ss:$28 sps:$4 sm:$0xff]  }
 0x271   :  { %2560 = vmatprep.subr.bf16.mxu0 %v6412_v26  ;;  %v926_v26 = vld [vmem:[%s10477_s5 + $0x798] sm:$0xff]  ;;  %v7253_v19 = vld [vmem:[%s10480_s7 + $0x190] ss:$28 sps:$4 sm:$0xff]  }
 0x272   :  { %v6476_v37 = vcombine.high %v926_v26, %v930_v27  ;;  %v6475_v39 = vcombine.low %v926_v26, %v930_v27  ;;  %v7268_v26 = vld [vmem:[%s10480_s7 + $0x230] ss:$28 sps:$4 sm:$0xff]   ;;  %v7271_v27 = vld [vmem:[%s10480_s7 + $0x238] ss:$28 sps:$4 sm:$0xff]  }
 0x273   :  { %2479 = vmatpush1.bf16.msra.mxu1 %v6409_v31  ;;  %v937_v31 = vld [vmem:[%s10477_s5 + $0x7f0] sm:$0xff] }
 0x274   :  { %2561 = vmatpush1.bf16.msra.mxu0 %v6411_v32  ;;  %2480 = vmatprep.subr.bf16.mxu1 %v6418_v33  ;;  %v6467_v32 = vcombine.low %v918_v10, %v922_v13  ;;  %v6474_v33 = vcombine.high %v925_v20, %v929_v21  ;;  %v7256_v10 = vld [vmem:[%s10480_s7 + $0x1c0] ss:$28 sps:$4 sm:$0xff]   ;;  %v7259_v13 = vld [vmem:[%s10480_s7 + $0x1c8] ss:$28 sps:$4 sm:$0xff]   ;;  %v7262_v20 = vld [vmem:[%s10480_s7 + $0x1f8] ss:$28 sps:$4 sm:$0xff]  }
 0x275   :  { %2562 = vmatprep.subr.bf16.mxu0 %v6420_v34  ;;  %v934_v34 = vld [vmem:[%s10477_s5 + $0x7d8] sm:$0xff] }
 0x276   :  { %v7265_v21 = vld [vmem:[%s10480_s7 + $0x200] ss:$28 sps:$4 sm:$0xff]  }
 0x277   :  { %2481 = vmatpush1.bf16.msra.mxu1 %v6417_v41  ;;  %v6482_v41 = vcombine.high %v933_v30, %v937_v31 }
 0x278   :  { %2563 = vmatpush1.bf16.msra.mxu0 %v6419_v0  ;;  %2482 = vmatprep.subr.bf16.mxu1 %v6426_v43  ;;  %v6484_v0 = vcombine.high %v934_v34, %v938_v36  ;;  %v6481_v43 = vcombine.low %v933_v30, %v937_v31  ;;  %v7274_v30 = vld [vmem:[%s10480_s7 + $0x268] ss:$28 sps:$4 sm:$0xff]   ;;  %v7277_v31 = vld [vmem:[%s10480_s7 + $0x270] ss:$28 sps:$4 sm:$0xff]  }
 0x279   :  { %2564 = vmatprep.subr.bf16.mxu0 %v6428_v44  ;;  %v6483_v44 = vcombine.low %v934_v34, %v938_v36  ;;  %v7280_v34 = vld [vmem:[%s10480_s7 + $0x2a0] ss:$28 sps:$4 sm:$0xff]   ;;  %v7283_v36 = vld [vmem:[%s10480_s7 + $0x2a8] ss:$28 sps:$4 sm:$0xff]  }
 0x27b   :  { %2483 = vmatpush1.bf16.msra.mxu1 %v6425_v51  ;;  %v7216_v51 = vld [vmem:[%s10480_s7 + $0x3c] ss:$28 sps:$4 sm:$0xff]  }
 0x27c   :  { %2565 = vmatpush1.bf16.msra.mxu0 %v6427_v52  ;;  %2484 = vmatprep.subr.bf16.mxu1 %v6434_v54  ;;  %v7219_v52 = vld [vmem:[%s10480_s7 + $0x44] ss:$28 sps:$4 sm:$0xff]   ;;  %v7214_v54 = vld [vmem:[%s10480_s7 + $0x38] ss:$28 sps:$4 sm:$0xff]  }
 0x27d   :  { %2566 = vmatprep.subr.bf16.mxu0 %v6436_v57  ;;  %v7225_v57 = vld [vmem:[%s10480_s7 + $0x7c] ss:$28 sps:$4 sm:$0xff]  }
 0x27f   :  { %2485 = vmatpush1.bf16.msra.mxu1 %v6433_v1  ;;  %v7231_v1 = vld [vmem:[%s10480_s7 + $0xb4] ss:$28 sps:$4 sm:$0xff]  }
 0x280   :  { %2567 = vmatpush1.bf16.msra.mxu0 %v6435_v62  ;;  %2486 = vmatprep.subr.bf16.mxu1 %v6442_v63  ;;  %v7234_v62 = vld [vmem:[%s10480_s7 + $0xe4] ss:$28 sps:$4 sm:$0xff]   ;;  %v7237_v63 = vld [vmem:[%s10480_s7 + $0xec] ss:$28 sps:$4 sm:$0xff]  }
 0x281   :  { %2568 = vmatprep.subr.bf16.mxu0 %v6444_v23  ;;  %v7240_v23 = vld [vmem:[%s10480_s7 + $0x11c] ss:$28 sps:$4 sm:$0xff]  }
 0x283   :  { %2487 = vmatpush1.bf16.msra.mxu1 %v6441_v4  ;;  %v7243_v4 = vld [vmem:[%s10480_s7 + $0x124] ss:$28 sps:$4 sm:$0xff]  }
 0x284   :  { %2569 = vmatpush1.bf16.msra.mxu0 %v6443_v7  ;;  %2488 = vmatprep.subr.bf16.mxu1 %v6450_v49  ;;  %v7246_v7 = vld [vmem:[%s10480_s7 + $0x154] ss:$28 sps:$4 sm:$0xff]   ;;  %v7249_v49 = vld [vmem:[%s10480_s7 + $0x15c] ss:$28 sps:$4 sm:$0xff]  }
 0x285   :  { %2570 = vmatprep.subr.bf16.mxu0 %v6452_v14  ;;  %v7252_v14 = vld [vmem:[%s10480_s7 + $0x18c] ss:$28 sps:$4 sm:$0xff]  }
 0x287   :  { %2489 = vmatpush1.bf16.msra.mxu1 %v6449_v15  ;;  %v7255_v15 = vld [vmem:[%s10480_s7 + $0x194] ss:$28 sps:$4 sm:$0xff]  }
 0x288   :  { %2571 = vmatpush1.bf16.msra.mxu0 %v6451_v8  ;;  %2490 = vmatprep.subr.bf16.mxu1 %v6458_v9  ;;  %v7258_v8 = vld [vmem:[%s10480_s7 + $0x1c4] ss:$28 sps:$4 sm:$0xff]   ;;  %v7261_v9 = vld [vmem:[%s10480_s7 + $0x1cc] ss:$28 sps:$4 sm:$0xff]  }
 0x289   :  { %2572 = vmatprep.subr.bf16.mxu0 %v6460_v16  ;;  %v7264_v16 = vld [vmem:[%s10480_s7 + $0x1fc] ss:$28 sps:$4 sm:$0xff]  }
 0x28b   :  { %2491 = vmatpush1.bf16.msra.mxu1 %v6457_v17  ;;  %v7267_v17 = vld [vmem:[%s10480_s7 + $0x204] ss:$28 sps:$4 sm:$0xff]  }
 0x28c   :  { %2573 = vmatpush1.bf16.msra.mxu0 %v6459_v22  ;;  %2492 = vmatprep.subr.bf16.mxu1 %v6466_v24  ;;  %v7270_v22 = vld [vmem:[%s10480_s7 + $0x234] ss:$28 sps:$4 sm:$0xff]   ;;  %v7273_v24 = vld [vmem:[%s10480_s7 + $0x23c] ss:$28 sps:$4 sm:$0xff]  }
 0x28d   :  { %2574 = vmatprep.subr.bf16.mxu0 %v6468_v28  ;;  %v7276_v28 = vld [vmem:[%s10480_s7 + $0x26c] ss:$28 sps:$4 sm:$0xff]  }
 0x28f   :  { %2493 = vmatpush1.bf16.msra.mxu1 %v6465_v29  ;;  %v7279_v29 = vld [vmem:[%s10480_s7 + $0x274] ss:$28 sps:$4 sm:$0xff]  }
 0x290   :  { %2575 = vmatpush1.bf16.msra.mxu0 %v6467_v32  ;;  %2494 = vmatprep.subr.bf16.mxu1 %v6474_v33  ;;  %v7282_v32 = vld [vmem:[%s10480_s7 + $0x2a4] ss:$28 sps:$4 sm:$0xff]   ;;  %v7285_v33 = vld [vmem:[%s10480_s7 + $0x2ac] ss:$28 sps:$4 sm:$0xff]  }
 0x291   :  { %2576 = vmatprep.subr.bf16.mxu0 %v6476_v37  ;;  %v7288_v37 = vld [vmem:[%s10480_s7 + $0x2dc] ss:$28 sps:$4 sm:$0xff]  }
 0x293   :  { %2495 = vmatpush1.bf16.msra.mxu1 %v6473_v38  ;;  %v7291_v38 = vld [vmem:[%s10480_s7 + $0x2e4] ss:$28 sps:$4 sm:$0xff]  }
 0x294   :  { %2577 = vmatpush1.bf16.msra.mxu0 %v6475_v39  ;;  %2496 = vmatprep.subr.bf16.mxu1 %v6482_v41  ;;  %v7286_v39 = vld [vmem:[%s10480_s7 + $0x2d8] ss:$28 sps:$4 sm:$0xff]   ;;  %v7289_v41 = vld [vmem:[%s10480_s7 + $0x2e0] ss:$28 sps:$4 sm:$0xff]  }
 0x295   :  { %2578 = vmatprep.subr.bf16.mxu0 %v6484_v0  ;;  %v7294_v0 = vld [vmem:[%s10480_s7 + $0x314] ss:$28 sps:$4 sm:$0xff]  }
 0x297   :  { %2497 = vmatpush1.bf16.msra.mxu1 %v6481_v43  ;;  %v7297_v43 = vld [vmem:[%s10480_s7 + $0x31c] ss:$28 sps:$4 sm:$0xff]  }
 0x298   :  { %2579 = vmatpush1.bf16.msra.mxu0 %v6483_v44  ;;  %5458 = vmatprep.subr.bf16.mxu1 %v7210_v45  ;;  %v7292_v44 = vld [vmem:[%s10480_s7 + $0x310] ss:$28 sps:$4 sm:$0xff]   ;;  %v7295_v45 = vld [vmem:[%s10480_s7 + $0x318] ss:$28 sps:$4 sm:$0xff]  }
 0x299   :  { %5622 = vmatprep.subr.bf16.mxu0 %v7213_v46  ;;  %v7300_v46 = vld [vmem:[%s10480_s7 + $0x34c] ss:$28 sps:$4 sm:$0xff]  }
 0x29a   :  { %2499 = vmatmul.mubr.bf16.vlgmr.msra.gmra.mrb[4].mxu1 %v8632_v25 }
 0x29b   :  { %2581 = vmatmul.mubr.bf16.vlgmr.msra.gmra.mrb[16].mxu0 %v8632_v25  ;;  %5459 = vmatpush1.bf16.msra.mxu1 %v7208_v47  ;;  %v7220_v25 = vld [vmem:[%s10480_s7 + $0x70] ss:$28 sps:$4 sm:$0xff]  }
 0x29c   :  { %5623 = vmatpush1.bf16.msra.mxu0 %v7211_v48  ;;  %5460 = vmatprep.subr.bf16.mxu1 %v7216_v51  ;;  %v7303_v47 = vld [vmem:[%s10480_s7 + $0x354] ss:$28 sps:$4 sm:$0xff]   ;;  %v7298_v48 = vld [vmem:[%s10480_s7 + $0x348] ss:$28 sps:$4 sm:$0xff]  }
 0x29d   :  { %5624 = vmatprep.subr.bf16.mxu0 %v7219_v52  ;;  %v7301_v51 = vld [vmem:[%s10480_s7 + $0x350] ss:$28 sps:$4 sm:$0xff]   ;;  %v7306_v52 = vld [vmem:[%s10480_s7 + $0x384] ss:$28 sps:$4 sm:$0xff]  }
 0x29f   :  { %5461 = vmatpush1.bf16.msra.mxu1 %v7214_v54  ;;  %v7309_v54 = vld [vmem:[%s10480_s7 + $0x38c] ss:$28 sps:$4 sm:$0xff]  }
 0x2a0   :  { %5625 = vmatpush1.bf16.msra.mxu0 %v7217_v55  ;;  %5462 = vmatprep.subr.bf16.mxu1 %v7222_v56  ;;  %v9207_v55 = vld [vmem:[%s10481_s6] sm:$0xff] }
 0x2a1   :  { %5626 = vmatprep.subr.bf16.mxu0 %v7225_v57  ;;  %v944_v56 = vrot.slane %v9207_v55, %v8144_v40  ;;  %v948_v57 = vrot.slane %v9207_v55, %v8150_v42 }
 0x2a3   :  { %5463 = vmatpush1.bf16.msra.mxu1 %v7220_v25  ;;  %v956_v25 = vrot.slane %v9207_v55, %v8588_v53 }
 0x2a4   :  { %5627 = vmatpush1.bf16.msra.mxu0 %v7223_v58  ;;  %5464 = vmatprep.subr.bf16.mxu1 %v7228_v59 }
 0x2a5   :  { %5628 = vmatprep.subr.bf16.mxu0 %v7231_v1 }
 0x2a7   :  { %5465 = vmatpush1.bf16.msra.mxu1 %v7226_v60 }
 0x2a8   :  { %5629 = vmatpush1.bf16.msra.mxu0 %v7229_v61  ;;  %5466 = vmatprep.subr.bf16.mxu1 %v7234_v62 }
 0x2a9   :  { %5630 = vmatprep.subr.bf16.mxu0 %v7237_v63 }
 0x2ab   :  { %5467 = vmatpush1.bf16.msra.mxu1 %v7232_v2 }
 0x2ac   :  { %5631 = vmatpush1.bf16.msra.mxu0 %v7235_v3  ;;  %5468 = vmatprep.subr.bf16.mxu1 %v7240_v23 }
 0x2ad   :  { %5632 = vmatprep.subr.bf16.mxu0 %v7243_v4 }
 0x2af   :  { %5469 = vmatpush1.bf16.msra.mxu1 %v7238_v5 }
 0x2b0   :  { %5633 = vmatpush1.bf16.msra.mxu0 %v7241_v6  ;;  %5470 = vmatprep.subr.bf16.mxu1 %v7246_v7  ;;  %v7304_v7 = vld [vmem:[%s10480_s7 + $0x380] ss:$28 sps:$4 sm:$0xff]  }
 0x2b1   :  { %5634 = vmatprep.subr.bf16.mxu0 %v7249_v49 }
 0x2b3   :  { %5471 = vmatpush1.bf16.msra.mxu1 %v7244_v11  ;;  %v7307_v11 = vld [vmem:[%s10480_s7 + $0x388] ss:$28 sps:$4 sm:$0xff]  }
 0x2b4   :  { %5635 = vmatpush1.bf16.msra.mxu0 %v7247_v12  ;;  %5472 = vmatprep.subr.bf16.mxu1 %v7252_v14 }
 0x2b5   :  { %5636 = vmatprep.subr.bf16.mxu0 %v7255_v15  ;;  %v7310_v15 = vld [vmem:[%s10480_s7 + $0x3b8] ss:$28 sps:$4 sm:$0xff]  }
 0x2b7   :  { %5473 = vmatpush1.bf16.msra.mxu1 %v7250_v18  ;;  %v7312_v18 = vld [vmem:[%s10480_s7 + $0x3bc] ss:$28 sps:$4 sm:$0xff]  }
 0x2b8   :  { %5637 = vmatpush1.bf16.msra.mxu0 %v7253_v19  ;;  %5474 = vmatprep.subr.bf16.mxu1 %v7258_v8  ;;  %v7315_v19 = vld [vmem:[%s10480_s7 + $0x3c4] ss:$28 sps:$4 sm:$0xff]  }
 0x2b9   :  { %5638 = vmatprep.subr.bf16.mxu0 %v7261_v9  ;;  %v7313_v9 = vld [vmem:[%s10480_s7 + $0x3c0] ss:$28 sps:$4 sm:$0xff]  }
 0x2bb   :  { %5475 = vmatpush1.bf16.msra.mxu1 %v7256_v10  ;;  %v7318_v10 = vld [vmem:[%s10480_s7 + $0x3f4] ss:$28 sps:$4 sm:$0xff]  }
 0x2bc   :  { %5639 = vmatpush1.bf16.msra.mxu0 %v7259_v13  ;;  %5476 = vmatprep.subr.bf16.mxu1 %v7264_v16  ;;  %v7321_v13 = vld [vmem:[%s10480_s7 + $0x3fc] ss:$28 sps:$4 sm:$0xff]   ;;  %v7316_v16 = vld [vmem:[%s10480_s7 + $0x3f0] ss:$28 sps:$4 sm:$0xff]  }
 0x2bd   :  { %5640 = vmatprep.subr.bf16.mxu0 %v7267_v17  ;;  %v7319_v17 = vld [vmem:[%s10480_s7 + $0x3f8] ss:$28 sps:$4 sm:$0xff]  }
 0x2bf   :  { %5477 = vmatpush1.bf16.msra.mxu1 %v7262_v20  ;;  %v7324_v20 = vld [vmem:[%s10480_s7 + $0x42c] ss:$28 sps:$4 sm:$0xff]  }
 0x2c0   :  { %5641 = vmatpush1.bf16.msra.mxu0 %v7265_v21  ;;  %5478 = vmatprep.subr.bf16.mxu1 %v7270_v22  ;;  %v7327_v21 = vld [vmem:[%s10480_s7 + $0x434] ss:$28 sps:$4 sm:$0xff]   ;;  %v7322_v22 = vld [vmem:[%s10480_s7 + $0x428] ss:$28 sps:$4 sm:$0xff]  }
 0x2c1   :  { %5642 = vmatprep.subr.bf16.mxu0 %v7273_v24  ;;  %v7325_v24 = vld [vmem:[%s10480_s7 + $0x430] ss:$28 sps:$4 sm:$0xff]  }
 0x2c3   :  { %5479 = vmatpush1.bf16.msra.mxu1 %v7268_v26  ;;  %v7330_v26 = vld [vmem:[%s10480_s7 + $0x464] ss:$28 sps:$4 sm:$0xff]  }
 0x2c4   :  { %5643 = vmatpush1.bf16.msra.mxu0 %v7271_v27  ;;  %5480 = vmatprep.subr.bf16.mxu1 %v7276_v28  ;;  %v7333_v27 = vld [vmem:[%s10480_s7 + $0x46c] ss:$28 sps:$4 sm:$0xff]   ;;  %v7328_v28 = vld [vmem:[%s10480_s7 + $0x460] ss:$28 sps:$4 sm:$0xff]  }
 0x2c5   :  { %5644 = vmatprep.subr.bf16.mxu0 %v7279_v29  ;;  %v7331_v29 = vld [vmem:[%s10480_s7 + $0x468] ss:$28 sps:$4 sm:$0xff]  }
 0x2c7   :  { %5481 = vmatpush1.bf16.msra.mxu1 %v7274_v30  ;;  %v7336_v30 = vld [vmem:[%s10480_s7 + $0x49c] ss:$28 sps:$4 sm:$0xff]  }
 0x2c8   :  { %5645 = vmatpush1.bf16.msra.mxu0 %v7277_v31  ;;  %5482 = vmatprep.subr.bf16.mxu1 %v7282_v32  ;;  %v7339_v31 = vld [vmem:[%s10480_s7 + $0x4a4] ss:$28 sps:$4 sm:$0xff]   ;;  %v7334_v32 = vld [vmem:[%s10480_s7 + $0x498] ss:$28 sps:$4 sm:$0xff]  }
 0x2c9   :  { %5646 = vmatprep.subr.bf16.mxu0 %v7285_v33  ;;  %v7337_v33 = vld [vmem:[%s10480_s7 + $0x4a0] ss:$28 sps:$4 sm:$0xff]  }
 0x2cb   :  { %5483 = vmatpush1.bf16.msra.mxu1 %v7280_v34  ;;  %v7342_v34 = vld [vmem:[%s10480_s7 + $0x4d4] ss:$28 sps:$4 sm:$0xff]  }
 0x2cc   :  { %5647 = vmatpush1.bf16.msra.mxu0 %v7283_v36  ;;  %5484 = vmatprep.subr.bf16.mxu1 %v7288_v37  ;;  %v7345_v36 = vld [vmem:[%s10480_s7 + $0x4dc] ss:$28 sps:$4 sm:$0xff]   ;;  %v7340_v37 = vld [vmem:[%s10480_s7 + $0x4d0] ss:$28 sps:$4 sm:$0xff]  }
 0x2cd   :  { %5648 = vmatprep.subr.bf16.mxu0 %v7291_v38  ;;  %v7343_v38 = vld [vmem:[%s10480_s7 + $0x4d8] ss:$28 sps:$4 sm:$0xff]  }
 0x2cf   :  { %5485 = vmatpush1.bf16.msra.mxu1 %v7286_v39  ;;  %v7348_v39 = vld [vmem:[%s10480_s7 + $0x50c] ss:$28 sps:$4 sm:$0xff]  }
 0x2d0   :  { %5649 = vmatpush1.bf16.msra.mxu0 %v7289_v41  ;;  %5486 = vmatprep.subr.bf16.mxu1 %v7294_v0  ;;  %v7351_v41 = vld [vmem:[%s10480_s7 + $0x514] ss:$28 sps:$4 sm:$0xff]   ;;  %v7346_v0 = vld [vmem:[%s10480_s7 + $0x508] ss:$28 sps:$4 sm:$0xff]  }
 0x2d1   :  { %5650 = vmatprep.subr.bf16.mxu0 %v7297_v43  ;;  %v7349_v43 = vld [vmem:[%s10480_s7 + $0x510] ss:$28 sps:$4 sm:$0xff]  }
 0x2d3   :  { %5487 = vmatpush1.bf16.msra.mxu1 %v7292_v44  ;;  %v7354_v44 = vld [vmem:[%s10480_s7 + $0x544] ss:$28 sps:$4 sm:$0xff]  }
 0x2d4   :  { %5651 = vmatpush1.bf16.msra.mxu0 %v7295_v45  ;;  %5488 = vmatprep.subr.bf16.mxu1 %v7300_v46  ;;  %v7357_v45 = vld [vmem:[%s10480_s7 + $0x54c] ss:$28 sps:$4 sm:$0xff]   ;;  %v7352_v46 = vld [vmem:[%s10480_s7 + $0x540] ss:$28 sps:$4 sm:$0xff]  }
 0x2d5   :  { %5652 = vmatprep.subr.bf16.mxu0 %v7303_v47  ;;  %v7355_v47 = vld [vmem:[%s10480_s7 + $0x548] ss:$28 sps:$4 sm:$0xff]  }
 0x2d7   :  { %5489 = vmatpush1.bf16.msra.mxu1 %v7298_v48  ;;  %v7360_v48 = vld [vmem:[%s10480_s7 + $0x57c] ss:$28 sps:$4 sm:$0xff]  }
 0x2d8   :  { %5653 = vmatpush1.bf16.msra.mxu0 %v7301_v51  ;;  %5499 = vmatprep.subr.bf16.mxu1 %v7306_v52  ;;  %v7363_v51 = vld [vmem:[%s10480_s7 + $0x584] ss:$28 sps:$4 sm:$0xff]   ;;  %v7358_v52 = vld [vmem:[%s10480_s7 + $0x578] ss:$28 sps:$4 sm:$0xff]  }
 0x2d9   :  { %5663 = vmatprep.subr.bf16.mxu0 %v7309_v54  ;;  %v7361_v54 = vld [vmem:[%s10480_s7 + $0x580] ss:$28 sps:$4 sm:$0xff]  }
 0x2ed   :  { %v2336_v58 = vpop.f32.mrb[0].mxu1  ;;  %v9215_v59 = vpop.f32.mrb[12].mxu0 }
 0x2ee   :  { %v7021_v1 = vadd.f32 %v2336_v58, %v944_v56  ;;  %v2338_v60 = vpop.f32.mrb[1].mxu1  ;;  %v2420_v61 = vpop.f32.mrb[13].mxu0  ;;  %v7366_v56 = vld [vmem:[%s10480_s7 + $0x5b4] ss:$28 sps:$4 sm:$0xff]  }
 0x2ef   :  { %v7022_v62 = vadd.f32 %v2338_v60, %v948_v57  ;;  %v7024_v63 = vadd.f32 %v2420_v61, %v956_v25  ;;  %v2340_v2 = vpop.f32.mrb[2].mxu1  ;;  %v2422_v3 = vpop.f32.mrb[14].mxu0  ;;  %v7369_v57 = vld [vmem:[%s10480_s7 + $0x5bc] ss:$28 sps:$4 sm:$0xff]   ;;  %v7364_v25 = vld [vmem:[%s10480_s7 + $0x5b0] ss:$28 sps:$4 sm:$0xff]  }
 0x2f0   :  { %v2589_v23 = vmax.f32 %v7021_v1, 0.0  ;;  %v2341_v4 = vpop.f32.mrb[3].mxu1  ;;  %v2423_v5 = vpop.f32.mrb[15].mxu0  ;;  %v7367_v58 = vld [vmem:[%s10480_s7 + $0x5b8] ss:$28 sps:$4 sm:$0xff]  }
 0x2f1   :  { %v2590_v6 = vmax.f32 %v7022_v62, 0.0  ;;  %v2592_v49 = vmax.f32 %v7024_v63, 0.0  ;;  %v7372_v1 = vld [vmem:[%s10480_s7 + $0x5ec] ss:$28 sps:$4 sm:$0xff]   ;;  %v7375_v60 = vld [vmem:[%s10480_s7 + $0x5f4] ss:$28 sps:$4 sm:$0xff]  }
 0x2f2   :  { %v9225_v14 = vpack.c.bf16 %v2589_v23, %v2589_v23  ;;  %v7370_v61 = vld [vmem:[%s10480_s7 + $0x5e8] ss:$28 sps:$4 sm:$0xff]   ;;  %v7373_v62 = vld [vmem:[%s10480_s7 + $0x5f0] ss:$28 sps:$4 sm:$0xff]   ;;  %v7376_v3 = vld [vmem:[%s10480_s7 + $0x620] ss:$28 sps:$4 sm:$0xff]  }
 0x2f3   :  { %v9223_v12 = vpack.c.bf16 %v2590_v6, %v2590_v6  ;;  %v9238_v8 = vpack.c.bf16 %v2592_v49, %v2592_v49  ;;  %v7378_v63 = vld [vmem:[%s10480_s7 + $0x624] ss:$28 sps:$4 sm:$0xff]   ;;  %v7381_v2 = vld [vmem:[%s10480_s7 + $0x62c] ss:$28 sps:$4 sm:$0xff]   ;;  %v7384_v4 = vld [vmem:[%s10480_s7 + $0x65c] ss:$28 sps:$4 sm:$0xff]   ;;  %v952_v49 = vrot.slane %v9207_v55, %v8585_v50 }
 0x2f4   :  { %v7379_v23 = vld [vmem:[%s10480_s7 + $0x628] ss:$28 sps:$4 sm:$0xff]   ;;  %v7382_v6 = vld [vmem:[%s10480_s7 + $0x658] ss:$28 sps:$4 sm:$0xff]  }
 0x2f5   :  { %5490 = vmatprep.mubr.bf16.mxu1 %v9223_v12  ;;  %5654 = vmatprep.mubr.bf16.mxu0 %v9223_v12  ;;  %v7387_v5 = vld [vmem:[%s10480_s7 + $0x664] ss:$28 sps:$4 sm:$0xff]  }
 0x2f6   :  { %5491 = vmatmul.mubr.bf16.vlgmr.msra.gmra.mrb[8].mxu1 %v9225_v14  ;;  %5655 = vmatmul.mubr.bf16.vlgmr.msra.gmra.mrb[20].mxu0 %v9225_v14 }
 0x2f7   :  { %5500 = vmatpush1.bf16.msra.mxu1 %v7304_v7  ;;  %5664 = vmatpush1.bf16.msra.mxu0 %v7307_v11  ;;  %v7385_v7 = vld [vmem:[%s10480_s7 + $0x660] ss:$28 sps:$4 sm:$0xff]   ;;  %v7390_v11 = vld [vmem:[%s10480_s7 + $0x694] ss:$28 sps:$4 sm:$0xff]  }
 0x2f8   :  { %5531 = vmatprep.mubr.bf16.mxu1 %v9238_v8  ;;  %5695 = vmatprep.mubr.bf16.mxu0 %v9238_v8 }
 0x2f9   :  { %5501 = vmatprep.subr.bf16.mxu1 %v7312_v18  ;;  %5665 = vmatprep.subr.bf16.mxu0 %v7315_v19  ;;  %v7388_v18 = vld [vmem:[%s10480_s7 + $0x690] ss:$28 sps:$4 sm:$0xff]   ;;  %v7391_v19 = vld [vmem:[%s10480_s7 + $0x698] ss:$28 sps:$4 sm:$0xff]  }
 0x2fb   :  { %5502 = vmatpush1.bf16.msra.mxu1 %v7310_v15  ;;  %5666 = vmatpush1.bf16.msra.mxu0 %v7313_v9  ;;  %v7393_v15 = vld [vmem:[%s10480_s7 + $0x69c] ss:$28 sps:$4 sm:$0xff]   ;;  %v7023_v9 = vadd.f32 %v9215_v59, %v952_v49  ;;  %v7397_v59 = vld [vmem:[%s10480_s7 + $0x6d0] ss:$28 sps:$4 sm:$0xff]  }
 0x2fc   :  { %5503 = vmatprep.subr.bf16.mxu1 %v7318_v10  ;;  %5667 = vmatprep.subr.bf16.mxu0 %v7321_v13  ;;  %v7396_v10 = vld [vmem:[%s10480_s7 + $0x6cc] ss:$28 sps:$4 sm:$0xff]   ;;  %v7399_v13 = vld [vmem:[%s10480_s7 + $0x6d4] ss:$28 sps:$4 sm:$0xff]  }
 0x2fd   :  { %v7463_v49 = vld [vmem:[%s10480_s7 + $0x938] ss:$28 sps:$4 sm:$0xff]  }
 0x2ff   :  { %5504 = vmatpush1.bf16.msra.mxu1 %v7316_v16  ;;  %5668 = vmatpush1.bf16.msra.mxu0 %v7319_v17  ;;  %v7394_v16 = vld [vmem:[%s10480_s7 + $0x6c8] ss:$28 sps:$4 sm:$0xff]   ;;  %v2591_v17 = vmax.f32 %v7023_v9, 0.0 }
 0x300   :  { %5505 = vmatprep.subr.bf16.mxu1 %v7324_v20  ;;  %5669 = vmatprep.subr.bf16.mxu0 %v7327_v21  ;;  %v7402_v20 = vld [vmem:[%s10480_s7 + $0x704] ss:$28 sps:$4 sm:$0xff]   ;;  %v7405_v21 = vld [vmem:[%s10480_s7 + $0x70c] ss:$28 sps:$4 sm:$0xff]  }
 0x301   :  { %v7474_v9 = vld [vmem:[%s10480_s7 + $0x9a4] ss:$28 sps:$4 sm:$0xff]  }
 0x303   :  { %5506 = vmatpush1.bf16.msra.mxu1 %v7322_v22  ;;  %5670 = vmatpush1.bf16.msra.mxu0 %v7325_v24  ;;  %v7400_v22 = vld [vmem:[%s10480_s7 + $0x700] ss:$28 sps:$4 sm:$0xff]   ;;  %v7403_v24 = vld [vmem:[%s10480_s7 + $0x708] ss:$28 sps:$4 sm:$0xff]  }
 0x304   :  { %5507 = vmatprep.subr.bf16.mxu1 %v7330_v26  ;;  %5671 = vmatprep.subr.bf16.mxu0 %v7333_v27  ;;  %v9430_v26 = vpack.c.bf16 %v2591_v17, %v2591_v17  ;;  %v7408_v27 = vld [vmem:[%s10480_s7 + $0x73c] ss:$28 sps:$4 sm:$0xff]   ;;  %v7483_v17 = vld [vmem:[%s10480_s7 + $0x9e4] ss:$28 sps:$4 sm:$0xff]  }
 0x307   :  { %5508 = vmatpush1.bf16.msra.mxu1 %v7328_v28  ;;  %5672 = vmatpush1.bf16.msra.mxu0 %v7331_v29  ;;  %v7411_v28 = vld [vmem:[%s10480_s7 + $0x744] ss:$28 sps:$4 sm:$0xff]   ;;  %v7406_v29 = vld [vmem:[%s10480_s7 + $0x738] ss:$28 sps:$4 sm:$0xff]  }
 0x308   :  { %5509 = vmatprep.subr.bf16.mxu1 %v7336_v30  ;;  %5673 = vmatprep.subr.bf16.mxu0 %v7339_v31  ;;  %v7409_v30 = vld [vmem:[%s10480_s7 + $0x740] ss:$28 sps:$4 sm:$0xff]   ;;  %v7414_v31 = vld [vmem:[%s10480_s7 + $0x774] ss:$28 sps:$4 sm:$0xff]  }
 0x30b   :  { %5510 = vmatpush1.bf16.msra.mxu1 %v7334_v32  ;;  %5674 = vmatpush1.bf16.msra.mxu0 %v7337_v33  ;;  %v7417_v32 = vld [vmem:[%s10480_s7 + $0x77c] ss:$28 sps:$4 sm:$0xff]   ;;  %v7412_v33 = vld [vmem:[%s10480_s7 + $0x770] ss:$28 sps:$4 sm:$0xff]  }
 0x30c   :  { %5511 = vmatprep.subr.bf16.mxu1 %v7342_v34  ;;  %5675 = vmatprep.subr.bf16.mxu0 %v7345_v36  ;;  %v7415_v34 = vld [vmem:[%s10480_s7 + $0x778] ss:$28 sps:$4 sm:$0xff]   ;;  %v7420_v36 = vld [vmem:[%s10480_s7 + $0x7ac] ss:$28 sps:$4 sm:$0xff]  }
 0x30f   :  { %5512 = vmatpush1.bf16.msra.mxu1 %v7340_v37  ;;  %5676 = vmatpush1.bf16.msra.mxu0 %v7343_v38  ;;  %v7423_v37 = vld [vmem:[%s10480_s7 + $0x7b4] ss:$28 sps:$4 sm:$0xff]   ;;  %v7418_v38 = vld [vmem:[%s10480_s7 + $0x7a8] ss:$28 sps:$4 sm:$0xff]  }
 0x310   :  { %5513 = vmatprep.subr.bf16.mxu1 %v7348_v39  ;;  %5677 = vmatprep.subr.bf16.mxu0 %v7351_v41  ;;  %v7421_v39 = vld [vmem:[%s10480_s7 + $0x7b0] ss:$28 sps:$4 sm:$0xff]   ;;  %v7426_v41 = vld [vmem:[%s10480_s7 + $0x7e4] ss:$28 sps:$4 sm:$0xff]  }
 0x313   :  { %5514 = vmatpush1.bf16.msra.mxu1 %v7346_v0  ;;  %5678 = vmatpush1.bf16.msra.mxu0 %v7349_v43  ;;  %v7429_v0 = vld [vmem:[%s10480_s7 + $0x7ec] ss:$28 sps:$4 sm:$0xff]   ;;  %v7424_v43 = vld [vmem:[%s10480_s7 + $0x7e0] ss:$28 sps:$4 sm:$0xff]  }
 0x314   :  { %5515 = vmatprep.subr.bf16.mxu1 %v7354_v44  ;;  %5679 = vmatprep.subr.bf16.mxu0 %v7357_v45  ;;  %v7427_v44 = vld [vmem:[%s10480_s7 + $0x7e8] ss:$28 sps:$4 sm:$0xff]   ;;  %v7432_v45 = vld [vmem:[%s10480_s7 + $0x81c] ss:$28 sps:$4 sm:$0xff]  }
 0x317   :  { %5516 = vmatpush1.bf16.msra.mxu1 %v7352_v46  ;;  %5680 = vmatpush1.bf16.msra.mxu0 %v7355_v47  ;;  %v7435_v46 = vld [vmem:[%s10480_s7 + $0x824] ss:$28 sps:$4 sm:$0xff]   ;;  %v7430_v47 = vld [vmem:[%s10480_s7 + $0x818] ss:$28 sps:$4 sm:$0xff]  }
 0x318   :  { %5517 = vmatprep.subr.bf16.mxu1 %v7360_v48  ;;  %5681 = vmatprep.subr.bf16.mxu0 %v7363_v51  ;;  %v7433_v48 = vld [vmem:[%s10480_s7 + $0x820] ss:$28 sps:$4 sm:$0xff]   ;;  %v7438_v51 = vld [vmem:[%s10480_s7 + $0x854] ss:$28 sps:$4 sm:$0xff]  }
 0x31b   :  { %5518 = vmatpush1.bf16.msra.mxu1 %v7358_v52  ;;  %5682 = vmatpush1.bf16.msra.mxu0 %v7361_v54  ;;  %v7441_v52 = vld [vmem:[%s10480_s7 + $0x85c] ss:$28 sps:$4 sm:$0xff]   ;;  %v7436_v54 = vld [vmem:[%s10480_s7 + $0x850] ss:$28 sps:$4 sm:$0xff]  }
 0x31c   :  { %5519 = vmatprep.subr.bf16.mxu1 %v7366_v56  ;;  %5683 = vmatprep.subr.bf16.mxu0 %v7369_v57  ;;  %v7439_v56 = vld [vmem:[%s10480_s7 + $0x858] ss:$28 sps:$4 sm:$0xff]   ;;  %v7444_v57 = vld [vmem:[%s10480_s7 + $0x88c] ss:$28 sps:$4 sm:$0xff]  }
 0x31f   :  { %5520 = vmatpush1.bf16.msra.mxu1 %v7364_v25  ;;  %5684 = vmatpush1.bf16.msra.mxu0 %v7367_v58  ;;  %v7447_v25 = vld [vmem:[%s10480_s7 + $0x894] ss:$28 sps:$4 sm:$0xff]   ;;  %v7442_v58 = vld [vmem:[%s10480_s7 + $0x888] ss:$28 sps:$4 sm:$0xff]  }
 0x320   :  { %5521 = vmatprep.subr.bf16.mxu1 %v7372_v1  ;;  %5685 = vmatprep.subr.bf16.mxu0 %v7375_v60  ;;  %v7445_v1 = vld [vmem:[%s10480_s7 + $0x890] ss:$28 sps:$4 sm:$0xff]   ;;  %v7450_v60 = vld [vmem:[%s10480_s7 + $0x8c4] ss:$28 sps:$4 sm:$0xff]  }
 0x323   :  { %5522 = vmatpush1.bf16.msra.mxu1 %v7370_v61  ;;  %5686 = vmatpush1.bf16.msra.mxu0 %v7373_v62  ;;  %v7453_v61 = vld [vmem:[%s10480_s7 + $0x8cc] ss:$28 sps:$4 sm:$0xff]   ;;  %v7448_v62 = vld [vmem:[%s10480_s7 + $0x8c0] ss:$28 sps:$4 sm:$0xff]  }
 0x324   :  { %5523 = vmatprep.subr.bf16.mxu1 %v7378_v63  ;;  %5687 = vmatprep.subr.bf16.mxu0 %v7381_v2  ;;  %v7451_v63 = vld [vmem:[%s10480_s7 + $0x8c8] ss:$28 sps:$4 sm:$0xff]   ;;  %v7456_v2 = vld [vmem:[%s10480_s7 + $0x8fc] ss:$28 sps:$4 sm:$0xff]  }
 0x327   :  { %5524 = vmatpush1.bf16.msra.mxu1 %v7376_v3  ;;  %5688 = vmatpush1.bf16.msra.mxu0 %v7379_v23  ;;  %v7459_v3 = vld [vmem:[%s10480_s7 + $0x904] ss:$28 sps:$4 sm:$0xff]   ;;  %v7454_v23 = vld [vmem:[%s10480_s7 + $0x8f8] ss:$28 sps:$4 sm:$0xff]  }
 0x328   :  { %5525 = vmatprep.subr.bf16.mxu1 %v7384_v4  ;;  %5689 = vmatprep.subr.bf16.mxu0 %v7387_v5  ;;  %v7457_v4 = vld [vmem:[%s10480_s7 + $0x900] ss:$28 sps:$4 sm:$0xff]   ;;  %v7462_v5 = vld [vmem:[%s10480_s7 + $0x934] ss:$28 sps:$4 sm:$0xff]  }
 0x32b   :  { %5526 = vmatpush1.bf16.msra.mxu1 %v7382_v6  ;;  %5690 = vmatpush1.bf16.msra.mxu0 %v7385_v7  ;;  %v7465_v6 = vld [vmem:[%s10480_s7 + $0x93c] ss:$28 sps:$4 sm:$0xff]   ;;  %v7460_v7 = vld [vmem:[%s10480_s7 + $0x930] ss:$28 sps:$4 sm:$0xff]  }
 0x32c   :  { %5527 = vmatprep.subr.bf16.mxu1 %v7390_v11  ;;  %5691 = vmatprep.subr.bf16.mxu0 %v7393_v15  ;;  %v7468_v11 = vld [vmem:[%s10480_s7 + $0x96c] ss:$28 sps:$4 sm:$0xff]   ;;  %v7471_v15 = vld [vmem:[%s10480_s7 + $0x974] ss:$28 sps:$4 sm:$0xff]  }
 0x32f   :  { %5528 = vmatpush1.bf16.msra.mxu1 %v7388_v18  ;;  %5692 = vmatpush1.bf16.msra.mxu0 %v7391_v19  ;;  %v7466_v18 = vld [vmem:[%s10480_s7 + $0x968] ss:$28 sps:$4 sm:$0xff]   ;;  %v7469_v19 = vld [vmem:[%s10480_s7 + $0x970] ss:$28 sps:$4 sm:$0xff]  }
 0x330   :  { %5529 = vmatprep.subr.bf16.mxu1 %v7396_v10  ;;  %5693 = vmatprep.subr.bf16.mxu0 %v7399_v13  ;;  %v7477_v10 = vld [vmem:[%s10480_s7 + $0x9ac] ss:$28 sps:$4 sm:$0xff]   ;;  %v7472_v13 = vld [vmem:[%s10480_s7 + $0x9a0] ss:$28 sps:$4 sm:$0xff]  }
 0x333   :  { %5530 = vmatpush1.bf16.msra.mxu1 %v7394_v16  ;;  %5694 = vmatpush1.bf16.msra.mxu0 %v7397_v59  ;;  %v7475_v16 = vld [vmem:[%s10480_s7 + $0x9a8] ss:$28 sps:$4 sm:$0xff]   ;;  %v7480_v59 = vld [vmem:[%s10480_s7 + $0x9dc] ss:$28 sps:$4 sm:$0xff]  }
 0x334   :  { %5540 = vmatprep.subr.bf16.mxu1 %v7402_v20  ;;  %5704 = vmatprep.subr.bf16.mxu0 %v7405_v21  ;;  %v959_v20 = vsub.s32 4, %v8135_v35  ;;  %v7478_v21 = vld [vmem:[%s10480_s7 + $0x9d8] ss:$28 sps:$4 sm:$0xff]  }
 0x336   :  { %5532 = vmatmul.mubr.bf16.vlgmr.msra.gmra.mrb[8].mxu1 %v9430_v26  ;;  %5696 = vmatmul.mubr.bf16.vlgmr.msra.gmra.mrb[20].mxu0 %v9430_v26 }
 0x337   :  { %5541 = vmatpush1.bf16.msra.mxu1 %v7400_v22  ;;  %5705 = vmatpush1.bf16.msra.mxu0 %v7403_v24  ;;  %v7481_v22 = vld [vmem:[%s10480_s7 + $0x9e0] ss:$28 sps:$4 sm:$0xff]   ;;  %v963_v24 = vsub.s32 5, %v8135_v35 }
 0x338   :  { %5542 = vmatprep.subr.bf16.mxu1 %v7408_v27  ;;  %5706 = vmatprep.subr.bf16.mxu0 %v7411_v28  ;;  %v7486_v27 = vld [vmem:[%s10480_s7 + $0xa14] ss:$28 sps:$4 sm:$0xff]   ;;  %v7489_v28 = vld [vmem:[%s10480_s7 + $0xa1c] ss:$28 sps:$4 sm:$0xff]  }
 0x33b   :  { %5543 = vmatpush1.bf16.msra.mxu1 %v7406_v29  ;;  %5707 = vmatpush1.bf16.msra.mxu0 %v7409_v30  ;;  %v971_v29 = vsub.s32 7, %v8135_v35  ;;  %v960_v30 = vrot.slane %v9207_v55, %v959_v20 }
 0x33c   :  { %5544 = vmatprep.subr.bf16.mxu1 %v7414_v31  ;;  %5708 = vmatprep.subr.bf16.mxu0 %v7417_v32  ;;  %v7484_v31 = vld [vmem:[%s10480_s7 + $0xa10] ss:$28 sps:$4 sm:$0xff]   ;;  %v7487_v32 = vld [vmem:[%s10480_s7 + $0xa18] ss:$28 sps:$4 sm:$0xff]  }
 0x33f   :  { %5545 = vmatpush1.bf16.msra.mxu1 %v7412_v33  ;;  %5709 = vmatpush1.bf16.msra.mxu0 %v7415_v34  ;;  %v964_v33 = vrot.slane %v9207_v55, %v963_v24  ;;  %v972_v34 = vrot.slane %v9207_v55, %v971_v29  ;;  %v7537_v29 = vld [vmem:[%s10480_s7 + $0xbdc] ss:$28 sps:$4 sm:$0xff]  }
 0x340   :  { %5546 = vmatprep.subr.bf16.mxu1 %v7420_v36  ;;  %5710 = vmatprep.subr.bf16.mxu0 %v7423_v37  ;;  %v7492_v36 = vld [vmem:[%s10480_s7 + $0xa4c] ss:$28 sps:$4 sm:$0xff]   ;;  %v7495_v37 = vld [vmem:[%s10480_s7 + $0xa54] ss:$28 sps:$4 sm:$0xff]  }
 0x343   :  { %5547 = vmatpush1.bf16.msra.mxu1 %v7418_v38  ;;  %5711 = vmatpush1.bf16.msra.mxu0 %v7421_v39 }
 0x344   :  { %5548 = vmatprep.subr.bf16.mxu1 %v7426_v41  ;;  %5712 = vmatprep.subr.bf16.mxu0 %v7429_v0 }
 0x347   :  { %5549 = vmatpush1.bf16.msra.mxu1 %v7424_v43  ;;  %5713 = vmatpush1.bf16.msra.mxu0 %v7427_v44  ;;  %v7490_v43 = vld [vmem:[%s10480_s7 + $0xa48] ss:$28 sps:$4 sm:$0xff]  }
 0x348   :  { %5550 = vmatprep.subr.bf16.mxu1 %v7432_v45  ;;  %5714 = vmatprep.subr.bf16.mxu0 %v7435_v46 }
 0x34b   :  { %5551 = vmatpush1.bf16.msra.mxu1 %v7430_v47  ;;  %5715 = vmatpush1.bf16.msra.mxu0 %v7433_v48  ;;  %v7493_v47 = vld [vmem:[%s10480_s7 + $0xa50] ss:$28 sps:$4 sm:$0xff]   ;;  %v7498_v48 = vld [vmem:[%s10480_s7 + $0xa84] ss:$28 sps:$4 sm:$0xff]  }
 0x34c   :  { %5552 = vmatprep.subr.bf16.mxu1 %v7438_v51  ;;  %5716 = vmatprep.subr.bf16.mxu0 %v7441_v52 }
 0x34f   :  { %5553 = vmatpush1.bf16.msra.mxu1 %v7436_v54  ;;  %5717 = vmatpush1.bf16.msra.mxu0 %v7439_v56 }
 0x350   :  { %5554 = vmatprep.subr.bf16.mxu1 %v7444_v57  ;;  %5718 = vmatprep.subr.bf16.mxu0 %v7447_v25  ;;  %v7501_v57 = vld [vmem:[%s10480_s7 + $0xa8c] ss:$28 sps:$4 sm:$0xff]  }
 0x353   :  { %5555 = vmatpush1.bf16.msra.mxu1 %v7442_v58  ;;  %5719 = vmatpush1.bf16.msra.mxu0 %v7445_v1 }
 0x354   :  { %5556 = vmatprep.subr.bf16.mxu1 %v7450_v60  ;;  %5720 = vmatprep.subr.bf16.mxu0 %v7453_v61  ;;  %v7496_v61 = vld [vmem:[%s10480_s7 + $0xa80] ss:$28 sps:$4 sm:$0xff]  }
 0x357   :  { %5557 = vmatpush1.bf16.msra.mxu1 %v7448_v62  ;;  %5721 = vmatpush1.bf16.msra.mxu0 %v7451_v63  ;;  %v7499_v62 = vld [vmem:[%s10480_s7 + $0xa88] ss:$28 sps:$4 sm:$0xff]  }
 0x358   :  { %5558 = vmatprep.subr.bf16.mxu1 %v7456_v2  ;;  %5722 = vmatprep.subr.bf16.mxu0 %v7459_v3  ;;  %v7504_v2 = vld [vmem:[%s10480_s7 + $0xabc] ss:$28 sps:$4 sm:$0xff]   ;;  %v7507_v3 = vld [vmem:[%s10480_s7 + $0xac4] ss:$28 sps:$4 sm:$0xff]  }
 0x35b   :  { %5559 = vmatpush1.bf16.msra.mxu1 %v7454_v23  ;;  %5723 = vmatpush1.bf16.msra.mxu0 %v7457_v4  ;;  %v7502_v4 = vld [vmem:[%s10480_s7 + $0xab8] ss:$28 sps:$4 sm:$0xff]  }
 0x35c   :  { %5560 = vmatprep.subr.bf16.mxu1 %v7462_v5  ;;  %5724 = vmatprep.subr.bf16.mxu0 %v7465_v6  ;;  %v7505_v5 = vld [vmem:[%s10480_s7 + $0xac0] ss:$28 sps:$4 sm:$0xff]   ;;  %v7510_v6 = vld [vmem:[%s10480_s7 + $0xaf4] ss:$28 sps:$4 sm:$0xff]  }
 0x35f   :  { %5561 = vmatpush1.bf16.msra.mxu1 %v7460_v7  ;;  %5725 = vmatpush1.bf16.msra.mxu0 %v7463_v49  ;;  %v7513_v7 = vld [vmem:[%s10480_s7 + $0xafc] ss:$28 sps:$4 sm:$0xff]   ;;  %v7508_v49 = vld [vmem:[%s10480_s7 + $0xaf0] ss:$28 sps:$4 sm:$0xff]  }
 0x360   :  { %5562 = vmatprep.subr.bf16.mxu1 %v7468_v11  ;;  %5726 = vmatprep.subr.bf16.mxu0 %v7471_v15  ;;  %v7511_v11 = vld [vmem:[%s10480_s7 + $0xaf8] ss:$28 sps:$4 sm:$0xff]   ;;  %v7516_v15 = vld [vmem:[%s10480_s7 + $0xb2c] ss:$28 sps:$4 sm:$0xff]  }
 0x363   :  { %5563 = vmatpush1.bf16.msra.mxu1 %v7466_v18  ;;  %5727 = vmatpush1.bf16.msra.mxu0 %v7469_v19  ;;  %v7519_v18 = vld [vmem:[%s10480_s7 + $0xb34] ss:$28 sps:$4 sm:$0xff]   ;;  %v7514_v19 = vld [vmem:[%s10480_s7 + $0xb28] ss:$28 sps:$4 sm:$0xff]  }
 0x364   :  { %5564 = vmatprep.subr.bf16.mxu1 %v7474_v9  ;;  %5728 = vmatprep.subr.bf16.mxu0 %v7477_v10  ;;  %v7517_v9 = vld [vmem:[%s10480_s7 + $0xb30] ss:$28 sps:$4 sm:$0xff]   ;;  %v7522_v10 = vld [vmem:[%s10480_s7 + $0xb64] ss:$28 sps:$4 sm:$0xff]  }
 0x367   :  { %5565 = vmatpush1.bf16.msra.mxu1 %v7472_v13  ;;  %5729 = vmatpush1.bf16.msra.mxu0 %v7475_v16  ;;  %v7525_v13 = vld [vmem:[%s10480_s7 + $0xb6c] ss:$28 sps:$4 sm:$0xff]   ;;  %v7520_v16 = vld [vmem:[%s10480_s7 + $0xb60] ss:$28 sps:$4 sm:$0xff]  }
 0x368   :  { %5566 = vmatprep.subr.bf16.mxu1 %v7480_v59  ;;  %5730 = vmatprep.subr.bf16.mxu0 %v7483_v17  ;;  %v7523_v59 = vld [vmem:[%s10480_s7 + $0xb68] ss:$28 sps:$4 sm:$0xff]   ;;  %v7528_v17 = vld [vmem:[%s10480_s7 + $0xb9c] ss:$28 sps:$4 sm:$0xff]  }
 0x36b   :  { %5567 = vmatpush1.bf16.msra.mxu1 %v7478_v21  ;;  %5731 = vmatpush1.bf16.msra.mxu0 %v7481_v22  ;;  %v7531_v21 = vld [vmem:[%s10480_s7 + $0xba4] ss:$28 sps:$4 sm:$0xff]   ;;  %v7526_v22 = vld [vmem:[%s10480_s7 + $0xb98] ss:$28 sps:$4 sm:$0xff]  }
 0x36c   :  { %5568 = vmatprep.subr.bf16.mxu1 %v7486_v27  ;;  %5732 = vmatprep.subr.bf16.mxu0 %v7489_v28  ;;  %v7529_v27 = vld [vmem:[%s10480_s7 + $0xba0] ss:$28 sps:$4 sm:$0xff]   ;;  %v7534_v28 = vld [vmem:[%s10480_s7 + $0xbd4] ss:$28 sps:$4 sm:$0xff]  }
 0x36d   :  { %v2500_v38 = vpop.f32.mrb[4].mxu1 }
 0x36e   :  { %v7025_v39 = vadd.f32 %v2500_v38, %v960_v30  ;;  %v9618_v41 = vpop.f32.mrb[16].mxu0  ;;  %v2502_v0 = vpop.f32.mrb[5].mxu1  ;;  %v7532_v30 = vld [vmem:[%s10480_s7 + $0xbd0] ss:$28 sps:$4 sm:$0xff]  }
 0x36f   :  { %v7026_v44 = vadd.f32 %v2502_v0, %v964_v33  ;;  %v2584_v45 = vpop.f32.mrb[17].mxu0  ;;  %5569 = vmatpush1.bf16.msra.mxu1 %v7484_v31  ;;  %5733 = vmatpush1.bf16.msra.mxu0 %v7487_v32  ;;  %v2504_v46 = vpop.f32.mrb[6].mxu1  ;;  %v7535_v31 = vld [vmem:[%s10480_s7 + $0xbd8] ss:$28 sps:$4 sm:$0xff]   ;;  %v7540_v32 = vld [vmem:[%s10480_s7 + $0xc0c] ss:$28 sps:$4 sm:$0xff]  }
 0x370   :  { %v2593_v51 = vmax.f32 %v7025_v39, 0.0  ;;  %v7028_v52 = vadd.f32 %v2584_v45, %v972_v34  ;;  %v2586_v54 = vpop.f32.mrb[18].mxu0  ;;  %v2505_v56 = vpop.f32.mrb[7].mxu1  ;;  %5570 = vmatprep.subr.bf16.mxu1 %v7492_v36  ;;  %5734 = vmatprep.subr.bf16.mxu0 %v7495_v37  ;;  %v7543_v33 = vld [vmem:[%s10480_s7 + $0xc14] ss:$28 sps:$4 sm:$0xff]  }
 0x371   :  { %v2594_v25 = vmax.f32 %v7026_v44, 0.0  ;;  %v2587_v58 = vpop.f32.mrb[19].mxu0  ;;  %v7538_v34 = vld [vmem:[%s10480_s7 + $0xc08] ss:$28 sps:$4 sm:$0xff]   ;;  %v7541_v36 = vld [vmem:[%s10480_s7 + $0xc10] ss:$28 sps:$4 sm:$0xff]  }
 0x372   :  { %v2596_v1 = vmax.f32 %v7028_v52, 0.0  ;;  %v9640_v63 = vpack.c.bf16 %v2593_v51, %v2593_v51  ;;  %v7546_v37 = vld [vmem:[%s10480_s7 + $0xc44] ss:$28 sps:$4 sm:$0xff]   ;;  %v7549_v38 = vld [vmem:[%s10480_s7 + $0xc4c] ss:$28 sps:$4 sm:$0xff]  }
 0x373   :  { %v9632_v60 = vpack.c.bf16 %v2594_v25, %v2594_v25  ;;  %5571 = vmatpush1.bf16.msra.mxu1 %v7490_v43  ;;  %5735 = vmatpush1.bf16.msra.mxu0 %v7493_v47  ;;  %v7544_v39 = vld [vmem:[%s10480_s7 + $0xc40] ss:$28 sps:$4 sm:$0xff]   ;;  %v7547_v0 = vld [vmem:[%s10480_s7 + $0xc48] ss:$28 sps:$4 sm:$0xff]   ;;  %v7550_v45 = vld [vmem:[%s10480_s7 + $0xc78] ss:$28 sps:$4 sm:$0xff]  }
 0x374   :  { %5581 = vmatprep.subr.bf16.mxu1 %v7498_v48  ;;  %5745 = vmatprep.subr.bf16.mxu0 %v7501_v57  ;;  %v9650_v23 = vpack.c.bf16 %v2596_v1, %v2596_v1  ;;  %v7552_v43 = vld [vmem:[%s10480_s7 + $0xc7c] ss:$28 sps:$4 sm:$0xff]   ;;  %v7555_v44 = vld [vmem:[%s10480_s7 + $0xc84] ss:$28 sps:$4 sm:$0xff]   ;;  %v7558_v47 = vld [vmem:[%s10480_s7 + $0xcb4] ss:$28 sps:$4 sm:$0xff]  }
 0x375   :  { %5572 = vmatprep.mubr.bf16.mxu1 %v9632_v60  ;;  %5736 = vmatprep.mubr.bf16.mxu0 %v9632_v60  ;;  %v7553_v46 = vld [vmem:[%s10480_s7 + $0xc80] ss:$28 sps:$4 sm:$0xff]   ;;  %v7556_v51 = vld [vmem:[%s10480_s7 + $0xcb0] ss:$28 sps:$4 sm:$0xff]   ;;  %v7559_v52 = vld [vmem:[%s10480_s7 + $0xcb8] ss:$28 sps:$4 sm:$0xff]  }
 0x376   :  { %5573 = vmatmul.mubr.bf16.vlgmr.msra.gmra.mrb[8].mxu1 %v9640_v63  ;;  %5737 = vmatmul.mubr.bf16.vlgmr.msra.gmra.mrb[20].mxu0 %v9640_v63  ;;  %v7561_v48 = vld [vmem:[%s10480_s7 + $0xcbc] ss:$28 sps:$4 sm:$0xff]   ;;  %v7564_v54 = vld [vmem:[%s10480_s7 + $0xcec] ss:$28 sps:$4 sm:$0xff]   ;;  %v7567_v56 = vld [vmem:[%s10480_s7 + $0xcf4] ss:$28 sps:$4 sm:$0xff]  }
 0x377   :  { %5582 = vmatpush1.bf16.msra.mxu1 %v7496_v61  ;;  %5746 = vmatpush1.bf16.msra.mxu0 %v7499_v62  ;;  %v7562_v57 = vld [vmem:[%s10480_s7 + $0xce8] ss:$28 sps:$4 sm:$0xff]   ;;  %v7565_v25 = vld [vmem:[%s10480_s7 + $0xcf0] ss:$28 sps:$4 sm:$0xff]   ;;  %v7568_v61 = vld [vmem:[%s10480_s7 + $0xd20] ss:$28 sps:$4 sm:$0xff]  }
 0x378   :  { %5613 = vmatprep.mubr.bf16.mxu1 %v9650_v23  ;;  %5777 = vmatprep.mubr.bf16.mxu0 %v9650_v23  ;;  %v7570_v58 = vld [vmem:[%s10480_s7 + $0xd24] ss:$28 sps:$4 sm:$0xff]   ;;  %v7573_v1 = vld [vmem:[%s10480_s7 + $0xd2c] ss:$28 sps:$4 sm:$0xff]  }
 0x379   :  { %5583 = vmatprep.subr.bf16.mxu1 %v7504_v2  ;;  %5747 = vmatprep.subr.bf16.mxu0 %v7507_v3  ;;  %v7571_v62 = vld [vmem:[%s10480_s7 + $0xd28] ss:$28 sps:$4 sm:$0xff]   ;;  %v967_v2 = vsub.s32 6, %v8135_v35  ;;  %v7576_v3 = vld [vmem:[%s10480_s7 + $0xd5c] ss:$28 sps:$4 sm:$0xff]  }
 0x37b   :  { %5584 = vmatpush1.bf16.msra.mxu1 %v7502_v4  ;;  %5748 = vmatpush1.bf16.msra.mxu0 %v7505_v5  ;;  %v7579_v4 = vld [vmem:[%s10480_s7 + $0xd64] ss:$28 sps:$4 sm:$0xff]   ;;  %v7574_v5 = vld [vmem:[%s10480_s7 + $0xd58] ss:$28 sps:$4 sm:$0xff]  }
 0x37c   :  { %5585 = vmatprep.subr.bf16.mxu1 %v7510_v6  ;;  %5749 = vmatprep.subr.bf16.mxu0 %v7513_v7  ;;  %v7577_v6 = vld [vmem:[%s10480_s7 + $0xd60] ss:$28 sps:$4 sm:$0xff]   ;;  %v968_v7 = vrot.slane %v9207_v55, %v967_v2  ;;  %v7583_v55 = vld [vmem:[%s10480_s7 + $0xd98] ss:$28 sps:$4 sm:$0xff]  }
 0x37f   :  { %5586 = vmatpush1.bf16.msra.mxu1 %v7508_v49  ;;  %5750 = vmatpush1.bf16.msra.mxu0 %v7511_v11  ;;  %v7582_v49 = vld [vmem:[%s10480_s7 + $0xd94] ss:$28 sps:$4 sm:$0xff]   ;;  %v7585_v11 = vld [vmem:[%s10480_s7 + $0xd9c] ss:$28 sps:$4 sm:$0xff]  }
 0x380   :  { %5587 = vmatprep.subr.bf16.mxu1 %v7516_v15  ;;  %5751 = vmatprep.subr.bf16.mxu0 %v7519_v18  ;;  %v7580_v15 = vld [vmem:[%s10480_s7 + $0xd90] ss:$28 sps:$4 sm:$0xff]   ;;  %v7027_v18 = vadd.f32 %v9618_v41, %v968_v7  ;;  %v7637_v7 = vld [vmem:[%s10480_s7 + $0x208] ss:$28 sps:$4 sm:$0xff]  }
 0x381   :  { %v7589_v41 = vld [vmem:[%s10480_s7 + $0xdd0] ss:$28 sps:$4 sm:$0xff]  }
 0x383   :  { %5588 = vmatpush1.bf16.msra.mxu1 %v7514_v19  ;;  %5752 = vmatpush1.bf16.msra.mxu0 %v7517_v9  ;;  %v7588_v19 = vld [vmem:[%s10480_s7 + $0xdcc] ss:$28 sps:$4 sm:$0xff]   ;;  %v7591_v9 = vld [vmem:[%s10480_s7 + $0xdd4] ss:$28 sps:$4 sm:$0xff]  }
 0x384   :  { %5589 = vmatprep.subr.bf16.mxu1 %v7522_v10  ;;  %5753 = vmatprep.subr.bf16.mxu0 %v7525_v13  ;;  %v7586_v10 = vld [vmem:[%s10480_s7 + $0xdc8] ss:$28 sps:$4 sm:$0xff]   ;;  %v2595_v13 = vmax.f32 %v7027_v18, 0.0 }
 0x385   :  { %v7646_v18 = vld [vmem:[%s10480_s7 + $0x408] ss:$28 sps:$4 sm:$0xff]  }
 0x387   :  { %5590 = vmatpush1.bf16.msra.mxu1 %v7520_v16  ;;  %5754 = vmatpush1.bf16.msra.mxu0 %v7523_v59  ;;  %v7594_v16 = vld [vmem:[%s10480_s7 + $0x14] ss:$28 sps:$4 sm:$0xff]  }
 0x388   :  { %5591 = vmatprep.subr.bf16.mxu1 %v7528_v17  ;;  %5755 = vmatprep.subr.bf16.mxu0 %v7531_v21  ;;  %v7595_v59 = vld [vmem:[%s10480_s7 + $0x1d8] ss:$28 sps:$4 sm:$0xff]   ;;  %v7592_v17 = vld [vmem:[%s10480_s7 + $0x10] ss:$28 sps:$4 sm:$0xff]   ;;  %v9844_v21 = vpack.c.bf16 %v2595_v13, %v2595_v13 }
 0x389   :  { %v7654_v13 = vld [vmem:[%s10480_s7 + $0x2b4] ss:$28 sps:$4 sm:$0xff]  }
 0x38b   :  { %5592 = vmatpush1.bf16.msra.mxu1 %v7526_v22  ;;  %5756 = vmatpush1.bf16.msra.mxu0 %v7529_v27  ;;  %v7596_v22 = vld [vmem:[%s10480_s7 + $0x18] ss:$28 sps:$4 sm:$0xff]   ;;  %v7599_v27 = vld [vmem:[%s10480_s7 + $0x4c] ss:$28 sps:$4 sm:$0xff]  }
 0x38c   :  { %5593 = vmatprep.subr.bf16.mxu1 %v7534_v28  ;;  %5757 = vmatprep.subr.bf16.mxu0 %v7537_v29  ;;  %v7600_v28 = vld [vmem:[%s10480_s7 + $0x210] ss:$28 sps:$4 sm:$0xff]   ;;  %v7597_v29 = vld [vmem:[%s10480_s7 + $0x48] ss:$28 sps:$4 sm:$0xff]  }
 0x38f   :  { %5594 = vmatpush1.bf16.msra.mxu1 %v7532_v30  ;;  %5758 = vmatpush1.bf16.msra.mxu0 %v7535_v31  ;;  %v7601_v30 = vld [vmem:[%s10480_s7 + $0x50] ss:$28 sps:$4 sm:$0xff]   ;;  %v7604_v31 = vld [vmem:[%s10480_s7 + $0x84] ss:$28 sps:$4 sm:$0xff]  }
 0x390   :  { %5595 = vmatprep.subr.bf16.mxu1 %v7540_v32  ;;  %5759 = vmatprep.subr.bf16.mxu0 %v7543_v33  ;;  %v7605_v32 = vld [vmem:[%s10480_s7 + $0x248] ss:$28 sps:$4 sm:$0xff]   ;;  %v7602_v33 = vld [vmem:[%s10480_s7 + $0x80] ss:$28 sps:$4 sm:$0xff]  }
 0x393   :  { %5596 = vmatpush1.bf16.msra.mxu1 %v7538_v34  ;;  %5760 = vmatpush1.bf16.msra.mxu0 %v7541_v36  ;;  %v7609_v34 = vld [vmem:[%s10480_s7 + $0xbc] ss:$28 sps:$4 sm:$0xff]  }
 0x394   :  { %5597 = vmatprep.subr.bf16.mxu1 %v7546_v37  ;;  %5761 = vmatprep.subr.bf16.mxu0 %v7549_v38  ;;  %v7610_v36 = vld [vmem:[%s10480_s7 + $0x280] ss:$28 sps:$4 sm:$0xff]   ;;  %v7607_v37 = vld [vmem:[%s10480_s7 + $0xb8] ss:$28 sps:$4 sm:$0xff]  }
 0x395   :  { %v7611_v38 = vld [vmem:[%s10480_s7 + $0xc0] ss:$28 sps:$4 sm:$0xff]  }
 0x397   :  { %5598 = vmatpush1.bf16.msra.mxu1 %v7544_v39  ;;  %5762 = vmatpush1.bf16.msra.mxu0 %v7547_v0  ;;  %v7614_v39 = vld [vmem:[%s10480_s7 + $0xf4] ss:$28 sps:$4 sm:$0xff]  }
 0x398   :  { %5599 = vmatprep.subr.bf16.mxu1 %v7552_v43  ;;  %5763 = vmatprep.subr.bf16.mxu0 %v7555_v44  ;;  %v7615_v0 = vld [vmem:[%s10480_s7 + $0x2b8] ss:$28 sps:$4 sm:$0xff]   ;;  %v7612_v43 = vld [vmem:[%s10480_s7 + $0xf0] ss:$28 sps:$4 sm:$0xff]  }
 0x399   :  { %v7616_v44 = vld [vmem:[%s10480_s7 + $0xf8] ss:$28 sps:$4 sm:$0xff]  }
 0x39b   :  { %5600 = vmatpush1.bf16.msra.mxu1 %v7550_v45  ;;  %5764 = vmatpush1.bf16.msra.mxu0 %v7553_v46  ;;  %v7619_v45 = vld [vmem:[%s10480_s7 + $0x12c] ss:$28 sps:$4 sm:$0xff]  }
 0x39c   :  { %5601 = vmatprep.subr.bf16.mxu1 %v7558_v47  ;;  %5765 = vmatprep.subr.bf16.mxu0 %v7561_v48  ;;  %v7620_v46 = vld [vmem:[%s10480_s7 + $0x2f0] ss:$28 sps:$4 sm:$0xff]   ;;  %v7617_v47 = vld [vmem:[%s10480_s7 + $0x128] ss:$28 sps:$4 sm:$0xff]  }
 0x39d   :  { %v7621_v48 = vld [vmem:[%s10480_s7 + $0x130] ss:$28 sps:$4 sm:$0xff]  }
 0x39f   :  { %5602 = vmatpush1.bf16.msra.mxu1 %v7556_v51  ;;  %5766 = vmatpush1.bf16.msra.mxu0 %v7559_v52  ;;  %v7624_v51 = vld [vmem:[%s10480_s7 + $0x164] ss:$28 sps:$4 sm:$0xff]  }
 0x3a0   :  { %5603 = vmatprep.subr.bf16.mxu1 %v7564_v54  ;;  %5767 = vmatprep.subr.bf16.mxu0 %v7567_v56  ;;  %v7625_v52 = vld [vmem:[%s10480_s7 + $0x328] ss:$28 sps:$4 sm:$0xff]   ;;  %v7622_v54 = vld [vmem:[%s10480_s7 + $0x160] ss:$28 sps:$4 sm:$0xff]  }
 0x3a1   :  { %v7626_v56 = vld [vmem:[%s10480_s7 + $0x168] ss:$28 sps:$4 sm:$0xff]  }
 0x3a3   :  { %5604 = vmatpush1.bf16.msra.mxu1 %v7562_v57  ;;  %5768 = vmatpush1.bf16.msra.mxu0 %v7565_v25  ;;  %v7629_v57 = vld [vmem:[%s10480_s7 + $0x19c] ss:$28 sps:$4 sm:$0xff]  }
 0x3a4   :  { %5605 = vmatprep.subr.bf16.mxu1 %v7570_v58  ;;  %5769 = vmatprep.subr.bf16.mxu0 %v7573_v1  ;;  %v7630_v25 = vld [vmem:[%s10480_s7 + $0x360] ss:$28 sps:$4 sm:$0xff]   ;;  %v7627_v58 = vld [vmem:[%s10480_s7 + $0x198] ss:$28 sps:$4 sm:$0xff]  }
 0x3a5   :  { %v7631_v1 = vld [vmem:[%s10480_s7 + $0x1a0] ss:$28 sps:$4 sm:$0xff]  }
 0x3a7   :  { %5606 = vmatpush1.bf16.msra.mxu1 %v7568_v61  ;;  %5770 = vmatpush1.bf16.msra.mxu0 %v7571_v62  ;;  %v7634_v61 = vld [vmem:[%s10480_s7 + $0x1d4] ss:$28 sps:$4 sm:$0xff]  }
 0x3a8   :  { %5607 = vmatprep.subr.bf16.mxu1 %v7576_v3  ;;  %5771 = vmatprep.subr.bf16.mxu0 %v7579_v4  ;;  %v7635_v62 = vld [vmem:[%s10480_s7 + $0x558] ss:$28 sps:$4 sm:$0xff]   ;;  %v7632_v3 = vld [vmem:[%s10480_s7 + $0x1d0] ss:$28 sps:$4 sm:$0xff]  }
 0x3a9   :  { %v7636_v4 = vld [vmem:[%s10480_s7 + $0x398] ss:$28 sps:$4 sm:$0xff]  }
 0x3ab   :  { %5608 = vmatpush1.bf16.msra.mxu1 %v7574_v5  ;;  %5772 = vmatpush1.bf16.msra.mxu0 %v7577_v6  ;;  %v7639_v5 = vld [vmem:[%s10480_s7 + $0x20c] ss:$28 sps:$4 sm:$0xff]  }
 0x3ac   :  { %5609 = vmatprep.subr.bf16.mxu1 %v7582_v49  ;;  %5773 = vmatprep.subr.bf16.mxu0 %v7585_v11  ;;  %v7640_v6 = vld [vmem:[%s10480_s7 + $0x590] ss:$28 sps:$4 sm:$0xff]   ;;  %v7644_v11 = vld [vmem:[%s10480_s7 + $0x244] ss:$28 sps:$4 sm:$0xff]  }
 0x3ad   :  { %v7641_v49 = vld [vmem:[%s10480_s7 + $0x3d0] ss:$28 sps:$4 sm:$0xff]  }
 0x3af   :  { %5610 = vmatpush1.bf16.msra.mxu1 %v7580_v15  ;;  %5774 = vmatpush1.bf16.msra.mxu0 %v7583_v55  ;;  %v7645_v15 = vld [vmem:[%s10480_s7 + $0x5c8] ss:$28 sps:$4 sm:$0xff]   ;;  %v7642_v55 = vld [vmem:[%s10480_s7 + $0x240] ss:$28 sps:$4 sm:$0xff]  }
 0x3b0   :  { %5611 = vmatprep.subr.bf16.mxu1 %v7588_v19  ;;  %5775 = vmatprep.subr.bf16.mxu0 %v7591_v9  ;;  %v7649_v19 = vld [vmem:[%s10480_s7 + $0x27c] ss:$28 sps:$4 sm:$0xff]  }
 0x3b1   :  { %v7650_v9 = vld [vmem:[%s10480_s7 + $0x600] ss:$28 sps:$4 sm:$0xff]  }
 0x3b3   :  { %5612 = vmatpush1.bf16.msra.mxu1 %v7586_v10  ;;  %5776 = vmatpush1.bf16.msra.mxu0 %v7589_v41  ;;  %v7647_v10 = vld [vmem:[%s10480_s7 + $0x278] ss:$28 sps:$4 sm:$0xff]   ;;  %v7651_v41 = vld [vmem:[%s10480_s7 + $0x440] ss:$28 sps:$4 sm:$0xff]  }
 0x3b4   :  { %5786 = vmatprep.subr.bf16.mxu1 %v7594_v16  ;;  %6933 = vmatprep.subr.bf16.mxu0 %v7595_v59  ;;  %v7655_v16 = vld [vmem:[%s10480_s7 + $0x638] ss:$28 sps:$4 sm:$0xff]   ;;  %v7652_v59 = vld [vmem:[%s10480_s7 + $0x2b0] ss:$28 sps:$4 sm:$0xff]  }
 0x3b6   :  { %5614 = vmatmul.mubr.bf16.vlgmr.msra.gmra.mrb[8].mxu1 %v9844_v21  ;;  %5778 = vmatmul.mubr.bf16.vlgmr.msra.gmra.mrb[20].mxu0 %v9844_v21 }
 0x3b7   :  { %5787 = vmatpush1.bf16.msra.mxu1 %v7592_v17  ;;  %5818 = vmatprep.mubr.bf16.mxu1 %v9223_v12  ;;  %v7656_v17 = vld [vmem:[%s10480_s7 + $0x478] ss:$28 sps:$4 sm:$0xff]  }
 0x3b8   :  { %6934 = vmatpush3.bf16.msra.mxu0 %v7596_v22  ;;  %5982 = vmatprep.mubr.bf16.mxu0 %v9223_v12  ;;  %v7606_v12 = vld [vmem:[%s10480_s7 + $0x88] ss:$28 sps:$4 sm:$0xff]  }
 0x3b9   :  { %5788 = vmatprep.subr.bf16.mxu1 %v7599_v27  ;;  %6935 = vmatprep.subr.bf16.mxu0 %v7600_v28  ;;  %v7659_v22 = vld [vmem:[%s10480_s7 + $0x2ec] ss:$28 sps:$4 sm:$0xff]  }
 0x3ba   :  { %v7660_v27 = vld [vmem:[%s10480_s7 + $0x670] ss:$28 sps:$4 sm:$0xff]   ;;  %v7657_v28 = vld [vmem:[%s10480_s7 + $0x2e8] ss:$28 sps:$4 sm:$0xff]  }
 0x3bb   :  { %5789 = vmatpush1.bf16.msra.mxu1 %v7597_v29  ;;  %v7661_v29 = vld [vmem:[%s10480_s7 + $0x4b0] ss:$28 sps:$4 sm:$0xff]  }
 0x3bc   :  { %6936 = vmatpush3.bf16.msra.mxu0 %v7601_v30  ;;  %5790 = vmatprep.subr.bf16.mxu1 %v7604_v31  ;;  %v7664_v30 = vld [vmem:[%s10480_s7 + $0x324] ss:$28 sps:$4 sm:$0xff]  }
 0x3bd   :  { %6937 = vmatprep.subr.bf16.mxu0 %v7605_v32  ;;  %v7665_v31 = vld [vmem:[%s10480_s7 + $0x6a8] ss:$28 sps:$4 sm:$0xff]   ;;  %v7662_v32 = vld [vmem:[%s10480_s7 + $0x320] ss:$28 sps:$4 sm:$0xff]  }
 0x3bf   :  { %5791 = vmatpush1.bf16.msra.mxu1 %v7602_v33  ;;  %v7666_v33 = vld [vmem:[%s10480_s7 + $0x4e8] ss:$28 sps:$4 sm:$0xff]  }
 0x3c0   :  { %6938 = vmatpush3.bf16.msra.mxu0 %v7606_v12  ;;  %5792 = vmatprep.subr.bf16.mxu1 %v7609_v34  ;;  %v7669_v12 = vld [vmem:[%s10480_s7 + $0x35c] ss:$28 sps:$4 sm:$0xff]  }
 0x3c1   :  { %6939 = vmatprep.subr.bf16.mxu0 %v7610_v36  ;;  %v7670_v34 = vld [vmem:[%s10480_s7 + $0x6e0] ss:$28 sps:$4 sm:$0xff]   ;;  %v7667_v36 = vld [vmem:[%s10480_s7 + $0x358] ss:$28 sps:$4 sm:$0xff]  }
 0x3c3   :  { %5793 = vmatpush1.bf16.msra.mxu1 %v7607_v37  ;;  %v7671_v37 = vld [vmem:[%s10480_s7 + $0x520] ss:$28 sps:$4 sm:$0xff]  }
 0x3c4   :  { %6940 = vmatpush3.bf16.msra.mxu0 %v7611_v38  ;;  %5794 = vmatprep.subr.bf16.mxu1 %v7614_v39  ;;  %v7674_v38 = vld [vmem:[%s10480_s7 + $0x394] ss:$28 sps:$4 sm:$0xff]  }
 0x3c5   :  { %6941 = vmatprep.subr.bf16.mxu0 %v7615_v0  ;;  %v7675_v39 = vld [vmem:[%s10480_s7 + $0x8d8] ss:$28 sps:$4 sm:$0xff]   ;;  %v7672_v0 = vld [vmem:[%s10480_s7 + $0x390] ss:$28 sps:$4 sm:$0xff]  }
 0x3c7   :  { %5795 = vmatpush1.bf16.msra.mxu1 %v7612_v43  ;;  %v7676_v43 = vld [vmem:[%s10480_s7 + $0x718] ss:$28 sps:$4 sm:$0xff]  }
 0x3c8   :  { %6942 = vmatpush3.bf16.msra.mxu0 %v7616_v44  ;;  %5796 = vmatprep.subr.bf16.mxu1 %v7619_v45  ;;  %v7679_v44 = vld [vmem:[%s10480_s7 + $0x3cc] ss:$28 sps:$4 sm:$0xff]  }
 0x3c9   :  { %6943 = vmatprep.subr.bf16.mxu0 %v7620_v46  ;;  %v7680_v45 = vld [vmem:[%s10480_s7 + $0x910] ss:$28 sps:$4 sm:$0xff]   ;;  %v7677_v46 = vld [vmem:[%s10480_s7 + $0x3c8] ss:$28 sps:$4 sm:$0xff]  }
 0x3cb   :  { %5797 = vmatpush1.bf16.msra.mxu1 %v7617_v47  ;;  %v7681_v47 = vld [vmem:[%s10480_s7 + $0x750] ss:$28 sps:$4 sm:$0xff]  }
 0x3cc   :  { %6944 = vmatpush3.bf16.msra.mxu0 %v7621_v48  ;;  %5798 = vmatprep.subr.bf16.mxu1 %v7624_v51  ;;  %v7685_v48 = vld [vmem:[%s10480_s7 + $0x948] ss:$28 sps:$4 sm:$0xff]  }
 0x3cd   :  { %6945 = vmatprep.subr.bf16.mxu0 %v7625_v52  ;;  %v7686_v51 = vld [vmem:[%s10480_s7 + $0x788] ss:$28 sps:$4 sm:$0xff]   ;;  %v7689_v52 = vld [vmem:[%s10480_s7 + $0x43c] ss:$28 sps:$4 sm:$0xff]  }
 0x3cf   :  { %5799 = vmatpush1.bf16.msra.mxu1 %v7622_v54  ;;  %v7690_v54 = vld [vmem:[%s10480_s7 + $0x980] ss:$28 sps:$4 sm:$0xff]  }
 0x3d0   :  { %6946 = vmatpush3.bf16.msra.mxu0 %v7626_v56  ;;  %5800 = vmatprep.subr.bf16.mxu1 %v7629_v57  ;;  %v7687_v56 = vld [vmem:[%s10480_s7 + $0x438] ss:$28 sps:$4 sm:$0xff]   ;;  %v7691_v57 = vld [vmem:[%s10480_s7 + $0x7c0] ss:$28 sps:$4 sm:$0xff]  }
 0x3d1   :  { %6947 = vmatprep.subr.bf16.mxu0 %v7630_v25  ;;  %v7694_v25 = vld [vmem:[%s10480_s7 + $0x474] ss:$28 sps:$4 sm:$0xff]  }
 0x3d3   :  { %5801 = vmatpush1.bf16.msra.mxu1 %v7627_v58  ;;  %v7695_v58 = vld [vmem:[%s10480_s7 + $0x9b8] ss:$28 sps:$4 sm:$0xff]  }
 0x3d4   :  { %6948 = vmatpush3.bf16.msra.mxu0 %v7631_v1  ;;  %5802 = vmatprep.subr.bf16.mxu1 %v7634_v61  ;;  %v7692_v1 = vld [vmem:[%s10480_s7 + $0x470] ss:$28 sps:$4 sm:$0xff]   ;;  %v7696_v61 = vld [vmem:[%s10480_s7 + $0x7f8] ss:$28 sps:$4 sm:$0xff]  }
 0x3d5   :  { %6955 = vmatprep.subr.bf16.mxu0 %v7635_v62  ;;  %v7699_v62 = vld [vmem:[%s10480_s7 + $0x4ac] ss:$28 sps:$4 sm:$0xff]  }
 0x3d7   :  { %5983 = vmatmul.mubr.bf16.vlgmr.msra.gmra.mrb[24].mxu0 %v9225_v14  ;;  %5803 = vmatpush1.bf16.msra.mxu1 %v7632_v3  ;;  %v7700_v3 = vld [vmem:[%s10480_s7 + $0x9f0] ss:$28 sps:$4 sm:$0xff]  }
 0x3d8   :  { %6956 = vmatpush3.bf16.msra.mxu0 %v7636_v4  ;;  %6022 = vmatprep.mubr.bf16.mxu0 %v9238_v8  ;;  %v7697_v4 = vld [vmem:[%s10480_s7 + $0x4a8] ss:$28 sps:$4 sm:$0xff]  }
 0x3d9   :  { %5804 = vmatprep.subr.bf16.mxu1 %v7639_v5  ;;  %6957 = vmatprep.subr.bf16.mxu0 %v7640_v6  ;;  %v7701_v5 = vld [vmem:[%s10480_s7 + $0x830] ss:$28 sps:$4 sm:$0xff]   ;;  %v7704_v6 = vld [vmem:[%s10480_s7 + $0x4e4] ss:$28 sps:$4 sm:$0xff]  }
 0x3db   :  { %5805 = vmatpush1.bf16.msra.mxu1 %v7637_v7  ;;  %v7705_v7 = vld [vmem:[%s10480_s7 + $0xa28] ss:$28 sps:$4 sm:$0xff]  }
 0x3dc   :  { %6958 = vmatpush3.bf16.msra.mxu0 %v7641_v49  ;;  %5806 = vmatprep.subr.bf16.mxu1 %v7644_v11  ;;  %v7702_v49 = vld [vmem:[%s10480_s7 + $0x4e0] ss:$28 sps:$4 sm:$0xff]   ;;  %v7706_v11 = vld [vmem:[%s10480_s7 + $0x868] ss:$28 sps:$4 sm:$0xff]  }
 0x3dd   :  { %6959 = vmatprep.subr.bf16.mxu0 %v7645_v15  ;;  %v7709_v15 = vld [vmem:[%s10480_s7 + $0x51c] ss:$28 sps:$4 sm:$0xff]  }
 0x3df   :  { %5807 = vmatpush1.bf16.msra.mxu1 %v7642_v55  ;;  %v7710_v55 = vld [vmem:[%s10480_s7 + $0xa60] ss:$28 sps:$4 sm:$0xff]  }
 0x3e0   :  { %6960 = vmatpush3.bf16.msra.mxu0 %v7646_v18  ;;  %5808 = vmatprep.subr.bf16.mxu1 %v7649_v19  ;;  %v7707_v18 = vld [vmem:[%s10480_s7 + $0x518] ss:$28 sps:$4 sm:$0xff]   ;;  %v7711_v19 = vld [vmem:[%s10480_s7 + $0x8a0] ss:$28 sps:$4 sm:$0xff]  }
 0x3e1   :  { %6961 = vmatprep.subr.bf16.mxu0 %v7650_v9  ;;  %v7714_v9 = vld [vmem:[%s10480_s7 + $0x554] ss:$28 sps:$4 sm:$0xff]  }
 0x3e3   :  { %5809 = vmatpush1.bf16.msra.mxu1 %v7647_v10  ;;  %v7715_v10 = vld [vmem:[%s10480_s7 + $0xc58] ss:$28 sps:$4 sm:$0xff]  }
 0x3e4   :  { %6962 = vmatpush3.bf16.msra.mxu0 %v7651_v41  ;;  %5810 = vmatprep.subr.bf16.mxu1 %v7654_v13  ;;  %v7712_v41 = vld [vmem:[%s10480_s7 + $0x550] ss:$28 sps:$4 sm:$0xff]   ;;  %v7716_v13 = vld [vmem:[%s10480_s7 + $0xa98] ss:$28 sps:$4 sm:$0xff]  }
 0x3e5   :  { %6963 = vmatprep.subr.bf16.mxu0 %v7655_v16  ;;  %v7719_v16 = vld [vmem:[%s10480_s7 + $0x58c] ss:$28 sps:$4 sm:$0xff]  }
 0x3e7   :  { %5811 = vmatpush1.bf16.msra.mxu1 %v7652_v59  ;;  %v7720_v59 = vld [vmem:[%s10480_s7 + $0xc90] ss:$28 sps:$4 sm:$0xff]  }
 0x3e8   :  { %6964 = vmatpush3.bf16.msra.mxu0 %v7656_v17  ;;  %5812 = vmatprep.subr.bf16.mxu1 %v7659_v22  ;;  %v7717_v17 = vld [vmem:[%s10480_s7 + $0x588] ss:$28 sps:$4 sm:$0xff]   ;;  %v7721_v22 = vld [vmem:[%s10480_s7 + $0xad0] ss:$28 sps:$4 sm:$0xff]  }
 0x3e9   :  { %6965 = vmatprep.subr.bf16.mxu0 %v7660_v27  ;;  %v7724_v27 = vld [vmem:[%s10480_s7 + $0x5c4] ss:$28 sps:$4 sm:$0xff]  }
 0x3eb   :  { %5813 = vmatpush1.bf16.msra.mxu1 %v7657_v28  ;;  %v7725_v28 = vld [vmem:[%s10480_s7 + $0xcc8] ss:$28 sps:$4 sm:$0xff]  }
 0x3ec   :  { %6966 = vmatpush3.bf16.msra.mxu0 %v7661_v29  ;;  %5814 = vmatprep.subr.bf16.mxu1 %v7664_v30  ;;  %v7722_v29 = vld [vmem:[%s10480_s7 + $0x5c0] ss:$28 sps:$4 sm:$0xff]   ;;  %v7726_v30 = vld [vmem:[%s10480_s7 + $0xb08] ss:$28 sps:$4 sm:$0xff]  }
 0x3ed   :  { %6967 = vmatprep.subr.bf16.mxu0 %v7665_v31  ;;  %v7729_v31 = vld [vmem:[%s10480_s7 + $0x5fc] ss:$28 sps:$4 sm:$0xff]  }
 0x3ef   :  { %5815 = vmatpush1.bf16.msra.mxu1 %v7662_v32  ;;  %v7730_v32 = vld [vmem:[%s10480_s7 + $0xd00] ss:$28 sps:$4 sm:$0xff]  }
 0x3f0   :  { %6968 = vmatpush3.bf16.msra.mxu0 %v7666_v33  ;;  %5816 = vmatprep.subr.bf16.mxu1 %v7669_v12  ;;  %v7727_v33 = vld [vmem:[%s10480_s7 + $0x5f8] ss:$28 sps:$4 sm:$0xff]   ;;  %v7731_v12 = vld [vmem:[%s10480_s7 + $0xb40] ss:$28 sps:$4 sm:$0xff]  }
 0x3f1   :  { %6969 = vmatprep.subr.bf16.mxu0 %v7670_v34  ;;  %v7734_v34 = vld [vmem:[%s10480_s7 + $0x634] ss:$28 sps:$4 sm:$0xff]  }
 0x3f3   :  { %5817 = vmatpush1.bf16.msra.mxu1 %v7667_v36  ;;  %v7735_v36 = vld [vmem:[%s10480_s7 + $0xd38] ss:$28 sps:$4 sm:$0xff]  }
 0x3f4   :  { %6970 = vmatpush3.bf16.msra.mxu0 %v7671_v37  ;;  %5827 = vmatprep.subr.bf16.mxu1 %v7674_v38  ;;  %v7732_v37 = vld [vmem:[%s10480_s7 + $0x630] ss:$28 sps:$4 sm:$0xff]   ;;  %v7736_v38 = vld [vmem:[%s10480_s7 + $0xb78] ss:$28 sps:$4 sm:$0xff]  }
 0x3f5   :  { %6977 = vmatprep.subr.bf16.mxu0 %v7675_v39  ;;  %v7739_v39 = vld [vmem:[%s10480_s7 + $0x66c] ss:$28 sps:$4 sm:$0xff]  }
 0x3f6   :  { %5819 = vmatmul.mubr.bf16.vlgmr.msra.gmra.mrb[12].mxu1 %v9225_v14  ;;  %v7684_v14 = vld [vmem:[%s10480_s7 + $0x404] ss:$28 sps:$4 sm:$0xff]  }
 0x3f7   :  { %6023 = vmatmul.mubr.bf16.vlgmr.msra.gmra.mrb[28].mxu0 %v9430_v26  ;;  %5828 = vmatpush1.bf16.msra.mxu1 %v7672_v0  ;;  %v7740_v0 = vld [vmem:[%s10480_s7 + $0xd70] ss:$28 sps:$4 sm:$0xff]  }
 0x3f8   :  { %5859 = vmatprep.mubr.bf16.mxu1 %v9238_v8  ;;  %6978 = vmatpush3.bf16.msra.mxu0 %v7676_v43  ;;  %v7682_v8 = vld [vmem:[%s10480_s7 + $0x400] ss:$28 sps:$4 sm:$0xff]   ;;  %v7737_v43 = vld [vmem:[%s10480_s7 + $0x668] ss:$28 sps:$4 sm:$0xff]  }
 0x3f9   :  { %6062 = vmatprep.mubr.bf16.mxu0 %v9632_v60  ;;  %5829 = vmatprep.subr.bf16.mxu1 %v7679_v44  ;;  %v7741_v44 = vld [vmem:[%s10480_s7 + $0xbb0] ss:$28 sps:$4 sm:$0xff]  }
 0x3fa   :  { %6979 = vmatprep.subr.bf16.mxu0 %v7680_v45  ;;  %v7744_v45 = vld [vmem:[%s10480_s7 + $0x6a4] ss:$28 sps:$4 sm:$0xff]  }
 0x3fb   :  { %5830 = vmatpush1.bf16.msra.mxu1 %v7677_v46  ;;  %v7745_v46 = vld [vmem:[%s10480_s7 + $0xda8] ss:$28 sps:$4 sm:$0xff]  }
 0x3fc   :  { %6980 = vmatpush3.bf16.msra.mxu0 %v7681_v47  ;;  %5831 = vmatprep.subr.bf16.mxu1 %v7684_v14  ;;  %v7742_v47 = vld [vmem:[%s10480_s7 + $0x6a0] ss:$28 sps:$4 sm:$0xff]   ;;  %v7746_v14 = vld [vmem:[%s10480_s7 + $0xbe8] ss:$28 sps:$4 sm:$0xff]  }
 0x3fd   :  { %6981 = vmatprep.subr.bf16.mxu0 %v7685_v48  ;;  %v7749_v48 = vld [vmem:[%s10480_s7 + $0x6dc] ss:$28 sps:$4 sm:$0xff]  }
 0x3ff   :  { %5832 = vmatpush1.bf16.msra.mxu1 %v7682_v8  ;;  %v7750_v8 = vld [vmem:[%s10480_s7 + $0xde0] ss:$28 sps:$4 sm:$0xff]  }
 0x400   :  { %6982 = vmatpush3.bf16.msra.mxu0 %v7686_v51  ;;  %5833 = vmatprep.subr.bf16.mxu1 %v7689_v52  ;;  %v7747_v51 = vld [vmem:[%s10480_s7 + $0x6d8] ss:$28 sps:$4 sm:$0xff]   ;;  %v7751_v52 = vld [vmem:[%s10480_s7 + $0xc20] ss:$28 sps:$4 sm:$0xff]  }
 0x401   :  { %6983 = vmatprep.subr.bf16.mxu0 %v7690_v54  ;;  %v7754_v54 = vld [vmem:[%s10480_s7 + $0x714] ss:$28 sps:$4 sm:$0xff]  }
 0x403   :  { %5834 = vmatpush1.bf16.msra.mxu1 %v7687_v56  ;;  %v7752_v56 = vld [vmem:[%s10480_s7 + $0x710] ss:$28 sps:$4 sm:$0xff]  }
 0x404   :  { %6984 = vmatpush3.bf16.msra.mxu0 %v7691_v57  ;;  %5835 = vmatprep.subr.bf16.mxu1 %v7694_v25  ;;  %v7757_v57 = vld [vmem:[%s10480_s7 + $0x74c] ss:$28 sps:$4 sm:$0xff]  }
 0x405   :  { %6985 = vmatprep.subr.bf16.mxu0 %v7695_v58  ;;  %v7755_v25 = vld [vmem:[%s10480_s7 + $0x748] ss:$28 sps:$4 sm:$0xff]  }
 0x406   :  { %v7760_v58 = vld [vmem:[%s10480_s7 + $0x784] ss:$28 sps:$4 sm:$0xff]  }
 0x407   :  { %5836 = vmatpush1.bf16.msra.mxu1 %v7692_v1  ;;  %v7758_v1 = vld [vmem:[%s10480_s7 + $0x780] ss:$28 sps:$4 sm:$0xff]  }
 0x408   :  { %6986 = vmatpush3.bf16.msra.mxu0 %v7696_v61  ;;  %5837 = vmatprep.subr.bf16.mxu1 %v7699_v62  ;;  %v7766_v61 = vld [vmem:[%s10480_s7 + $0x7f4] ss:$28 sps:$4 sm:$0xff]  }
 0x409   :  { %6987 = vmatprep.subr.bf16.mxu0 %v7700_v3  ;;  %v7764_v62 = vld [vmem:[%s10480_s7 + $0x7f0] ss:$28 sps:$4 sm:$0xff]  }
 0x40a   :  { %v7769_v3 = vld [vmem:[%s10480_s7 + $0x82c] ss:$28 sps:$4 sm:$0xff]  }
 0x40b   :  { %5838 = vmatpush1.bf16.msra.mxu1 %v7697_v4  ;;  %v7767_v4 = vld [vmem:[%s10480_s7 + $0x828] ss:$28 sps:$4 sm:$0xff]  }
 0x40c   :  { %6988 = vmatpush3.bf16.msra.mxu0 %v7701_v5  ;;  %5839 = vmatprep.subr.bf16.mxu1 %v7704_v6  ;;  %v7772_v5 = vld [vmem:[%s10480_s7 + $0x864] ss:$28 sps:$4 sm:$0xff]  }
 0x40d   :  { %6989 = vmatprep.subr.bf16.mxu0 %v7705_v7  ;;  %v7770_v6 = vld [vmem:[%s10480_s7 + $0x860] ss:$28 sps:$4 sm:$0xff]  }
 0x40e   :  { %v7775_v7 = vld [vmem:[%s10480_s7 + $0x89c] ss:$28 sps:$4 sm:$0xff]  }
 0x40f   :  { %5840 = vmatpush1.bf16.msra.mxu1 %v7702_v49  ;;  %v7773_v49 = vld [vmem:[%s10480_s7 + $0x898] ss:$28 sps:$4 sm:$0xff]  }
 0x410   :  { %6990 = vmatpush3.bf16.msra.mxu0 %v7706_v11  ;;  %5841 = vmatprep.subr.bf16.mxu1 %v7709_v15  ;;  %v7778_v11 = vld [vmem:[%s10480_s7 + $0x8d4] ss:$28 sps:$4 sm:$0xff]  }
 0x411   :  { %6991 = vmatprep.subr.bf16.mxu0 %v7710_v55  ;;  %v7776_v15 = vld [vmem:[%s10480_s7 + $0x8d0] ss:$28 sps:$4 sm:$0xff]  }
 0x412   :  { %v7781_v55 = vld [vmem:[%s10480_s7 + $0x90c] ss:$28 sps:$4 sm:$0xff]  }
 0x413   :  { %5842 = vmatpush1.bf16.msra.mxu1 %v7707_v18  ;;  %v7779_v18 = vld [vmem:[%s10480_s7 + $0x908] ss:$28 sps:$4 sm:$0xff]  }
 0x414   :  { %6992 = vmatpush3.bf16.msra.mxu0 %v7711_v19  ;;  %5843 = vmatprep.subr.bf16.mxu1 %v7714_v9  ;;  %v7784_v19 = vld [vmem:[%s10480_s7 + $0x944] ss:$28 sps:$4 sm:$0xff]  }
 0x415   :  { %6999 = vmatprep.subr.bf16.mxu0 %v7715_v10  ;;  %v7782_v9 = vld [vmem:[%s10480_s7 + $0x940] ss:$28 sps:$4 sm:$0xff]  }
 0x416   :  { %v7787_v10 = vld [vmem:[%s10480_s7 + $0x97c] ss:$28 sps:$4 sm:$0xff]  }
 0x417   :  { %6063 = vmatmul.mubr.bf16.vlgmr.msra.gmra.mrb[32].mxu0 %v9640_v63  ;;  %5844 = vmatpush1.bf16.msra.mxu1 %v7712_v41  ;;  %v7785_v41 = vld [vmem:[%s10480_s7 + $0x978] ss:$28 sps:$4 sm:$0xff]  }
 0x418   :  { %7000 = vmatpush3.bf16.msra.mxu0 %v7716_v13  ;;  %6102 = vmatprep.mubr.bf16.mxu0 %v9650_v23  ;;  %v7790_v13 = vld [vmem:[%s10480_s7 + $0x9b4] ss:$28 sps:$4 sm:$0xff]  }
 0x419   :  { %5845 = vmatprep.subr.bf16.mxu1 %v7719_v16  ;;  %7001 = vmatprep.subr.bf16.mxu0 %v7720_v59  ;;  %v7788_v16 = vld [vmem:[%s10480_s7 + $0x9b0] ss:$28 sps:$4 sm:$0xff]  }
 0x41a   :  { %v7793_v59 = vld [vmem:[%s10480_s7 + $0x9ec] ss:$28 sps:$4 sm:$0xff]  }
 0x41b   :  { %5846 = vmatpush1.bf16.msra.mxu1 %v7717_v17  ;;  %v7791_v17 = vld [vmem:[%s10480_s7 + $0x9e8] ss:$28 sps:$4 sm:$0xff]  }
 0x41c   :  { %7002 = vmatpush3.bf16.msra.mxu0 %v7721_v22  ;;  %5847 = vmatprep.subr.bf16.mxu1 %v7724_v27  ;;  %v7796_v22 = vld [vmem:[%s10480_s7 + $0xa24] ss:$28 sps:$4 sm:$0xff]  }
 0x41d   :  { %7003 = vmatprep.subr.bf16.mxu0 %v7725_v28  ;;  %v7794_v27 = vld [vmem:[%s10480_s7 + $0xa20] ss:$28 sps:$4 sm:$0xff]  }
 0x41e   :  { %v7799_v28 = vld [vmem:[%s10480_s7 + $0xa5c] ss:$28 sps:$4 sm:$0xff]  }
 0x41f   :  { %5848 = vmatpush1.bf16.msra.mxu1 %v7722_v29  ;;  %v7797_v29 = vld [vmem:[%s10480_s7 + $0xa58] ss:$28 sps:$4 sm:$0xff]  }
 0x420   :  { %7004 = vmatpush3.bf16.msra.mxu0 %v7726_v30  ;;  %5849 = vmatprep.subr.bf16.mxu1 %v7729_v31  ;;  %v7802_v30 = vld [vmem:[%s10480_s7 + $0xa94] ss:$28 sps:$4 sm:$0xff]  }
 0x421   :  { %7005 = vmatprep.subr.bf16.mxu0 %v7730_v32  ;;  %v7800_v31 = vld [vmem:[%s10480_s7 + $0xa90] ss:$28 sps:$4 sm:$0xff]  }
 0x422   :  { %v7805_v32 = vld [vmem:[%s10480_s7 + $0xacc] ss:$28 sps:$4 sm:$0xff]  }
 0x423   :  { %5850 = vmatpush1.bf16.msra.mxu1 %v7727_v33  ;;  %v7803_v33 = vld [vmem:[%s10480_s7 + $0xac8] ss:$28 sps:$4 sm:$0xff]  }
 0x424   :  { %7006 = vmatpush3.bf16.msra.mxu0 %v7731_v12  ;;  %5851 = vmatprep.subr.bf16.mxu1 %v7734_v34  ;;  %v7808_v12 = vld [vmem:[%s10480_s7 + $0xb04] ss:$28 sps:$4 sm:$0xff]  }
 0x425   :  { %7007 = vmatprep.subr.bf16.mxu0 %v7735_v36  ;;  %v7806_v34 = vld [vmem:[%s10480_s7 + $0xb00] ss:$28 sps:$4 sm:$0xff]   ;;  %v7814_v36 = vld [vmem:[%s10480_s7 + $0xb74] ss:$28 sps:$4 sm:$0xff]  }
 0x427   :  { %5852 = vmatpush1.bf16.msra.mxu1 %v7732_v37  ;;  %v7812_v37 = vld [vmem:[%s10480_s7 + $0xb70] ss:$28 sps:$4 sm:$0xff]  }
 0x428   :  { %7008 = vmatpush3.bf16.msra.mxu0 %v7736_v38  ;;  %5853 = vmatprep.subr.bf16.mxu1 %v7739_v39  ;;  %v10367_v38 = vld [vmem:[%s10482_s8] sm:$0xff]  ;;  %v7817_v39 = vld [vmem:[%s10480_s7 + $0xbac] ss:$28 sps:$4 sm:$0xff]  }
 0x429   :  { %7009 = vmatprep.subr.bf16.mxu0 %v7740_v0  ;;  %v3122_v0 = vrot.slane %v10367_v38, %v8144_v40 }
 0x42b   :  { %5854 = vmatpush1.bf16.msra.mxu1 %v7737_v43  ;;  %v3130_v43 = vrot.slane %v10367_v38, %v8585_v50 }
 0x42c   :  { %7010 = vmatpush3.bf16.msra.mxu0 %v7741_v44  ;;  %5855 = vmatprep.subr.bf16.mxu1 %v7744_v45  ;;  %v3126_v44 = vrot.slane %v10367_v38, %v8150_v42  ;;  %v3134_v45 = vrot.slane %v10367_v38, %v8588_v53  ;;  %v7818_v53 = vld [vmem:[%s10480_s7 + $0xbe0] ss:$28 sps:$4 sm:$0xff]  }
 0x42d   :  { %7011 = vmatprep.subr.bf16.mxu0 %v7745_v46  ;;  %v7815_v46 = vld [vmem:[%s10480_s7 + $0xba8] ss:$28 sps:$4 sm:$0xff]  }
 0x42f   :  { %5856 = vmatpush1.bf16.msra.mxu1 %v7742_v47  ;;  %v7820_v47 = vld [vmem:[%s10480_s7 + $0xbe4] ss:$28 sps:$4 sm:$0xff]  }
 0x430   :  { %7012 = vmatpush3.bf16.msra.mxu0 %v7746_v14  ;;  %5857 = vmatprep.subr.bf16.mxu1 %v7749_v48 }
 0x431   :  { %7013 = vmatprep.subr.bf16.mxu0 %v7750_v8 }
 0x433   :  { %5858 = vmatpush1.bf16.msra.mxu1 %v7747_v51 }
 0x434   :  { %7014 = vmatpush3.bf16.msra.mxu0 %v7751_v52  ;;  %5868 = vmatprep.subr.bf16.mxu1 %v7754_v54 }
 0x436   :  { %5860 = vmatmul.mubr.bf16.vlgmr.msra.gmra.mrb[12].mxu1 %v9430_v26  ;;  %v7763_v26 = vld [vmem:[%s10480_s7 + $0x7bc] ss:$28 sps:$4 sm:$0xff]  }
 0x437   :  { %6103 = vmatmul.mubr.bf16.vlgmr.msra.gmra.mrb[36].mxu0 %v9844_v21  ;;  %5869 = vmatpush1.bf16.msra.mxu1 %v7752_v56 }
 0x438   :  { %5900 = vmatprep.mubr.bf16.mxu1 %v9632_v60  ;;  %5870 = vmatprep.subr.bf16.mxu1 %v7757_v57  ;;  %v7761_v60 = vld [vmem:[%s10480_s7 + $0x7b8] ss:$28 sps:$4 sm:$0xff]  }
 0x43b   :  { %5871 = vmatpush1.bf16.msra.mxu1 %v7755_v25 }
 0x43c   :  { %5872 = vmatprep.subr.bf16.mxu1 %v7760_v58 }
 0x43f   :  { %5873 = vmatpush1.bf16.msra.mxu1 %v7758_v1 }
 0x440   :  { %5874 = vmatprep.subr.bf16.mxu1 %v7763_v26  ;;  %v7823_v26 = vld [vmem:[%s10480_s7 + $0xc1c] ss:$28 sps:$4 sm:$0xff]  }
 0x443   :  { %5875 = vmatpush1.bf16.msra.mxu1 %v7761_v60 }
 0x444   :  { %5876 = vmatprep.subr.bf16.mxu1 %v7766_v61 }
 0x447   :  { %5877 = vmatpush1.bf16.msra.mxu1 %v7764_v62  ;;  %v7821_v62 = vld [vmem:[%s10480_s7 + $0xc18] ss:$28 sps:$4 sm:$0xff]  }
 0x448   :  { %5878 = vmatprep.subr.bf16.mxu1 %v7769_v3  ;;  %v7826_v3 = vld [vmem:[%s10480_s7 + $0xc54] ss:$28 sps:$4 sm:$0xff]  }
 0x44b   :  { %5879 = vmatpush1.bf16.msra.mxu1 %v7767_v4  ;;  %v7824_v4 = vld [vmem:[%s10480_s7 + $0xc50] ss:$28 sps:$4 sm:$0xff]  }
 0x44c   :  { %5880 = vmatprep.subr.bf16.mxu1 %v7772_v5  ;;  %v7829_v5 = vld [vmem:[%s10480_s7 + $0xc8c] ss:$28 sps:$4 sm:$0xff]  }
 0x44f   :  { %5881 = vmatpush1.bf16.msra.mxu1 %v7770_v6  ;;  %v7827_v6 = vld [vmem:[%s10480_s7 + $0xc88] ss:$28 sps:$4 sm:$0xff]  }
 0x450   :  { %5882 = vmatprep.subr.bf16.mxu1 %v7775_v7 }
 0x453   :  { %5883 = vmatpush1.bf16.msra.mxu1 %v7773_v49  ;;  %v7832_v49 = vld [vmem:[%s10480_s7 + $0xcc4] ss:$28 sps:$4 sm:$0xff]  }
 0x454   :  { %5884 = vmatprep.subr.bf16.mxu1 %v7778_v11 }
 0x457   :  { %5885 = vmatpush1.bf16.msra.mxu1 %v7776_v15 }
 0x458   :  { %5886 = vmatprep.subr.bf16.mxu1 %v7781_v55 }
 0x45b   :  { %5887 = vmatpush1.bf16.msra.mxu1 %v7779_v18 }
 0x45c   :  { %5888 = vmatprep.subr.bf16.mxu1 %v7784_v19 }
 0x45f   :  { %5889 = vmatpush1.bf16.msra.mxu1 %v7782_v9 }
 0x460   :  { %5890 = vmatprep.subr.bf16.mxu1 %v7787_v10 }
 0x463   :  { %5891 = vmatpush1.bf16.msra.mxu1 %v7785_v41  ;;  %v7830_v41 = vld [vmem:[%s10480_s7 + $0xcc0] ss:$28 sps:$4 sm:$0xff]  }
 0x464   :  { %5892 = vmatprep.subr.bf16.mxu1 %v7790_v13 }
 0x467   :  { %5893 = vmatpush1.bf16.msra.mxu1 %v7788_v16 }
 0x468   :  { %5894 = vmatprep.subr.bf16.mxu1 %v7793_v59  ;;  %v7835_v59 = vld [vmem:[%s10480_s7 + $0xcfc] ss:$28 sps:$4 sm:$0xff]  }
 0x46b   :  { %5895 = vmatpush1.bf16.msra.mxu1 %v7791_v17 }
 0x46c   :  { %5896 = vmatprep.subr.bf16.mxu1 %v7796_v22 }
 0x46f   :  { %5897 = vmatpush1.bf16.msra.mxu1 %v7794_v27  ;;  %v7833_v27 = vld [vmem:[%s10480_s7 + $0xcf8] ss:$28 sps:$4 sm:$0xff]  }
 0x470   :  { %5898 = vmatprep.subr.bf16.mxu1 %v7799_v28  ;;  %v7838_v28 = vld [vmem:[%s10480_s7 + $0xd34] ss:$28 sps:$4 sm:$0xff]  }
 0x473   :  { %5899 = vmatpush1.bf16.msra.mxu1 %v7797_v29  ;;  %v7836_v29 = vld [vmem:[%s10480_s7 + $0xd30] ss:$28 sps:$4 sm:$0xff]  }
 0x474   :  { %5909 = vmatprep.subr.bf16.mxu1 %v7802_v30  ;;  %v7841_v30 = vld [vmem:[%s10480_s7 + $0xd6c] ss:$28 sps:$4 sm:$0xff]  }
 0x476   :  { %5901 = vmatmul.mubr.bf16.vlgmr.msra.gmra.mrb[12].mxu1 %v9640_v63  ;;  %v7811_v63 = vld [vmem:[%s10480_s7 + $0xb3c] ss:$28 sps:$4 sm:$0xff]  }
 0x477   :  { %5910 = vmatpush1.bf16.msra.mxu1 %v7800_v31  ;;  %5941 = vmatprep.mubr.bf16.mxu1 %v9650_v23  ;;  %v7809_v23 = vld [vmem:[%s10480_s7 + $0xb38] ss:$28 sps:$4 sm:$0xff]   ;;  %v7839_v31 = vld [vmem:[%s10480_s7 + $0xd68] ss:$28 sps:$4 sm:$0xff]  }
 0x478   :  { %5911 = vmatprep.subr.bf16.mxu1 %v7805_v32  ;;  %v7844_v32 = vld [vmem:[%s10480_s7 + $0xda4] ss:$28 sps:$4 sm:$0xff]  }
 0x47b   :  { %5912 = vmatpush1.bf16.msra.mxu1 %v7803_v33 }
 0x47c   :  { %5913 = vmatprep.subr.bf16.mxu1 %v7808_v12 }
 0x47f   :  { %5914 = vmatpush1.bf16.msra.mxu1 %v7806_v34  ;;  %v7842_v34 = vld [vmem:[%s10480_s7 + $0xda0] ss:$28 sps:$4 sm:$0xff]  }
 0x480   :  { %5915 = vmatprep.subr.bf16.mxu1 %v7811_v63 }
 0x483   :  { %5916 = vmatpush1.bf16.msra.mxu1 %v7809_v23 }
 0x484   :  { %5917 = vmatprep.subr.bf16.mxu1 %v7814_v36  ;;  %v7847_v36 = vld [vmem:[%s10480_s7 + $0xddc] ss:$28 sps:$4 sm:$0xff]  }
 0x487   :  { %5918 = vmatpush1.bf16.msra.mxu1 %v7812_v37 }
 0x488   :  { %5919 = vmatprep.subr.bf16.mxu1 %v7817_v39  ;;  %v7845_v39 = vld [vmem:[%s10480_s7 + $0xdd8] ss:$28 sps:$4 sm:$0xff]  }
 0x489   :  { %v5615_v40 = vpop.f32.mrb[8].mxu1  ;;  %v5779_v14 = vpop.f32.mrb[20].mxu0 }
 0x48a   :  { %v7029_v48 = vadd.f32 %v5615_v40, %v3122_v0  ;;  %v7031_v50 = vadd.f32 %v5779_v14, %v3130_v43  ;;  %v5617_v8 = vpop.f32.mrb[9].mxu1  ;;  %v5781_v51 = vpop.f32.mrb[21].mxu0  ;;  %v3146_v0 = vrot.slane %v10367_v38, %v967_v2 }
 0x48b   :  { %v7030_v52 = vadd.f32 %v5617_v8, %v3126_v44  ;;  %v7032_v42 = vadd.f32 %v5781_v51, %v3134_v45  ;;  %v5619_v54 = vpop.f32.mrb[10].mxu1  ;;  %v5783_v56 = vpop.f32.mrb[22].mxu0  ;;  %5920 = vmatpush1.bf16.msra.mxu1 %v7815_v46 }
 0x48c   :  { %v6110_v57 = vmul.f32 0.5, %v7029_v48  ;;  %v6112_v25 = vmul.f32 0.5, %v7031_v50  ;;  %v5620_v58 = vpop.f32.mrb[11].mxu1  ;;  %v5784_v1 = vpop.f32.mrb[23].mxu0  ;;  %5921 = vmatprep.subr.bf16.mxu1 %v7820_v47 }
 0x48d   :  { %v6111_v60 = vmul.f32 0.5, %v7030_v52  ;;  %v6113_v61 = vmul.f32 0.5, %v7032_v42 }
 0x48e   :  { %7848 = vtanh.f32 %v6110_v57 }
 0x48f   :  { %7850 = vtanh.f32 %v6112_v25  ;;  %5922 = vmatpush1.bf16.msra.mxu1 %v7818_v53 }
 0x490   :  { %7852 = vtanh.f32 %v6111_v60  ;;  %5923 = vmatprep.subr.bf16.mxu1 %v7823_v26  ;;  %v3138_v60 = vrot.slane %v10367_v38, %v959_v20 }
 0x491   :  { %7854 = vtanh.f32 %v6113_v61  ;;  %v3142_v61 = vrot.slane %v10367_v38, %v963_v24 }
 0x493   :  { %5924 = vmatpush1.bf16.msra.mxu1 %v7821_v62 }
 0x494   :  { %5925 = vmatprep.subr.bf16.mxu1 %v7826_v3 }
 0x497   :  { %5926 = vmatpush1.bf16.msra.mxu1 %v7824_v4 }
 0x498   :  { %v7849_v7 = vpop.eup %7848  ;;  %5927 = vmatprep.subr.bf16.mxu1 %v7829_v5 }
 0x499   :  { %v7851_v11 = vpop.eup %7850  ;;  %v6124_v15 = vadd.f32 1.0, %v7849_v7 }
 0x49a   :  { %v7853_v55 = vpop.eup %7852  ;;  %v6126_v18 = vadd.f32 1.0, %v7851_v11 }
 0x49b   :  { %v7855_v19 = vpop.eup %7854  ;;  %v6131_v9 = vmul.f32 0.5, %v6124_v15  ;;  %v6125_v10 = vadd.f32 1.0, %v7853_v55  ;;  %5928 = vmatpush1.bf16.msra.mxu1 %v7827_v6 }
 0x49c   :  { %v6133_v13 = vmul.f32 0.5, %v6126_v18  ;;  %v6127_v16 = vadd.f32 1.0, %v7855_v19  ;;  %5929 = vmatprep.subr.bf16.mxu1 %v7832_v49 }
 0x49d   :  { %6138 = vst [vmem:[%s10483_s9] sm:$0xff] %v6131_v9  ;;  %v6132_v17 = vmul.f32 0.5, %v6125_v10 }
 0x49e   :  { %6140 = vst [vmem:[%s10483_s9 + $0x10] sm:$0xff] %v6133_v13  ;;  %v6134_v22 = vmul.f32 0.5, %v6127_v16 }
 0x49f   :  { %6139 = vst [vmem:[%s10483_s9 + $0x8] sm:$0xff] %v6132_v17  ;;  %5930 = vmatpush1.bf16.msra.mxu1 %v7830_v41 }
 0x4a0   :  { %6141 = vst [vmem:[%s10483_s9 + $0x18] sm:$0xff] %v6134_v22  ;;  %5931 = vmatprep.subr.bf16.mxu1 %v7835_v59 }
 0x4a3   :  { %5932 = vmatpush1.bf16.msra.mxu1 %v7833_v27 }
 0x4a4   :  { %5933 = vmatprep.subr.bf16.mxu1 %v7838_v28 }
 0x4a7   :  { %5934 = vmatpush1.bf16.msra.mxu1 %v7836_v29 }
 0x4a8   :  { %5935 = vmatprep.subr.bf16.mxu1 %v7841_v30 }
 0x4aa   :  { %v6949_v33 = vpop.f32.mrb[24].mxu0 }
 0x4ab   :  { %v6950_v12 = vpop.f32.mrb[25].mxu0  ;;  %5936 = vmatpush1.bf16.msra.mxu1 %v7839_v31 }
 0x4ac   :  { %v6951_v63 = vadd.f32 %v6950_v12, %v6949_v33  ;;  %v6952_v23 = vpop.f32.mrb[26].mxu0  ;;  %5937 = vmatprep.subr.bf16.mxu1 %v7844_v32 }
 0x4ad   :  { %v6953_v37 = vpop.f32.mrb[27].mxu0 }
 0x4ae   :  { %v5985_v45 = vadd.f32 %v6951_v63, %v3146_v0 }
 0x4af   :  { %5938 = vmatpush1.bf16.msra.mxu1 %v7842_v34 }
 0x4b0   :  { %5939 = vmatprep.subr.bf16.mxu1 %v7847_v36 }
 0x4b3   :  { %5940 = vmatpush1.bf16.msra.mxu1 %v7845_v39 }
 0x4b6   :  { %5942 = vmatmul.mubr.bf16.vlgmr.msra.gmra.mrb[12].mxu1 %v9844_v21 }
 0x4ca   :  { %v6971_v43 = vpop.f32.mrb[28].mxu0 }
 0x4cb   :  { %v6972_v44 = vpop.f32.mrb[29].mxu0 }
 0x4cc   :  { %v6973_v46 = vadd.f32 %v6972_v44, %v6971_v43  ;;  %v6974_v47 = vpop.f32.mrb[30].mxu0 }
 0x4cd   :  { %v6975_v40 = vpop.f32.mrb[31].mxu0 }
 0x4ce   :  { %v6025_v14 = vadd.f32 %v6973_v46, %v5985_v45 }
 0x4ea   :  { %v6993_v48 = vpop.f32.mrb[32].mxu0 }
 0x4eb   :  { %v6994_v50 = vpop.f32.mrb[33].mxu0 }
 0x4ec   :  { %v6995_v8 = vadd.f32 %v6994_v50, %v6993_v48  ;;  %v6996_v51 = vpop.f32.mrb[34].mxu0 }
 0x4ed   :  { %v6997_v52 = vpop.f32.mrb[35].mxu0 }
 0x4ee   :  { %v6065_v42 = vadd.f32 %v6995_v8, %v6025_v14 }
 0x50a   :  { %v7015_v54 = vpop.f32.mrb[36].mxu0 }
 0x50b   :  { %v7016_v56 = vpop.f32.mrb[37].mxu0 }
 0x50c   :  { %v7017_v21 = vadd.f32 %v7016_v56, %v7015_v54  ;;  %v7018_v53 = vpop.f32.mrb[38].mxu0 }
 0x50d   :  { %v7019_v57 = vpop.f32.mrb[39].mxu0 }
 0x50e   :  { %v6105_v25 = vadd.f32 %v7017_v21, %v6065_v42 }
 0x510   :  { %v6116_v2 = vmul.f32 0.5, %v6105_v25 }
 0x512   :  { %7856 = vtanh.f32 %v6116_v2 }
 0x51c   :  { %v7857_v58 = vpop.eup %7856 }
 0x51d   :  { %v6130_v1 = vadd.f32 1.0, %v7857_v58 }
 0x51f   :  { %v6137_v26 = vmul.f32 0.5, %v6130_v1 }
 0x521   :  { %6144 = vst [vmem:[%s10483_s9 + $0x30] sm:$0xff] %v6137_v26 }
 0x589   :  { %v5943_v62 = vpop.f32.mrb[12].mxu1 }
 0x58a   :  { %v7033_v3 = vadd.f32 %v5943_v62, %v3138_v60  ;;  %v5945_v4 = vpop.f32.mrb[13].mxu1 }
 0x58b   :  { %v7034_v5 = vadd.f32 %v5945_v4, %v3142_v61  ;;  %v5947_v6 = vpop.f32.mrb[14].mxu1 }
 0x58c   :  { %v6114_v7 = vmul.f32 0.5, %v7033_v3  ;;  %v5948_v49 = vpop.f32.mrb[15].mxu1 }
 0x58d   :  { %v6115_v11 = vmul.f32 0.5, %v7034_v5 }
 0x58e   :  { %7858 = vtanh.f32 %v6114_v7 }
 0x58f   :  { %7860 = vtanh.f32 %v6115_v11 }
 0x598   :  { %v7859_v15 = vpop.eup %7858 }
 0x599   :  { %v7861_v55 = vpop.eup %7860  ;;  %v6128_v18 = vadd.f32 1.0, %v7859_v15 }
 0x59a   :  { %v6129_v19 = vadd.f32 1.0, %v7861_v55 }
 0x59b   :  { %v6135_v9 = vmul.f32 0.5, %v6128_v18 }
 0x59c   :  { %v6136_v20 = vmul.f32 0.5, %v6129_v19 }
 0x59d   :  { %6142 = vst [vmem:[%s10483_s9 + $0x20] sm:$0xff] %v6135_v9 }
 0x59e   :  { %6143 = vst [vmem:[%s10483_s9 + $0x28] sm:$0xff] %v6136_v20 }

</bundles_post_ra>
